<compile_context>
chip_gen: v6e
topology: v6e:2x2x1
jax: 0.10.0
libtpu: 0.0.40
codegen_flags: <defaults>
</compile_context>

<pallas_src>
import functools
import math

import jax
import jax.numpy as jnp
from jax.experimental import pallas as pl
from jax.experimental.pallas import tpu as pltpu


# ---------------------------------------------------------------------------
# Pallas kernel
# ---------------------------------------------------------------------------
def _decoder_layer_kernel(x_ref, enc_ref,
                          wqkv_s_ref, bqkv_s_ref, wo_s_ref, bo_s_ref,
                          wqk_c_ref, bqk_c_ref, wv_c_ref, bv_c_ref,
                          wo_c_ref, bo_c_ref,
                          w1_ref, b1_ref, w2_ref, b2_ref,
                          gamma_ref, beta_ref, head_oh_ref,
                          out_ref,
                          qkv_scr, attn_scr,
                          *, num_heads, seq_len, batch_tile):
    f32 = jnp.float32
    cdt = wqkv_s_ref.dtype                     # matmul compute dtype (bf16)
    _, D = x_ref.shape                         # rows = batch_tile * seq_len
    H, S = num_heads, seq_len
    HS = H * S

    # Constants (built in the wrapper, DMA'd once per call, read once per step).
    head_oh_f = head_oh_ref[...].astype(f32)   # [H, D] per-head lane one-hot
    head_oh_c = head_oh_f.astype(cdt)

    x = x_ref[...].astype(f32)                 # residual stream kept in f32
    enc_c = enc_ref[...].astype(cdt)           # encoder_out only feeds matmuls

    def linear(a_c, w_ref, b_ref):
        # bf16 x bf16 -> f32 accumulation on the MXU; bias added in f32.
        return jnp.dot(a_c, w_ref[...], preferred_element_type=f32) + b_ref[...]

    def layer_norm(h, i):
        g = gamma_ref[i].astype(f32)
        b = beta_ref[i].astype(f32)
        mu = jnp.mean(h, axis=-1, keepdims=True)
        var = jnp.mean(jnp.square(h - mu), axis=-1, keepdims=True)
        return (h - mu) * jax.lax.rsqrt(var + 1e-5) * g + b

    def attention():
        # Multi-head attention on the Q|K|V held in qkv_scr (bf16, Q already
        # pre-scaled by 1/sqrt(d_k)).  Per sequence:
        #   Q expanded block-diagonally -> one [HS, D] x [S, D]^T matmul gives
        #   per-(head, query) score rows, plain per-row softmax (per-head max),
        #   P @ V, then H static masked row-slices recover concatenated heads.
        # Results go straight into attn_scr (bf16): bounded live ranges, no
        # list/concatenate across the batch loop.
        def body(b, carry):
            r0 = pl.multiple_of(b * S, S)
            qb = qkv_scr[pl.ds(r0, S), :D]                       # [S, D] bf16
            kb = qkv_scr[pl.ds(r0, S), D:2 * D]
            vb = qkv_scr[pl.ds(r0, S), 2 * D:]
            # block-diagonal Q expansion via broadcast-multiply (no concat)
            q_exp = (qb[None, :, :] * head_oh_c[:, None, :]).reshape(HS, D)
            s = jax.lax.dot_general(q_exp, kb, (((1,), (1,)), ((), ())),
                                    preferred_element_type=f32)   # [HS, S]
            m = jnp.max(s, axis=-1, keepdims=True)      # per-(head, query) max
            e = jnp.exp(s - m)
            den = jnp.sum(e, axis=-1, keepdims=True)    # >= 1 -> approx recip safe
            p = (e * pl.reciprocal(den, approx=True)).astype(cdt)
            res = jnp.dot(p, vb, preferred_element_type=f32)      # [HS, D]
            # recover concatenated heads: lane d takes row-block head(d)
            o = res[0:S, :] * head_oh_f[0:1, :]
            for h in range(1, H):                       # static, H is small
                o = o + res[h * S:(h + 1) * S, :] * head_oh_f[h:h + 1, :]
            attn_scr[pl.ds(r0, S), :] = o.astype(cdt)
            return carry

        jax.lax.fori_loop(0, batch_tile, body, 0, unroll=True)

    # ---- self attention: Q = K = V = x (target_mask unused, as in the module)
    qkv = linear(x.astype(cdt), wqkv_s_ref, bqkv_s_ref)           # [rows, 3D]
    qkv_scr[...] = qkv.astype(cdt)
    attention()
    a1 = linear(attn_scr[...], wo_s_ref, bo_s_ref)
    h1 = layer_norm(x + a1, 0)
    h1_c = h1.astype(cdt)                                         # cached cast

    # ---- cross attention: Q = K = encoder_out, V = h1 (mirrors the torch call)
    qk = linear(enc_c, wqk_c_ref, bqk_c_ref)                      # [rows, 2D]
    v2 = linear(h1_c, wv_c_ref, bv_c_ref)                         # [rows, D]
    qkv_scr[:, :2 * D] = qk.astype(cdt)
    qkv_scr[:, 2 * D:] = v2.astype(cdt)
    attention()
    a2 = linear(attn_scr[...], wo_c_ref, bo_c_ref)
    h2 = layer_norm(h1 + a2, 1)
    h2_c = h2.astype(cdt)

    # ---- feed forward --------------------------------------------------------
    f = jnp.maximum(linear(h2_c, w1_ref, b1_ref), 0.0)
    f = linear(f.astype(cdt), w2_ref, b2_ref)
    out = layer_norm(h2 + f, 2)

    out_ref[...] = out.astype(out_ref.dtype)


# ---------------------------------------------------------------------------
# wrapper
# ---------------------------------------------------------------------------
def decoder_layer(x, encoder_out, kernel_params, *, num_heads,
                  src_mask=None, target_mask=None, batch_tile=None):
    """DecoderLayer forward.  Masks are accepted but unused (the PyTorch
    MultiHeadAttention.forward never applies `mask`)."""
    del src_mask, target_mask
    B, S, D = x.shape
    assert encoder_out.shape == (B, S, D)
    assert D % num_heads == 0

    if batch_tile is None:
        # Row block <= 256 rows, sublane-aligned, and preferably >= 4 grid
        # steps so the pipeline has DMAs to hide (>= 2 steps/TC on v7x).
        divisors = [c for c in range(1, B + 1)
                    if B % c == 0 and (c * S) % 8 == 0 and c * S <= 256]
        if not divisors:
            divisors = [B]                      # full-array block (exempt shape)
        preferred = [c for c in divisors if B // c >= 4]
        batch_tile = max(preferred) if preferred else max(divisors)
    assert B % batch_tile == 0
    rows = batch_tile * S
    grid = (B // batch_tile,)

    # flatten [B, S, D] -> [B*S, D] (free) so the kernel sees lane-dense 2-D
    # activation blocks and produces lane-dense output stores.
    x2 = x.reshape(B * S, D)
    enc2 = encoder_out.reshape(B * S, D)

    # per-head lane one-hot, precomputed once here (not rebuilt per grid step)
    d_k = D // num_heads
    head_oh = (jnp.arange(D, dtype=jnp.int32)[None, :] // d_k
               == jnp.arange(num_heads, dtype=jnp.int32)[:, None]
               ).astype(jnp.float32)                                  # [H, D]

    kernel = functools.partial(_decoder_layer_kernel, num_heads=num_heads,
                               seq_len=S, batch_tile=batch_tile)

    # Constant operands keep the same block index every grid step -> single
    # VMEM buffer (DMA'd once, not double-buffered).
    const_kw = {}
    if hasattr(pl, "Buffered"):
        const_kw = dict(pipeline_mode=pl.Buffered(1))

    def const_spec(arr):
        nd = arr.ndim
        return pl.BlockSpec(arr.shape, lambda *_: (0,) * nd, **const_kw)

    def act_spec():
        return pl.BlockSpec((rows, D), lambda i: (i, 0))

    consts = tuple(kernel_params) + (head_oh,)
    in_specs = [act_spec(), act_spec()] + [const_spec(c) for c in consts]
    cdt = kernel_params[0].dtype

    # NOTE: at production d_model/d_inner, add a grid axis blocking the FFN
    # over d_inner (and the fused QKV over its N dim) instead of keeping all
    # weights resident, to stay inside v7x's 64 MiB VMEM.
    out2 = pl.pallas_call(
        kernel,
        out_shape=jax.ShapeDtypeStruct((B * S, D), x.dtype),
        grid_spec=pltpu.PrefetchScalarGridSpec(
            num_scalar_prefetch=0,
            grid=grid,
            in_specs=in_specs,
            out_specs=pl.BlockSpec((rows, D), lambda i: (i, 0)),
            scratch_shapes=[
                pltpu.VMEM((rows, 3 * D), cdt),   # Q | K | V of active attention
                pltpu.VMEM((rows, D), cdt),       # per-sequence attention output
            ],
        ),
        compiler_params=pltpu.CompilerParams(
            dimension_semantics=("parallel",),    # shard batch blocks over 2 TCs
            vmem_limit_bytes=32 * 1024 * 1024,
        ),
    )(x2, enc2, *consts)

    return out2.reshape(B, S, D)


# ---------------------------------------------------------------------------
# parameter construction / preparation
# ---------------------------------------------------------------------------
def init_raw_params(key, d_model, d_inner):
    """Raw parameters in y = x @ W + b convention (transpose of torch)."""
    ks = jax.random.split(key, 4)
    s = 0.05

    def linear(k, din, dout):
        kw, kb = jax.random.split(k)
        return (jax.random.normal(kw, (din, dout), jnp.float32) * s,
                jax.random.normal(kb, (dout,), jnp.float32) * s)

    def mha(k):
        k1, k2, k3, k4 = jax.random.split(k, 4)
        wq, bq = linear(k1, d_model, d_model)
        wk, bk = linear(k2, d_model, d_model)
        wv, bv = linear(k3, d_model, d_model)
        wo, bo = linear(k4, d_model, d_model)
        return (wq, bq, wk, bk, wv, bv, wo, bo)

    sa = mha(ks[0])                 # self attention
    ca = mha(ks[1])                 # cross attention
    w1, b1 = linear(ks[2], d_model, d_inner)
    w2, b2 = linear(ks[3], d_inner, d_model)
    gamma = jnp.ones((3, d_model), jnp.float32)    # nn.LayerNorm default init
    beta = jnp.zeros((3, d_model), jnp.float32)
    return (sa, ca, w1, b1, w2, b2, gamma, beta)


def prepare_params(raw, num_heads, compute_dtype=jnp.bfloat16):
    """Fuse QKV weights, fold 1/sqrt(d_k) into Wq/bq, cast weights to bf16
    (biases / LN params stay f32)."""
    sa, ca, w1, b1, w2, b2, gamma, beta = raw
    wq_s, bq_s, wk_s, bk_s, wv_s, bv_s, wo_s, bo_s = sa
    wq_c, bq_c, wk_c, bk_c, wv_c, bv_c, wo_c, bo_c = ca
    D = wq_s.shape[0]
    scale = 1.0 / math.sqrt(D // num_heads)

    wqkv_s = jnp.concatenate([wq_s * scale, wk_s, wv_s], axis=1).astype(compute_dtype)
    bqkv_s = jnp.concatenate([bq_s * scale, bk_s, bv_s])[None, :].astype(jnp.float32)
    wqk_c = jnp.concatenate([wq_c * scale, wk_c], axis=1).astype(compute_dtype)
    bqk_c = jnp.concatenate([bq_c * scale, bk_c])[None, :].astype(jnp.float32)

    return (wqkv_s, bqkv_s,
            wo_s.astype(compute_dtype), bo_s[None, :].astype(jnp.float32),
            wqk_c, bqk_c,
            wv_c.astype(compute_dtype), bv_c[None, :].astype(jnp.float32),
            wo_c.astype(compute_dtype), bo_c[None, :].astype(jnp.float32),
            w1.astype(compute_dtype), b1[None, :].astype(jnp.float32),
            w2.astype(compute_dtype), b2[None, :].astype(jnp.float32),
            gamma.astype(jnp.float32), beta.astype(jnp.float32))


# ---------------------------------------------------------------------------
# pure-JAX reference (independent per-head formulation; same bf16 matmul /
# f32 accumulation precision policy as the kernel)
# ---------------------------------------------------------------------------
def _ref_linear(a, w, b, cdt=jnp.bfloat16):
    return (jnp.einsum('bsd,de->bse', a.astype(cdt), w.astype(cdt),
                       preferred_element_type=jnp.float32)
            + b.astype(jnp.float32))


def _ref_layer_norm(h, g, b, eps=1e-5):
    mu = jnp.mean(h, axis=-1, keepdims=True)
    var = jnp.mean((h - mu) ** 2, axis=-1, keepdims=True)
    return (h - mu) * jax.lax.rsqrt(var + eps) * g + b


def _ref_mha(q_in, k_in, v_in, p, num_heads):
    wq, bq, wk, bk, wv, bv, wo, bo = p
    cdt = jnp.bfloat16
    q = _ref_linear(q_in, wq, bq)
    k = _ref_linear(k_in, wk, bk)
    v = _ref_linear(v_in, wv, bv)
    B, S, D = q.shape
    dk = D // num_heads

    def split(t):
        return t.reshape(B, S, num_heads, dk).transpose(0, 2, 1, 3)

    qh, kh, vh = split(q), split(k), split(v)
    s = jnp.einsum('bhqd,bhkd->bhqk', qh.astype(cdt), kh.astype(cdt),
                   preferred_element_type=jnp.float32) / math.sqrt(dk)
    s = s - jnp.max(s, axis=-1, keepdims=True)
    pm = jnp.exp(s)
    pm = pm / jnp.sum(pm, axis=-1, keepdims=True)
    o = jnp.einsum('bhqk,bhkd->bhqd', pm.astype(cdt), vh.astype(cdt),
                   preferred_element_type=jnp.float32)
    o = o.transpose(0, 2, 1, 3).reshape(B, S, D)
    return _ref_linear(o, wo, bo)


def reference_decoder_layer(x, enc, raw, num_heads):
    sa, ca, w1, b1, w2, b2, gamma, beta = raw
    a1 = _ref_mha(x, x, x, sa, num_heads)
    h1 = _ref_layer_norm(x + a1, gamma[0], beta[0])
    a2 = _ref_mha(enc, enc, h1, ca, num_heads)      # Q=K=enc, V=h1 (as in torch)
    h2 = _ref_layer_norm(h1 + a2, gamma[1], beta[1])
    f = jnp.maximum(_ref_linear(h2, w1, b1), 0.0)
    f = _ref_linear(f, w2, b2)
    return _ref_layer_norm(h2 + f, gamma[2], beta[2])


# ---------------------------------------------------------------------------
if __name__ == "__main__":
    B, S, D, Di, H = 16, 16, 128, 256, 4     # small but lane/sublane-friendly
    key = jax.random.PRNGKey(0)
    kx, ke, kp = jax.random.split(key, 3)
    x = jax.random.normal(kx, (B, S, D), jnp.float32)
    encoder_out = jax.random.normal(ke, (B, S, D), jnp.float32)

    raw_params = init_raw_params(kp, D, Di)
    kparams = prepare_params(raw_params, H)

    out = decoder_layer(x, encoder_out, kparams, num_heads=H,
                        src_mask=None, target_mask=None)
    out = jax.block_until_ready(out)

    ref = jax.block_until_ready(reference_decoder_layer(x, encoder_out,
                                                        raw_params, H))
    assert out.shape == (B, S, D)
    max_err = float(jnp.max(jnp.abs(out - ref)))
    # tolerance covers bf16 matmul rounding (incl. the scale folded into Wq)
    # and the EUP approximate reciprocal vs the reference's exact division.
    assert jnp.allclose(out, ref, atol=3e-2, rtol=3e-2), f"max abs err {max_err}"

    print("KERNEL_OK")
</pallas_src>

<mosaic_0001>
module attributes {stable_mosaic.version = 11 : i64} {
  func.func @_decoder_layer_kernel(%arg0: i32, %arg1: memref<64x128xf32, #tpu.memory_space<vmem>>, %arg2: memref<64x128xf32, #tpu.memory_space<vmem>>, %arg3: memref<128x384xbf16, #tpu.memory_space<vmem>>, %arg4: memref<1x384xf32, #tpu.memory_space<vmem>>, %arg5: memref<128x128xbf16, #tpu.memory_space<vmem>>, %arg6: memref<1x128xf32, #tpu.memory_space<vmem>>, %arg7: memref<128x256xbf16, #tpu.memory_space<vmem>>, %arg8: memref<1x256xf32, #tpu.memory_space<vmem>>, %arg9: memref<128x128xbf16, #tpu.memory_space<vmem>>, %arg10: memref<1x128xf32, #tpu.memory_space<vmem>>, %arg11: memref<128x128xbf16, #tpu.memory_space<vmem>>, %arg12: memref<1x128xf32, #tpu.memory_space<vmem>>, %arg13: memref<128x256xbf16, #tpu.memory_space<vmem>>, %arg14: memref<1x256xf32, #tpu.memory_space<vmem>>, %arg15: memref<256x128xbf16, #tpu.memory_space<vmem>>, %arg16: memref<1x128xf32, #tpu.memory_space<vmem>>, %arg17: memref<3x128xf32, #tpu.memory_space<vmem>>, %arg18: memref<3x128xf32, #tpu.memory_space<vmem>>, %arg19: memref<4x128xf32, #tpu.memory_space<vmem>>, %arg20: memref<64x128xf32, #tpu.memory_space<vmem>>, %arg21: memref<64x384xbf16, #tpu.memory_space<vmem>>, %arg22: memref<64x128xbf16, #tpu.memory_space<vmem>>) attributes {dimension_semantics = [#tpu.dimension_semantics<parallel>], iteration_bounds = array<i64: 4>, scalar_prefetch = 0 : i64, scratch_operands = 2 : i64, tpu.core_type = #tpu.core_type<tc>, window_params = [{transform_indices = @transform_0, window_bounds = array<i64: 64, 128>}, {transform_indices = @transform_1, window_bounds = array<i64: 64, 128>}, {pipeline_mode = #tpu.pipeline_mode<synchronous>, transform_indices = @transform_2, window_bounds = array<i64: 128, 384>}, {pipeline_mode = #tpu.pipeline_mode<synchronous>, transform_indices = @transform_3, window_bounds = array<i64: 1, 384>}, {pipeline_mode = #tpu.pipeline_mode<synchronous>, transform_indices = @transform_4, window_bounds = array<i64: 128, 128>}, {pipeline_mode = #tpu.pipeline_mode<synchronous>, transform_indices = @transform_5, window_bounds = array<i64: 1, 128>}, {pipeline_mode = #tpu.pipeline_mode<synchronous>, transform_indices = @transform_6, window_bounds = array<i64: 128, 256>}, {pipeline_mode = #tpu.pipeline_mode<synchronous>, transform_indices = @transform_7, window_bounds = array<i64: 1, 256>}, {pipeline_mode = #tpu.pipeline_mode<synchronous>, transform_indices = @transform_8, window_bounds = array<i64: 128, 128>}, {pipeline_mode = #tpu.pipeline_mode<synchronous>, transform_indices = @transform_9, window_bounds = array<i64: 1, 128>}, {pipeline_mode = #tpu.pipeline_mode<synchronous>, transform_indices = @transform_10, window_bounds = array<i64: 128, 128>}, {pipeline_mode = #tpu.pipeline_mode<synchronous>, transform_indices = @transform_11, window_bounds = array<i64: 1, 128>}, {pipeline_mode = #tpu.pipeline_mode<synchronous>, transform_indices = @transform_12, window_bounds = array<i64: 128, 256>}, {pipeline_mode = #tpu.pipeline_mode<synchronous>, transform_indices = @transform_13, window_bounds = array<i64: 1, 256>}, {pipeline_mode = #tpu.pipeline_mode<synchronous>, transform_indices = @transform_14, window_bounds = array<i64: 256, 128>}, {pipeline_mode = #tpu.pipeline_mode<synchronous>, transform_indices = @transform_15, window_bounds = array<i64: 1, 128>}, {pipeline_mode = #tpu.pipeline_mode<synchronous>, transform_indices = @transform_16, window_bounds = array<i64: 3, 128>}, {pipeline_mode = #tpu.pipeline_mode<synchronous>, transform_indices = @transform_17, window_bounds = array<i64: 3, 128>}, {pipeline_mode = #tpu.pipeline_mode<synchronous>, transform_indices = @transform_18, window_bounds = array<i64: 4, 128>}, {transform_indices = @transform_19, window_bounds = array<i64: 64, 128>}]} {
    %c0 = arith.constant 0 : index
    %c0_0 = arith.constant 0 : index
    %0 = vector.load %arg19[%c0, %c0_0] : memref<4x128xf32, #tpu.memory_space<vmem>>, vector<4x128xf32>
    %1 = arith.truncf %0 : vector<4x128xf32> to vector<4x128xbf16>
    %c0_1 = arith.constant 0 : index
    %c0_2 = arith.constant 0 : index
    %2 = vector.load %arg1[%c0_1, %c0_2] : memref<64x128xf32, #tpu.memory_space<vmem>>, vector<64x128xf32>
    %c0_3 = arith.constant 0 : index
    %c0_4 = arith.constant 0 : index
    %3 = vector.load %arg2[%c0_3, %c0_4] : memref<64x128xf32, #tpu.memory_space<vmem>>, vector<64x128xf32>
    %4 = arith.truncf %3 : vector<64x128xf32> to vector<64x128xbf16>
    %5 = arith.truncf %2 : vector<64x128xf32> to vector<64x128xbf16>
    %c0_5 = arith.constant 0 : index
    %c0_6 = arith.constant 0 : index
    %6 = vector.load %arg3[%c0_5, %c0_6] : memref<128x384xbf16, #tpu.memory_space<vmem>>, vector<128x384xbf16>
    %cst = arith.constant dense<0.000000e+00> : vector<64x384xf32>
    %7 = tpu.matmul %5, %6, %cst {dimension_numbers = #tpu.dot_dimension_numbers<[1], [0], [0], [1], [0, 0, 1, 1], [], []>} : vector<64x128xbf16>, vector<128x384xbf16>, vector<64x384xf32> -> vector<64x384xf32>
    %c0_7 = arith.constant 0 : index
    %c0_8 = arith.constant 0 : index
    %8 = vector.load %arg4[%c0_7, %c0_8] : memref<1x384xf32, #tpu.memory_space<vmem>>, vector<1x384xf32>
    %9 = vector.broadcast %8 : vector<1x384xf32> to vector<64x384xf32>
    %10 = arith.addf %7, %9 : vector<64x384xf32>
    %11 = arith.truncf %10 : vector<64x384xf32> to vector<64x384xbf16>
    %c0_9 = arith.constant 0 : index
    %c0_10 = arith.constant 0 : index
    %12 = vector.load %arg21[%c0_9, %c0_10] : memref<64x384xbf16, #tpu.memory_space<vmem>>, vector<64x384xbf16>
    tpu.vector_store %arg21[%c0_9, %c0_10], %11 {strides = array<i32>} : memref<64x384xbf16, #tpu.memory_space<vmem>>, vector<64x384xbf16>,
    %c0_i32 = arith.constant 0 : i32
    %c16_i32 = arith.constant 16 : i32
    %13 = arith.muli %c0_i32, %c16_i32 : i32
    %14 = tpu.assume_multiple %13, 16 : i32
    %15 = arith.index_cast %14 : i32 to index
    %c0_11 = arith.constant 0 : index
    %16 = vector.load %arg21[%15, %c0_11] : memref<64x384xbf16, #tpu.memory_space<vmem>>, vector<16x128xbf16>
    %17 = arith.index_cast %14 : i32 to index
    %c128 = arith.constant 128 : index
    %18 = vector.load %arg21[%17, %c128] : memref<64x384xbf16, #tpu.memory_space<vmem>>, vector<16x128xbf16>
    %19 = arith.index_cast %14 : i32 to index
    %c256 = arith.constant 256 : index
    %20 = vector.load %arg21[%19, %c256] : memref<64x384xbf16, #tpu.memory_space<vmem>>, vector<16x128xbf16>
    %21 = vector.shape_cast %16 : vector<16x128xbf16> to vector<1x16x128xbf16>
    %22 = vector.shape_cast %1 : vector<4x128xbf16> to vector<4x1x128xbf16>
    %23 = vector.broadcast %21 : vector<1x16x128xbf16> to vector<4x16x128xbf16>
    %24 = vector.broadcast %22 : vector<4x1x128xbf16> to vector<4x16x128xbf16>
    %25 = arith.mulf %23, %24 : vector<4x16x128xbf16>
    %26 = vector.shape_cast %25 : vector<4x16x128xbf16> to vector<64x128xbf16>
    %cst_12 = arith.constant dense<0.000000e+00> : vector<64x16xf32>
    %27 = tpu.matmul %26, %18, %cst_12 {dimension_numbers = #tpu.dot_dimension_numbers<[1], [1], [0], [0], [0, 0, 1, 0], [], []>} : vector<64x128xbf16>, vector<16x128xbf16>, vector<64x16xf32> -> vector<64x16xf32>
    %cst_13 = arith.constant dense<0xFF800000> : vector<64xf32>
    %28 = vector.multi_reduction <maximumf>, %27, %cst_13 [1] : vector<64x16xf32> to vector<64xf32>
    %29 = vector.shape_cast %28 : vector<64xf32> to vector<64x1xf32>
    %30 = vector.broadcast %29 : vector<64x1xf32> to vector<64x16xf32>
    %31 = arith.subf %27, %30 : vector<64x16xf32>
    %32 = math.exp %31 : vector<64x16xf32>
    %cst_14 = arith.constant dense<0.000000e+00> : vector<64xf32>
    %33 = vector.multi_reduction <add>, %32, %cst_14 [1] : vector<64x16xf32> to vector<64xf32>
    %34 = vector.shape_cast %33 : vector<64xf32> to vector<64x1xf32>
    %35 = tpu.reciprocal %34 {approx = true} : vector<64x1xf32> -> vector<64x1xf32>
    %36 = vector.broadcast %35 : vector<64x1xf32> to vector<64x16xf32>
    %37 = arith.mulf %32, %36 : vector<64x16xf32>
    %38 = arith.truncf %37 : vector<64x16xf32> to vector<64x16xbf16>
    %cst_15 = arith.constant dense<0.000000e+00> : vector<64x128xf32>
    %39 = tpu.matmul %38, %20, %cst_15 {dimension_numbers = #tpu.dot_dimension_numbers<[1], [0], [0], [1], [0, 0, 1, 1], [], []>} : vector<64x16xbf16>, vector<16x128xbf16>, vector<64x128xf32> -> vector<64x128xf32>
    %40 = vector.extract_strided_slice %39 {offsets = [0, 0], sizes = [16, 128], strides = [1, 1]} : vector<64x128xf32> to vector<16x128xf32>
    %41 = vector.extract_strided_slice %0 {offsets = [0, 0], sizes = [1, 128], strides = [1, 1]} : vector<4x128xf32> to vector<1x128xf32>
    %42 = vector.broadcast %41 : vector<1x128xf32> to vector<16x128xf32>
    %43 = arith.mulf %40, %42 : vector<16x128xf32>
    %44 = vector.extract_strided_slice %39 {offsets = [16, 0], sizes = [16, 128], strides = [1, 1]} : vector<64x128xf32> to vector<16x128xf32>
    %45 = vector.extract_strided_slice %0 {offsets = [1, 0], sizes = [1, 128], strides = [1, 1]} : vector<4x128xf32> to vector<1x128xf32>
    %46 = vector.broadcast %45 : vector<1x128xf32> to vector<16x128xf32>
    %47 = arith.mulf %44, %46 : vector<16x128xf32>
    %48 = arith.addf %43, %47 : vector<16x128xf32>
    %49 = vector.extract_strided_slice %39 {offsets = [32, 0], sizes = [16, 128], strides = [1, 1]} : vector<64x128xf32> to vector<16x128xf32>
    %50 = vector.extract_strided_slice %0 {offsets = [2, 0], sizes = [1, 128], strides = [1, 1]} : vector<4x128xf32> to vector<1x128xf32>
    %51 = vector.broadcast %50 : vector<1x128xf32> to vector<16x128xf32>
    %52 = arith.mulf %49, %51 : vector<16x128xf32>
    %53 = arith.addf %48, %52 : vector<16x128xf32>
    %54 = vector.extract_strided_slice %39 {offsets = [48, 0], sizes = [16, 128], strides = [1, 1]} : vector<64x128xf32> to vector<16x128xf32>
    %55 = vector.extract_strided_slice %0 {offsets = [3, 0], sizes = [1, 128], strides = [1, 1]} : vector<4x128xf32> to vector<1x128xf32>
    %56 = vector.broadcast %55 : vector<1x128xf32> to vector<16x128xf32>
    %57 = arith.mulf %54, %56 : vector<16x128xf32>
    %58 = arith.addf %53, %57 : vector<16x128xf32>
    %59 = arith.truncf %58 : vector<16x128xf32> to vector<16x128xbf16>
    %60 = arith.index_cast %14 : i32 to index
    %c0_16 = arith.constant 0 : index
    %61 = vector.load %arg22[%60, %c0_16] : memref<64x128xbf16, #tpu.memory_space<vmem>>, vector<16x128xbf16>
    tpu.vector_store %arg22[%60, %c0_16], %59 {strides = array<i32>} : memref<64x128xbf16, #tpu.memory_space<vmem>>, vector<16x128xbf16>,
    %c1_i32 = arith.constant 1 : i32
    %c16_i32_17 = arith.constant 16 : i32
    %62 = arith.muli %c1_i32, %c16_i32_17 : i32
    %63 = tpu.assume_multiple %62, 16 : i32
    %64 = arith.index_cast %63 : i32 to index
    %c0_18 = arith.constant 0 : index
    %65 = vector.load %arg21[%64, %c0_18] : memref<64x384xbf16, #tpu.memory_space<vmem>>, vector<16x128xbf16>
    %66 = arith.index_cast %63 : i32 to index
    %c128_19 = arith.constant 128 : index
    %67 = vector.load %arg21[%66, %c128_19] : memref<64x384xbf16, #tpu.memory_space<vmem>>, vector<16x128xbf16>
    %68 = arith.index_cast %63 : i32 to index
    %c256_20 = arith.constant 256 : index
    %69 = vector.load %arg21[%68, %c256_20] : memref<64x384xbf16, #tpu.memory_space<vmem>>, vector<16x128xbf16>
    %70 = vector.shape_cast %65 : vector<16x128xbf16> to vector<1x16x128xbf16>
    %71 = vector.shape_cast %1 : vector<4x128xbf16> to vector<4x1x128xbf16>
    %72 = vector.broadcast %70 : vector<1x16x128xbf16> to vector<4x16x128xbf16>
    %73 = vector.broadcast %71 : vector<4x1x128xbf16> to vector<4x16x128xbf16>
    %74 = arith.mulf %72, %73 : vector<4x16x128xbf16>
    %75 = vector.shape_cast %74 : vector<4x16x128xbf16> to vector<64x128xbf16>
    %cst_21 = arith.constant dense<0.000000e+00> : vector<64x16xf32>
    %76 = tpu.matmul %75, %67, %cst_21 {dimension_numbers = #tpu.dot_dimension_numbers<[1], [1], [0], [0], [0, 0, 1, 0], [], []>} : vector<64x128xbf16>, vector<16x128xbf16>, vector<64x16xf32> -> vector<64x16xf32>
    %cst_22 = arith.constant dense<0xFF800000> : vector<64xf32>
    %77 = vector.multi_reduction <maximumf>, %76, %cst_22 [1] : vector<64x16xf32> to vector<64xf32>
    %78 = vector.shape_cast %77 : vector<64xf32> to vector<64x1xf32>
    %79 = vector.broadcast %78 : vector<64x1xf32> to vector<64x16xf32>
    %80 = arith.subf %76, %79 : vector<64x16xf32>
    %81 = math.exp %80 : vector<64x16xf32>
    %cst_23 = arith.constant dense<0.000000e+00> : vector<64xf32>
    %82 = vector.multi_reduction <add>, %81, %cst_23 [1] : vector<64x16xf32> to vector<64xf32>
    %83 = vector.shape_cast %82 : vector<64xf32> to vector<64x1xf32>
    %84 = tpu.reciprocal %83 {approx = true} : vector<64x1xf32> -> vector<64x1xf32>
    %85 = vector.broadcast %84 : vector<64x1xf32> to vector<64x16xf32>
    %86 = arith.mulf %81, %85 : vector<64x16xf32>
    %87 = arith.truncf %86 : vector<64x16xf32> to vector<64x16xbf16>
    %cst_24 = arith.constant dense<0.000000e+00> : vector<64x128xf32>
    %88 = tpu.matmul %87, %69, %cst_24 {dimension_numbers = #tpu.dot_dimension_numbers<[1], [0], [0], [1], [0, 0, 1, 1], [], []>} : vector<64x16xbf16>, vector<16x128xbf16>, vector<64x128xf32> -> vector<64x128xf32>
    %89 = vector.extract_strided_slice %88 {offsets = [0, 0], sizes = [16, 128], strides = [1, 1]} : vector<64x128xf32> to vector<16x128xf32>
    %90 = vector.extract_strided_slice %0 {offsets = [0, 0], sizes = [1, 128], strides = [1, 1]} : vector<4x128xf32> to vector<1x128xf32>
    %91 = vector.broadcast %90 : vector<1x128xf32> to vector<16x128xf32>
    %92 = arith.mulf %89, %91 : vector<16x128xf32>
    %93 = vector.extract_strided_slice %88 {offsets = [16, 0], sizes = [16, 128], strides = [1, 1]} : vector<64x128xf32> to vector<16x128xf32>
    %94 = vector.extract_strided_slice %0 {offsets = [1, 0], sizes = [1, 128], strides = [1, 1]} : vector<4x128xf32> to vector<1x128xf32>
    %95 = vector.broadcast %94 : vector<1x128xf32> to vector<16x128xf32>
    %96 = arith.mulf %93, %95 : vector<16x128xf32>
    %97 = arith.addf %92, %96 : vector<16x128xf32>
    %98 = vector.extract_strided_slice %88 {offsets = [32, 0], sizes = [16, 128], strides = [1, 1]} : vector<64x128xf32> to vector<16x128xf32>
    %99 = vector.extract_strided_slice %0 {offsets = [2, 0], sizes = [1, 128], strides = [1, 1]} : vector<4x128xf32> to vector<1x128xf32>
    %100 = vector.broadcast %99 : vector<1x128xf32> to vector<16x128xf32>
    %101 = arith.mulf %98, %100 : vector<16x128xf32>
    %102 = arith.addf %97, %101 : vector<16x128xf32>
    %103 = vector.extract_strided_slice %88 {offsets = [48, 0], sizes = [16, 128], strides = [1, 1]} : vector<64x128xf32> to vector<16x128xf32>
    %104 = vector.extract_strided_slice %0 {offsets = [3, 0], sizes = [1, 128], strides = [1, 1]} : vector<4x128xf32> to vector<1x128xf32>
    %105 = vector.broadcast %104 : vector<1x128xf32> to vector<16x128xf32>
    %106 = arith.mulf %103, %105 : vector<16x128xf32>
    %107 = arith.addf %102, %106 : vector<16x128xf32>
    %108 = arith.truncf %107 : vector<16x128xf32> to vector<16x128xbf16>
    %109 = arith.index_cast %63 : i32 to index
    %c0_25 = arith.constant 0 : index
    %110 = vector.load %arg22[%109, %c0_25] : memref<64x128xbf16, #tpu.memory_space<vmem>>, vector<16x128xbf16>
    tpu.vector_store %arg22[%109, %c0_25], %108 {strides = array<i32>} : memref<64x128xbf16, #tpu.memory_space<vmem>>, vector<16x128xbf16>,
    %c2_i32 = arith.constant 2 : i32
    %c16_i32_26 = arith.constant 16 : i32
    %111 = arith.muli %c2_i32, %c16_i32_26 : i32
    %112 = tpu.assume_multiple %111, 16 : i32
    %113 = arith.index_cast %112 : i32 to index
    %c0_27 = arith.constant 0 : index
    %114 = vector.load %arg21[%113, %c0_27] : memref<64x384xbf16, #tpu.memory_space<vmem>>, vector<16x128xbf16>
    %115 = arith.index_cast %112 : i32 to index
    %c128_28 = arith.constant 128 : index
    %116 = vector.load %arg21[%115, %c128_28] : memref<64x384xbf16, #tpu.memory_space<vmem>>, vector<16x128xbf16>
    %117 = arith.index_cast %112 : i32 to index
    %c256_29 = arith.constant 256 : index
    %118 = vector.load %arg21[%117, %c256_29] : memref<64x384xbf16, #tpu.memory_space<vmem>>, vector<16x128xbf16>
    %119 = vector.shape_cast %114 : vector<16x128xbf16> to vector<1x16x128xbf16>
    %120 = vector.shape_cast %1 : vector<4x128xbf16> to vector<4x1x128xbf16>
    %121 = vector.broadcast %119 : vector<1x16x128xbf16> to vector<4x16x128xbf16>
    %122 = vector.broadcast %120 : vector<4x1x128xbf16> to vector<4x16x128xbf16>
    %123 = arith.mulf %121, %122 : vector<4x16x128xbf16>
    %124 = vector.shape_cast %123 : vector<4x16x128xbf16> to vector<64x128xbf16>
    %cst_30 = arith.constant dense<0.000000e+00> : vector<64x16xf32>
    %125 = tpu.matmul %124, %116, %cst_30 {dimension_numbers = #tpu.dot_dimension_numbers<[1], [1], [0], [0], [0, 0, 1, 0], [], []>} : vector<64x128xbf16>, vector<16x128xbf16>, vector<64x16xf32> -> vector<64x16xf32>
    %cst_31 = arith.constant dense<0xFF800000> : vector<64xf32>
    %126 = vector.multi_reduction <maximumf>, %125, %cst_31 [1] : vector<64x16xf32> to vector<64xf32>
    %127 = vector.shape_cast %126 : vector<64xf32> to vector<64x1xf32>
    %128 = vector.broadcast %127 : vector<64x1xf32> to vector<64x16xf32>
    %129 = arith.subf %125, %128 : vector<64x16xf32>
    %130 = math.exp %129 : vector<64x16xf32>
    %cst_32 = arith.constant dense<0.000000e+00> : vector<64xf32>
    %131 = vector.multi_reduction <add>, %130, %cst_32 [1] : vector<64x16xf32> to vector<64xf32>
    %132 = vector.shape_cast %131 : vector<64xf32> to vector<64x1xf32>
    %133 = tpu.reciprocal %132 {approx = true} : vector<64x1xf32> -> vector<64x1xf32>
    %134 = vector.broadcast %133 : vector<64x1xf32> to vector<64x16xf32>
    %135 = arith.mulf %130, %134 : vector<64x16xf32>
    %136 = arith.truncf %135 : vector<64x16xf32> to vector<64x16xbf16>
    %cst_33 = arith.constant dense<0.000000e+00> : vector<64x128xf32>
    %137 = tpu.matmul %136, %118, %cst_33 {dimension_numbers = #tpu.dot_dimension_numbers<[1], [0], [0], [1], [0, 0, 1, 1], [], []>} : vector<64x16xbf16>, vector<16x128xbf16>, vector<64x128xf32> -> vector<64x128xf32>
    %138 = vector.extract_strided_slice %137 {offsets = [0, 0], sizes = [16, 128], strides = [1, 1]} : vector<64x128xf32> to vector<16x128xf32>
    %139 = vector.extract_strided_slice %0 {offsets = [0, 0], sizes = [1, 128], strides = [1, 1]} : vector<4x128xf32> to vector<1x128xf32>
    %140 = vector.broadcast %139 : vector<1x128xf32> to vector<16x128xf32>
    %141 = arith.mulf %138, %140 : vector<16x128xf32>
    %142 = vector.extract_strided_slice %137 {offsets = [16, 0], sizes = [16, 128], strides = [1, 1]} : vector<64x128xf32> to vector<16x128xf32>
    %143 = vector.extract_strided_slice %0 {offsets = [1, 0], sizes = [1, 128], strides = [1, 1]} : vector<4x128xf32> to vector<1x128xf32>
    %144 = vector.broadcast %143 : vector<1x128xf32> to vector<16x128xf32>
    %145 = arith.mulf %142, %144 : vector<16x128xf32>
    %146 = arith.addf %141, %145 : vector<16x128xf32>
    %147 = vector.extract_strided_slice %137 {offsets = [32, 0], sizes = [16, 128], strides = [1, 1]} : vector<64x128xf32> to vector<16x128xf32>
    %148 = vector.extract_strided_slice %0 {offsets = [2, 0], sizes = [1, 128], strides = [1, 1]} : vector<4x128xf32> to vector<1x128xf32>
    %149 = vector.broadcast %148 : vector<1x128xf32> to vector<16x128xf32>
    %150 = arith.mulf %147, %149 : vector<16x128xf32>
    %151 = arith.addf %146, %150 : vector<16x128xf32>
    %152 = vector.extract_strided_slice %137 {offsets = [48, 0], sizes = [16, 128], strides = [1, 1]} : vector<64x128xf32> to vector<16x128xf32>
    %153 = vector.extract_strided_slice %0 {offsets = [3, 0], sizes = [1, 128], strides = [1, 1]} : vector<4x128xf32> to vector<1x128xf32>
    %154 = vector.broadcast %153 : vector<1x128xf32> to vector<16x128xf32>
    %155 = arith.mulf %152, %154 : vector<16x128xf32>
    %156 = arith.addf %151, %155 : vector<16x128xf32>
    %157 = arith.truncf %156 : vector<16x128xf32> to vector<16x128xbf16>
    %158 = arith.index_cast %112 : i32 to index
    %c0_34 = arith.constant 0 : index
    %159 = vector.load %arg22[%158, %c0_34] : memref<64x128xbf16, #tpu.memory_space<vmem>>, vector<16x128xbf16>
    tpu.vector_store %arg22[%158, %c0_34], %157 {strides = array<i32>} : memref<64x128xbf16, #tpu.memory_space<vmem>>, vector<16x128xbf16>,
    %c3_i32 = arith.constant 3 : i32
    %c16_i32_35 = arith.constant 16 : i32
    %160 = arith.muli %c3_i32, %c16_i32_35 : i32
    %161 = tpu.assume_multiple %160, 16 : i32
    %162 = arith.index_cast %161 : i32 to index
    %c0_36 = arith.constant 0 : index
    %163 = vector.load %arg21[%162, %c0_36] : memref<64x384xbf16, #tpu.memory_space<vmem>>, vector<16x128xbf16>
    %164 = arith.index_cast %161 : i32 to index
    %c128_37 = arith.constant 128 : index
    %165 = vector.load %arg21[%164, %c128_37] : memref<64x384xbf16, #tpu.memory_space<vmem>>, vector<16x128xbf16>
    %166 = arith.index_cast %161 : i32 to index
    %c256_38 = arith.constant 256 : index
    %167 = vector.load %arg21[%166, %c256_38] : memref<64x384xbf16, #tpu.memory_space<vmem>>, vector<16x128xbf16>
    %168 = vector.shape_cast %163 : vector<16x128xbf16> to vector<1x16x128xbf16>
    %169 = vector.shape_cast %1 : vector<4x128xbf16> to vector<4x1x128xbf16>
    %170 = vector.broadcast %168 : vector<1x16x128xbf16> to vector<4x16x128xbf16>
    %171 = vector.broadcast %169 : vector<4x1x128xbf16> to vector<4x16x128xbf16>
    %172 = arith.mulf %170, %171 : vector<4x16x128xbf16>
    %173 = vector.shape_cast %172 : vector<4x16x128xbf16> to vector<64x128xbf16>
    %cst_39 = arith.constant dense<0.000000e+00> : vector<64x16xf32>
    %174 = tpu.matmul %173, %165, %cst_39 {dimension_numbers = #tpu.dot_dimension_numbers<[1], [1], [0], [0], [0, 0, 1, 0], [], []>} : vector<64x128xbf16>, vector<16x128xbf16>, vector<64x16xf32> -> vector<64x16xf32>
    %cst_40 = arith.constant dense<0xFF800000> : vector<64xf32>
    %175 = vector.multi_reduction <maximumf>, %174, %cst_40 [1] : vector<64x16xf32> to vector<64xf32>
    %176 = vector.shape_cast %175 : vector<64xf32> to vector<64x1xf32>
    %177 = vector.broadcast %176 : vector<64x1xf32> to vector<64x16xf32>
    %178 = arith.subf %174, %177 : vector<64x16xf32>
    %179 = math.exp %178 : vector<64x16xf32>
    %cst_41 = arith.constant dense<0.000000e+00> : vector<64xf32>
    %180 = vector.multi_reduction <add>, %179, %cst_41 [1] : vector<64x16xf32> to vector<64xf32>
    %181 = vector.shape_cast %180 : vector<64xf32> to vector<64x1xf32>
    %182 = tpu.reciprocal %181 {approx = true} : vector<64x1xf32> -> vector<64x1xf32>
    %183 = vector.broadcast %182 : vector<64x1xf32> to vector<64x16xf32>
    %184 = arith.mulf %179, %183 : vector<64x16xf32>
    %185 = arith.truncf %184 : vector<64x16xf32> to vector<64x16xbf16>
    %cst_42 = arith.constant dense<0.000000e+00> : vector<64x128xf32>
    %186 = tpu.matmul %185, %167, %cst_42 {dimension_numbers = #tpu.dot_dimension_numbers<[1], [0], [0], [1], [0, 0, 1, 1], [], []>} : vector<64x16xbf16>, vector<16x128xbf16>, vector<64x128xf32> -> vector<64x128xf32>
    %187 = vector.extract_strided_slice %186 {offsets = [0, 0], sizes = [16, 128], strides = [1, 1]} : vector<64x128xf32> to vector<16x128xf32>
    %188 = vector.extract_strided_slice %0 {offsets = [0, 0], sizes = [1, 128], strides = [1, 1]} : vector<4x128xf32> to vector<1x128xf32>
    %189 = vector.broadcast %188 : vector<1x128xf32> to vector<16x128xf32>
    %190 = arith.mulf %187, %189 : vector<16x128xf32>
    %191 = vector.extract_strided_slice %186 {offsets = [16, 0], sizes = [16, 128], strides = [1, 1]} : vector<64x128xf32> to vector<16x128xf32>
    %192 = vector.extract_strided_slice %0 {offsets = [1, 0], sizes = [1, 128], strides = [1, 1]} : vector<4x128xf32> to vector<1x128xf32>
    %193 = vector.broadcast %192 : vector<1x128xf32> to vector<16x128xf32>
    %194 = arith.mulf %191, %193 : vector<16x128xf32>
    %195 = arith.addf %190, %194 : vector<16x128xf32>
    %196 = vector.extract_strided_slice %186 {offsets = [32, 0], sizes = [16, 128], strides = [1, 1]} : vector<64x128xf32> to vector<16x128xf32>
    %197 = vector.extract_strided_slice %0 {offsets = [2, 0], sizes = [1, 128], strides = [1, 1]} : vector<4x128xf32> to vector<1x128xf32>
    %198 = vector.broadcast %197 : vector<1x128xf32> to vector<16x128xf32>
    %199 = arith.mulf %196, %198 : vector<16x128xf32>
    %200 = arith.addf %195, %199 : vector<16x128xf32>
    %201 = vector.extract_strided_slice %186 {offsets = [48, 0], sizes = [16, 128], strides = [1, 1]} : vector<64x128xf32> to vector<16x128xf32>
    %202 = vector.extract_strided_slice %0 {offsets = [3, 0], sizes = [1, 128], strides = [1, 1]} : vector<4x128xf32> to vector<1x128xf32>
    %203 = vector.broadcast %202 : vector<1x128xf32> to vector<16x128xf32>
    %204 = arith.mulf %201, %203 : vector<16x128xf32>
    %205 = arith.addf %200, %204 : vector<16x128xf32>
    %206 = arith.truncf %205 : vector<16x128xf32> to vector<16x128xbf16>
    %207 = arith.index_cast %161 : i32 to index
    %c0_43 = arith.constant 0 : index
    %208 = vector.load %arg22[%207, %c0_43] : memref<64x128xbf16, #tpu.memory_space<vmem>>, vector<16x128xbf16>
    tpu.vector_store %arg22[%207, %c0_43], %206 {strides = array<i32>} : memref<64x128xbf16, #tpu.memory_space<vmem>>, vector<16x128xbf16>,
    %c4_i32 = arith.constant 4 : i32
    %c0_44 = arith.constant 0 : index
    %c0_45 = arith.constant 0 : index
    %209 = vector.load %arg22[%c0_44, %c0_45] : memref<64x128xbf16, #tpu.memory_space<vmem>>, vector<64x128xbf16>
    %c0_46 = arith.constant 0 : index
    %c0_47 = arith.constant 0 : index
    %210 = vector.load %arg5[%c0_46, %c0_47] : memref<128x128xbf16, #tpu.memory_space<vmem>>, vector<128x128xbf16>
    %cst_48 = arith.constant dense<0.000000e+00> : vector<64x128xf32>
    %211 = tpu.matmul %209, %210, %cst_48 {dimension_numbers = #tpu.dot_dimension_numbers<[1], [0], [0], [1], [0, 0, 1, 1], [], []>} : vector<64x128xbf16>, vector<128x128xbf16>, vector<64x128xf32> -> vector<64x128xf32>
    %c0_49 = arith.constant 0 : index
    %c0_50 = arith.constant 0 : index
    %212 = vector.load %arg6[%c0_49, %c0_50] : memref<1x128xf32, #tpu.memory_space<vmem>>, vector<1x128xf32>
    %213 = vector.broadcast %212 : vector<1x128xf32> to vector<64x128xf32>
    %214 = arith.addf %211, %213 : vector<64x128xf32>
    %215 = arith.addf %2, %214 : vector<64x128xf32>
    %c0_51 = arith.constant 0 : index
    %c0_52 = arith.constant 0 : index
    %216 = vector.load %arg17[%c0_51, %c0_52] : memref<3x128xf32, #tpu.memory_space<vmem>>, vector<1x128xf32>
    %217 = vector.shape_cast %216 : vector<1x128xf32> to vector<128xf32>
    %c0_53 = arith.constant 0 : index
    %c0_54 = arith.constant 0 : index
    %218 = vector.load %arg18[%c0_53, %c0_54] : memref<3x128xf32, #tpu.memory_space<vmem>>, vector<1x128xf32>
    %219 = vector.shape_cast %218 : vector<1x128xf32> to vector<128xf32>
    %cst_55 = arith.constant dense<0.000000e+00> : vector<64xf32>
    %220 = vector.multi_reduction <add>, %215, %cst_55 [1] : vector<64x128xf32> to vector<64xf32>
    %221 = vector.shape_cast %220 : vector<64xf32> to vector<64x1xf32>
    %cst_56 = arith.constant 1.280000e+02 : f32
    %222 = vector.broadcast %cst_56 : f32 to vector<64x1xf32>
    %223 = arith.divf %221, %222 : vector<64x1xf32>
    %224 = vector.broadcast %223 : vector<64x1xf32> to vector<64x128xf32>
    %225 = arith.subf %215, %224 : vector<64x128xf32>
    %226 = arith.mulf %225, %225 : vector<64x128xf32>
    %cst_57 = arith.constant dense<0.000000e+00> : vector<64xf32>
    %227 = vector.multi_reduction <add>, %226, %cst_57 [1] : vector<64x128xf32> to vector<64xf32>
    %228 = vector.shape_cast %227 : vector<64xf32> to vector<64x1xf32>
    %cst_58 = arith.constant 1.280000e+02 : f32
    %229 = vector.broadcast %cst_58 : f32 to vector<64x1xf32>
    %230 = arith.divf %228, %229 : vector<64x1xf32>
    %231 = vector.broadcast %223 : vector<64x1xf32> to vector<64x128xf32>
    %232 = arith.subf %215, %231 : vector<64x128xf32>
    %cst_59 = arith.constant 9.99999974E-6 : f32
    %233 = vector.broadcast %cst_59 : f32 to vector<64x1xf32>
    %234 = arith.addf %230, %233 : vector<64x1xf32>
    %235 = math.rsqrt %234 : vector<64x1xf32>
    %236 = vector.broadcast %235 : vector<64x1xf32> to vector<64x128xf32>
    %237 = arith.mulf %232, %236 : vector<64x128xf32>
    %238 = vector.shape_cast %217 : vector<128xf32> to vector<1x128xf32>
    %239 = vector.broadcast %238 : vector<1x128xf32> to vector<64x128xf32>
    %240 = arith.mulf %237, %239 : vector<64x128xf32>
    %241 = vector.shape_cast %219 : vector<128xf32> to vector<1x128xf32>
    %242 = vector.broadcast %241 : vector<1x128xf32> to vector<64x128xf32>
    %243 = arith.addf %240, %242 : vector<64x128xf32>
    %244 = arith.truncf %243 : vector<64x128xf32> to vector<64x128xbf16>
    %c0_60 = arith.constant 0 : index
    %c0_61 = arith.constant 0 : index
    %245 = vector.load %arg7[%c0_60, %c0_61] : memref<128x256xbf16, #tpu.memory_space<vmem>>, vector<128x256xbf16>
    %cst_62 = arith.constant dense<0.000000e+00> : vector<64x256xf32>
    %246 = tpu.matmul %4, %245, %cst_62 {dimension_numbers = #tpu.dot_dimension_numbers<[1], [0], [0], [1], [0, 0, 1, 1], [], []>} : vector<64x128xbf16>, vector<128x256xbf16>, vector<64x256xf32> -> vector<64x256xf32>
    %c0_63 = arith.constant 0 : index
    %c0_64 = arith.constant 0 : index
    %247 = vector.load %arg8[%c0_63, %c0_64] : memref<1x256xf32, #tpu.memory_space<vmem>>, vector<1x256xf32>
    %248 = vector.broadcast %247 : vector<1x256xf32> to vector<64x256xf32>
    %249 = arith.addf %246, %248 : vector<64x256xf32>
    %c0_65 = arith.constant 0 : index
    %c0_66 = arith.constant 0 : index
    %250 = vector.load %arg9[%c0_65, %c0_66] : memref<128x128xbf16, #tpu.memory_space<vmem>>, vector<128x128xbf16>
    %cst_67 = arith.constant dense<0.000000e+00> : vector<64x128xf32>
    %251 = tpu.matmul %244, %250, %cst_67 {dimension_numbers = #tpu.dot_dimension_numbers<[1], [0], [0], [1], [0, 0, 1, 1], [], []>} : vector<64x128xbf16>, vector<128x128xbf16>, vector<64x128xf32> -> vector<64x128xf32>
    %c0_68 = arith.constant 0 : index
    %c0_69 = arith.constant 0 : index
    %252 = vector.load %arg10[%c0_68, %c0_69] : memref<1x128xf32, #tpu.memory_space<vmem>>, vector<1x128xf32>
    %253 = vector.broadcast %252 : vector<1x128xf32> to vector<64x128xf32>
    %254 = arith.addf %251, %253 : vector<64x128xf32>
    %255 = arith.truncf %249 : vector<64x256xf32> to vector<64x256xbf16>
    %c0_70 = arith.constant 0 : index
    %c0_71 = arith.constant 0 : index
    %256 = vector.load %arg21[%c0_70, %c0_71] : memref<64x384xbf16, #tpu.memory_space<vmem>>, vector<64x256xbf16>
    tpu.vector_store %arg21[%c0_70, %c0_71], %255 {strides = array<i32>} : memref<64x384xbf16, #tpu.memory_space<vmem>>, vector<64x256xbf16>,
    %257 = arith.truncf %254 : vector<64x128xf32> to vector<64x128xbf16>
    %c0_72 = arith.constant 0 : index
    %c256_73 = arith.constant 256 : index
    %258 = vector.load %arg21[%c0_72, %c256_73] : memref<64x384xbf16, #tpu.memory_space<vmem>>, vector<64x128xbf16>
    tpu.vector_store %arg21[%c0_72, %c256_73], %257 {strides = array<i32>} : memref<64x384xbf16, #tpu.memory_space<vmem>>, vector<64x128xbf16>,
    %c0_i32_74 = arith.constant 0 : i32
    %c16_i32_75 = arith.constant 16 : i32
    %259 = arith.muli %c0_i32_74, %c16_i32_75 : i32
    %260 = tpu.assume_multiple %259, 16 : i32
    %261 = arith.index_cast %260 : i32 to index
    %c0_76 = arith.constant 0 : index
    %262 = vector.load %arg21[%261, %c0_76] : memref<64x384xbf16, #tpu.memory_space<vmem>>, vector<16x128xbf16>
    %263 = arith.index_cast %260 : i32 to index
    %c128_77 = arith.constant 128 : index
    %264 = vector.load %arg21[%263, %c128_77] : memref<64x384xbf16, #tpu.memory_space<vmem>>, vector<16x128xbf16>
    %265 = arith.index_cast %260 : i32 to index
    %c256_78 = arith.constant 256 : index
    %266 = vector.load %arg21[%265, %c256_78] : memref<64x384xbf16, #tpu.memory_space<vmem>>, vector<16x128xbf16>
    %267 = vector.shape_cast %262 : vector<16x128xbf16> to vector<1x16x128xbf16>
    %268 = vector.shape_cast %1 : vector<4x128xbf16> to vector<4x1x128xbf16>
    %269 = vector.broadcast %267 : vector<1x16x128xbf16> to vector<4x16x128xbf16>
    %270 = vector.broadcast %268 : vector<4x1x128xbf16> to vector<4x16x128xbf16>
    %271 = arith.mulf %269, %270 : vector<4x16x128xbf16>
    %272 = vector.shape_cast %271 : vector<4x16x128xbf16> to vector<64x128xbf16>
    %cst_79 = arith.constant dense<0.000000e+00> : vector<64x16xf32>
    %273 = tpu.matmul %272, %264, %cst_79 {dimension_numbers = #tpu.dot_dimension_numbers<[1], [1], [0], [0], [0, 0, 1, 0], [], []>} : vector<64x128xbf16>, vector<16x128xbf16>, vector<64x16xf32> -> vector<64x16xf32>
    %cst_80 = arith.constant dense<0xFF800000> : vector<64xf32>
    %274 = vector.multi_reduction <maximumf>, %273, %cst_80 [1] : vector<64x16xf32> to vector<64xf32>
    %275 = vector.shape_cast %274 : vector<64xf32> to vector<64x1xf32>
    %276 = vector.broadcast %275 : vector<64x1xf32> to vector<64x16xf32>
    %277 = arith.subf %273, %276 : vector<64x16xf32>
    %278 = math.exp %277 : vector<64x16xf32>
    %cst_81 = arith.constant dense<0.000000e+00> : vector<64xf32>
    %279 = vector.multi_reduction <add>, %278, %cst_81 [1] : vector<64x16xf32> to vector<64xf32>
    %280 = vector.shape_cast %279 : vector<64xf32> to vector<64x1xf32>
    %281 = tpu.reciprocal %280 {approx = true} : vector<64x1xf32> -> vector<64x1xf32>
    %282 = vector.broadcast %281 : vector<64x1xf32> to vector<64x16xf32>
    %283 = arith.mulf %278, %282 : vector<64x16xf32>
    %284 = arith.truncf %283 : vector<64x16xf32> to vector<64x16xbf16>
    %cst_82 = arith.constant dense<0.000000e+00> : vector<64x128xf32>
    %285 = tpu.matmul %284, %266, %cst_82 {dimension_numbers = #tpu.dot_dimension_numbers<[1], [0], [0], [1], [0, 0, 1, 1], [], []>} : vector<64x16xbf16>, vector<16x128xbf16>, vector<64x128xf32> -> vector<64x128xf32>
    %286 = vector.extract_strided_slice %285 {offsets = [0, 0], sizes = [16, 128], strides = [1, 1]} : vector<64x128xf32> to vector<16x128xf32>
    %287 = vector.extract_strided_slice %0 {offsets = [0, 0], sizes = [1, 128], strides = [1, 1]} : vector<4x128xf32> to vector<1x128xf32>
    %288 = vector.broadcast %287 : vector<1x128xf32> to vector<16x128xf32>
    %289 = arith.mulf %286, %288 : vector<16x128xf32>
    %290 = vector.extract_strided_slice %285 {offsets = [16, 0], sizes = [16, 128], strides = [1, 1]} : vector<64x128xf32> to vector<16x128xf32>
    %291 = vector.extract_strided_slice %0 {offsets = [1, 0], sizes = [1, 128], strides = [1, 1]} : vector<4x128xf32> to vector<1x128xf32>
    %292 = vector.broadcast %291 : vector<1x128xf32> to vector<16x128xf32>
    %293 = arith.mulf %290, %292 : vector<16x128xf32>
    %294 = arith.addf %289, %293 : vector<16x128xf32>
    %295 = vector.extract_strided_slice %285 {offsets = [32, 0], sizes = [16, 128], strides = [1, 1]} : vector<64x128xf32> to vector<16x128xf32>
    %296 = vector.extract_strided_slice %0 {offsets = [2, 0], sizes = [1, 128], strides = [1, 1]} : vector<4x128xf32> to vector<1x128xf32>
    %297 = vector.broadcast %296 : vector<1x128xf32> to vector<16x128xf32>
    %298 = arith.mulf %295, %297 : vector<16x128xf32>
    %299 = arith.addf %294, %298 : vector<16x128xf32>
    %300 = vector.extract_strided_slice %285 {offsets = [48, 0], sizes = [16, 128], strides = [1, 1]} : vector<64x128xf32> to vector<16x128xf32>
    %301 = vector.extract_strided_slice %0 {offsets = [3, 0], sizes = [1, 128], strides = [1, 1]} : vector<4x128xf32> to vector<1x128xf32>
    %302 = vector.broadcast %301 : vector<1x128xf32> to vector<16x128xf32>
    %303 = arith.mulf %300, %302 : vector<16x128xf32>
    %304 = arith.addf %299, %303 : vector<16x128xf32>
    %305 = arith.truncf %304 : vector<16x128xf32> to vector<16x128xbf16>
    %306 = arith.index_cast %260 : i32 to index
    %c0_83 = arith.constant 0 : index
    %307 = vector.load %arg22[%306, %c0_83] : memref<64x128xbf16, #tpu.memory_space<vmem>>, vector<16x128xbf16>
    tpu.vector_store %arg22[%306, %c0_83], %305 {strides = array<i32>} : memref<64x128xbf16, #tpu.memory_space<vmem>>, vector<16x128xbf16>,
    %c1_i32_84 = arith.constant 1 : i32
    %c16_i32_85 = arith.constant 16 : i32
    %308 = arith.muli %c1_i32_84, %c16_i32_85 : i32
    %309 = tpu.assume_multiple %308, 16 : i32
    %310 = arith.index_cast %309 : i32 to index
    %c0_86 = arith.constant 0 : index
    %311 = vector.load %arg21[%310, %c0_86] : memref<64x384xbf16, #tpu.memory_space<vmem>>, vector<16x128xbf16>
    %312 = arith.index_cast %309 : i32 to index
    %c128_87 = arith.constant 128 : index
    %313 = vector.load %arg21[%312, %c128_87] : memref<64x384xbf16, #tpu.memory_space<vmem>>, vector<16x128xbf16>
    %314 = arith.index_cast %309 : i32 to index
    %c256_88 = arith.constant 256 : index
    %315 = vector.load %arg21[%314, %c256_88] : memref<64x384xbf16, #tpu.memory_space<vmem>>, vector<16x128xbf16>
    %316 = vector.shape_cast %311 : vector<16x128xbf16> to vector<1x16x128xbf16>
    %317 = vector.shape_cast %1 : vector<4x128xbf16> to vector<4x1x128xbf16>
    %318 = vector.broadcast %316 : vector<1x16x128xbf16> to vector<4x16x128xbf16>
    %319 = vector.broadcast %317 : vector<4x1x128xbf16> to vector<4x16x128xbf16>
    %320 = arith.mulf %318, %319 : vector<4x16x128xbf16>
    %321 = vector.shape_cast %320 : vector<4x16x128xbf16> to vector<64x128xbf16>
    %cst_89 = arith.constant dense<0.000000e+00> : vector<64x16xf32>
    %322 = tpu.matmul %321, %313, %cst_89 {dimension_numbers = #tpu.dot_dimension_numbers<[1], [1], [0], [0], [0, 0, 1, 0], [], []>} : vector<64x128xbf16>, vector<16x128xbf16>, vector<64x16xf32> -> vector<64x16xf32>
    %cst_90 = arith.constant dense<0xFF800000> : vector<64xf32>
    %323 = vector.multi_reduction <maximumf>, %322, %cst_90 [1] : vector<64x16xf32> to vector<64xf32>
    %324 = vector.shape_cast %323 : vector<64xf32> to vector<64x1xf32>
    %325 = vector.broadcast %324 : vector<64x1xf32> to vector<64x16xf32>
    %326 = arith.subf %322, %325 : vector<64x16xf32>
    %327 = math.exp %326 : vector<64x16xf32>
    %cst_91 = arith.constant dense<0.000000e+00> : vector<64xf32>
    %328 = vector.multi_reduction <add>, %327, %cst_91 [1] : vector<64x16xf32> to vector<64xf32>
    %329 = vector.shape_cast %328 : vector<64xf32> to vector<64x1xf32>
    %330 = tpu.reciprocal %329 {approx = true} : vector<64x1xf32> -> vector<64x1xf32>
    %331 = vector.broadcast %330 : vector<64x1xf32> to vector<64x16xf32>
    %332 = arith.mulf %327, %331 : vector<64x16xf32>
    %333 = arith.truncf %332 : vector<64x16xf32> to vector<64x16xbf16>
    %cst_92 = arith.constant dense<0.000000e+00> : vector<64x128xf32>
    %334 = tpu.matmul %333, %315, %cst_92 {dimension_numbers = #tpu.dot_dimension_numbers<[1], [0], [0], [1], [0, 0, 1, 1], [], []>} : vector<64x16xbf16>, vector<16x128xbf16>, vector<64x128xf32> -> vector<64x128xf32>
    %335 = vector.extract_strided_slice %334 {offsets = [0, 0], sizes = [16, 128], strides = [1, 1]} : vector<64x128xf32> to vector<16x128xf32>
    %336 = vector.extract_strided_slice %0 {offsets = [0, 0], sizes = [1, 128], strides = [1, 1]} : vector<4x128xf32> to vector<1x128xf32>
    %337 = vector.broadcast %336 : vector<1x128xf32> to vector<16x128xf32>
    %338 = arith.mulf %335, %337 : vector<16x128xf32>
    %339 = vector.extract_strided_slice %334 {offsets = [16, 0], sizes = [16, 128], strides = [1, 1]} : vector<64x128xf32> to vector<16x128xf32>
    %340 = vector.extract_strided_slice %0 {offsets = [1, 0], sizes = [1, 128], strides = [1, 1]} : vector<4x128xf32> to vector<1x128xf32>
    %341 = vector.broadcast %340 : vector<1x128xf32> to vector<16x128xf32>
    %342 = arith.mulf %339, %341 : vector<16x128xf32>
    %343 = arith.addf %338, %342 : vector<16x128xf32>
    %344 = vector.extract_strided_slice %334 {offsets = [32, 0], sizes = [16, 128], strides = [1, 1]} : vector<64x128xf32> to vector<16x128xf32>
    %345 = vector.extract_strided_slice %0 {offsets = [2, 0], sizes = [1, 128], strides = [1, 1]} : vector<4x128xf32> to vector<1x128xf32>
    %346 = vector.broadcast %345 : vector<1x128xf32> to vector<16x128xf32>
    %347 = arith.mulf %344, %346 : vector<16x128xf32>
    %348 = arith.addf %343, %347 : vector<16x128xf32>
    %349 = vector.extract_strided_slice %334 {offsets = [48, 0], sizes = [16, 128], strides = [1, 1]} : vector<64x128xf32> to vector<16x128xf32>
    %350 = vector.extract_strided_slice %0 {offsets = [3, 0], sizes = [1, 128], strides = [1, 1]} : vector<4x128xf32> to vector<1x128xf32>
    %351 = vector.broadcast %350 : vector<1x128xf32> to vector<16x128xf32>
    %352 = arith.mulf %349, %351 : vector<16x128xf32>
    %353 = arith.addf %348, %352 : vector<16x128xf32>
    %354 = arith.truncf %353 : vector<16x128xf32> to vector<16x128xbf16>
    %355 = arith.index_cast %309 : i32 to index
    %c0_93 = arith.constant 0 : index
    %356 = vector.load %arg22[%355, %c0_93] : memref<64x128xbf16, #tpu.memory_space<vmem>>, vector<16x128xbf16>
    tpu.vector_store %arg22[%355, %c0_93], %354 {strides = array<i32>} : memref<64x128xbf16, #tpu.memory_space<vmem>>, vector<16x128xbf16>,
    %c2_i32_94 = arith.constant 2 : i32
    %c16_i32_95 = arith.constant 16 : i32
    %357 = arith.muli %c2_i32_94, %c16_i32_95 : i32
    %358 = tpu.assume_multiple %357, 16 : i32
    %359 = arith.index_cast %358 : i32 to index
    %c0_96 = arith.constant 0 : index
    %360 = vector.load %arg21[%359, %c0_96] : memref<64x384xbf16, #tpu.memory_space<vmem>>, vector<16x128xbf16>
    %361 = arith.index_cast %358 : i32 to index
    %c128_97 = arith.constant 128 : index
    %362 = vector.load %arg21[%361, %c128_97] : memref<64x384xbf16, #tpu.memory_space<vmem>>, vector<16x128xbf16>
    %363 = arith.index_cast %358 : i32 to index
    %c256_98 = arith.constant 256 : index
    %364 = vector.load %arg21[%363, %c256_98] : memref<64x384xbf16, #tpu.memory_space<vmem>>, vector<16x128xbf16>
    %365 = vector.shape_cast %360 : vector<16x128xbf16> to vector<1x16x128xbf16>
    %366 = vector.shape_cast %1 : vector<4x128xbf16> to vector<4x1x128xbf16>
    %367 = vector.broadcast %365 : vector<1x16x128xbf16> to vector<4x16x128xbf16>
    %368 = vector.broadcast %366 : vector<4x1x128xbf16> to vector<4x16x128xbf16>
    %369 = arith.mulf %367, %368 : vector<4x16x128xbf16>
    %370 = vector.shape_cast %369 : vector<4x16x128xbf16> to vector<64x128xbf16>
    %cst_99 = arith.constant dense<0.000000e+00> : vector<64x16xf32>
    %371 = tpu.matmul %370, %362, %cst_99 {dimension_numbers = #tpu.dot_dimension_numbers<[1], [1], [0], [0], [0, 0, 1, 0], [], []>} : vector<64x128xbf16>, vector<16x128xbf16>, vector<64x16xf32> -> vector<64x16xf32>
    %cst_100 = arith.constant dense<0xFF800000> : vector<64xf32>
    %372 = vector.multi_reduction <maximumf>, %371, %cst_100 [1] : vector<64x16xf32> to vector<64xf32>
    %373 = vector.shape_cast %372 : vector<64xf32> to vector<64x1xf32>
    %374 = vector.broadcast %373 : vector<64x1xf32> to vector<64x16xf32>
    %375 = arith.subf %371, %374 : vector<64x16xf32>
    %376 = math.exp %375 : vector<64x16xf32>
    %cst_101 = arith.constant dense<0.000000e+00> : vector<64xf32>
    %377 = vector.multi_reduction <add>, %376, %cst_101 [1] : vector<64x16xf32> to vector<64xf32>
    %378 = vector.shape_cast %377 : vector<64xf32> to vector<64x1xf32>
    %379 = tpu.reciprocal %378 {approx = true} : vector<64x1xf32> -> vector<64x1xf32>
    %380 = vector.broadcast %379 : vector<64x1xf32> to vector<64x16xf32>
    %381 = arith.mulf %376, %380 : vector<64x16xf32>
    %382 = arith.truncf %381 : vector<64x16xf32> to vector<64x16xbf16>
    %cst_102 = arith.constant dense<0.000000e+00> : vector<64x128xf32>
    %383 = tpu.matmul %382, %364, %cst_102 {dimension_numbers = #tpu.dot_dimension_numbers<[1], [0], [0], [1], [0, 0, 1, 1], [], []>} : vector<64x16xbf16>, vector<16x128xbf16>, vector<64x128xf32> -> vector<64x128xf32>
    %384 = vector.extract_strided_slice %383 {offsets = [0, 0], sizes = [16, 128], strides = [1, 1]} : vector<64x128xf32> to vector<16x128xf32>
    %385 = vector.extract_strided_slice %0 {offsets = [0, 0], sizes = [1, 128], strides = [1, 1]} : vector<4x128xf32> to vector<1x128xf32>
    %386 = vector.broadcast %385 : vector<1x128xf32> to vector<16x128xf32>
    %387 = arith.mulf %384, %386 : vector<16x128xf32>
    %388 = vector.extract_strided_slice %383 {offsets = [16, 0], sizes = [16, 128], strides = [1, 1]} : vector<64x128xf32> to vector<16x128xf32>
    %389 = vector.extract_strided_slice %0 {offsets = [1, 0], sizes = [1, 128], strides = [1, 1]} : vector<4x128xf32> to vector<1x128xf32>
    %390 = vector.broadcast %389 : vector<1x128xf32> to vector<16x128xf32>
    %391 = arith.mulf %388, %390 : vector<16x128xf32>
    %392 = arith.addf %387, %391 : vector<16x128xf32>
    %393 = vector.extract_strided_slice %383 {offsets = [32, 0], sizes = [16, 128], strides = [1, 1]} : vector<64x128xf32> to vector<16x128xf32>
    %394 = vector.extract_strided_slice %0 {offsets = [2, 0], sizes = [1, 128], strides = [1, 1]} : vector<4x128xf32> to vector<1x128xf32>
    %395 = vector.broadcast %394 : vector<1x128xf32> to vector<16x128xf32>
    %396 = arith.mulf %393, %395 : vector<16x128xf32>
    %397 = arith.addf %392, %396 : vector<16x128xf32>
    %398 = vector.extract_strided_slice %383 {offsets = [48, 0], sizes = [16, 128], strides = [1, 1]} : vector<64x128xf32> to vector<16x128xf32>
    %399 = vector.extract_strided_slice %0 {offsets = [3, 0], sizes = [1, 128], strides = [1, 1]} : vector<4x128xf32> to vector<1x128xf32>
    %400 = vector.broadcast %399 : vector<1x128xf32> to vector<16x128xf32>
    %401 = arith.mulf %398, %400 : vector<16x128xf32>
    %402 = arith.addf %397, %401 : vector<16x128xf32>
    %403 = arith.truncf %402 : vector<16x128xf32> to vector<16x128xbf16>
    %404 = arith.index_cast %358 : i32 to index
    %c0_103 = arith.constant 0 : index
    %405 = vector.load %arg22[%404, %c0_103] : memref<64x128xbf16, #tpu.memory_space<vmem>>, vector<16x128xbf16>
    tpu.vector_store %arg22[%404, %c0_103], %403 {strides = array<i32>} : memref<64x128xbf16, #tpu.memory_space<vmem>>, vector<16x128xbf16>,
    %c3_i32_104 = arith.constant 3 : i32
    %c16_i32_105 = arith.constant 16 : i32
    %406 = arith.muli %c3_i32_104, %c16_i32_105 : i32
    %407 = tpu.assume_multiple %406, 16 : i32
    %408 = arith.index_cast %407 : i32 to index
    %c0_106 = arith.constant 0 : index
    %409 = vector.load %arg21[%408, %c0_106] : memref<64x384xbf16, #tpu.memory_space<vmem>>, vector<16x128xbf16>
    %410 = arith.index_cast %407 : i32 to index
    %c128_107 = arith.constant 128 : index
    %411 = vector.load %arg21[%410, %c128_107] : memref<64x384xbf16, #tpu.memory_space<vmem>>, vector<16x128xbf16>
    %412 = arith.index_cast %407 : i32 to index
    %c256_108 = arith.constant 256 : index
    %413 = vector.load %arg21[%412, %c256_108] : memref<64x384xbf16, #tpu.memory_space<vmem>>, vector<16x128xbf16>
    %414 = vector.shape_cast %409 : vector<16x128xbf16> to vector<1x16x128xbf16>
    %415 = vector.shape_cast %1 : vector<4x128xbf16> to vector<4x1x128xbf16>
    %416 = vector.broadcast %414 : vector<1x16x128xbf16> to vector<4x16x128xbf16>
    %417 = vector.broadcast %415 : vector<4x1x128xbf16> to vector<4x16x128xbf16>
    %418 = arith.mulf %416, %417 : vector<4x16x128xbf16>
    %419 = vector.shape_cast %418 : vector<4x16x128xbf16> to vector<64x128xbf16>
    %cst_109 = arith.constant dense<0.000000e+00> : vector<64x16xf32>
    %420 = tpu.matmul %419, %411, %cst_109 {dimension_numbers = #tpu.dot_dimension_numbers<[1], [1], [0], [0], [0, 0, 1, 0], [], []>} : vector<64x128xbf16>, vector<16x128xbf16>, vector<64x16xf32> -> vector<64x16xf32>
    %cst_110 = arith.constant dense<0xFF800000> : vector<64xf32>
    %421 = vector.multi_reduction <maximumf>, %420, %cst_110 [1] : vector<64x16xf32> to vector<64xf32>
    %422 = vector.shape_cast %421 : vector<64xf32> to vector<64x1xf32>
    %423 = vector.broadcast %422 : vector<64x1xf32> to vector<64x16xf32>
    %424 = arith.subf %420, %423 : vector<64x16xf32>
    %425 = math.exp %424 : vector<64x16xf32>
    %cst_111 = arith.constant dense<0.000000e+00> : vector<64xf32>
    %426 = vector.multi_reduction <add>, %425, %cst_111 [1] : vector<64x16xf32> to vector<64xf32>
    %427 = vector.shape_cast %426 : vector<64xf32> to vector<64x1xf32>
    %428 = tpu.reciprocal %427 {approx = true} : vector<64x1xf32> -> vector<64x1xf32>
    %429 = vector.broadcast %428 : vector<64x1xf32> to vector<64x16xf32>
    %430 = arith.mulf %425, %429 : vector<64x16xf32>
    %431 = arith.truncf %430 : vector<64x16xf32> to vector<64x16xbf16>
    %cst_112 = arith.constant dense<0.000000e+00> : vector<64x128xf32>
    %432 = tpu.matmul %431, %413, %cst_112 {dimension_numbers = #tpu.dot_dimension_numbers<[1], [0], [0], [1], [0, 0, 1, 1], [], []>} : vector<64x16xbf16>, vector<16x128xbf16>, vector<64x128xf32> -> vector<64x128xf32>
    %433 = vector.extract_strided_slice %432 {offsets = [0, 0], sizes = [16, 128], strides = [1, 1]} : vector<64x128xf32> to vector<16x128xf32>
    %434 = vector.extract_strided_slice %0 {offsets = [0, 0], sizes = [1, 128], strides = [1, 1]} : vector<4x128xf32> to vector<1x128xf32>
    %435 = vector.broadcast %434 : vector<1x128xf32> to vector<16x128xf32>
    %436 = arith.mulf %433, %435 : vector<16x128xf32>
    %437 = vector.extract_strided_slice %432 {offsets = [16, 0], sizes = [16, 128], strides = [1, 1]} : vector<64x128xf32> to vector<16x128xf32>
    %438 = vector.extract_strided_slice %0 {offsets = [1, 0], sizes = [1, 128], strides = [1, 1]} : vector<4x128xf32> to vector<1x128xf32>
    %439 = vector.broadcast %438 : vector<1x128xf32> to vector<16x128xf32>
    %440 = arith.mulf %437, %439 : vector<16x128xf32>
    %441 = arith.addf %436, %440 : vector<16x128xf32>
    %442 = vector.extract_strided_slice %432 {offsets = [32, 0], sizes = [16, 128], strides = [1, 1]} : vector<64x128xf32> to vector<16x128xf32>
    %443 = vector.extract_strided_slice %0 {offsets = [2, 0], sizes = [1, 128], strides = [1, 1]} : vector<4x128xf32> to vector<1x128xf32>
    %444 = vector.broadcast %443 : vector<1x128xf32> to vector<16x128xf32>
    %445 = arith.mulf %442, %444 : vector<16x128xf32>
    %446 = arith.addf %441, %445 : vector<16x128xf32>
    %447 = vector.extract_strided_slice %432 {offsets = [48, 0], sizes = [16, 128], strides = [1, 1]} : vector<64x128xf32> to vector<16x128xf32>
    %448 = vector.extract_strided_slice %0 {offsets = [3, 0], sizes = [1, 128], strides = [1, 1]} : vector<4x128xf32> to vector<1x128xf32>
    %449 = vector.broadcast %448 : vector<1x128xf32> to vector<16x128xf32>
    %450 = arith.mulf %447, %449 : vector<16x128xf32>
    %451 = arith.addf %446, %450 : vector<16x128xf32>
    %452 = arith.truncf %451 : vector<16x128xf32> to vector<16x128xbf16>
    %453 = arith.index_cast %407 : i32 to index
    %c0_113 = arith.constant 0 : index
    %454 = vector.load %arg22[%453, %c0_113] : memref<64x128xbf16, #tpu.memory_space<vmem>>, vector<16x128xbf16>
    tpu.vector_store %arg22[%453, %c0_113], %452 {strides = array<i32>} : memref<64x128xbf16, #tpu.memory_space<vmem>>, vector<16x128xbf16>,
    %c4_i32_114 = arith.constant 4 : i32
    %c0_115 = arith.constant 0 : index
    %c0_116 = arith.constant 0 : index
    %455 = vector.load %arg22[%c0_115, %c0_116] : memref<64x128xbf16, #tpu.memory_space<vmem>>, vector<64x128xbf16>
    %c0_117 = arith.constant 0 : index
    %c0_118 = arith.constant 0 : index
    %456 = vector.load %arg11[%c0_117, %c0_118] : memref<128x128xbf16, #tpu.memory_space<vmem>>, vector<128x128xbf16>
    %cst_119 = arith.constant dense<0.000000e+00> : vector<64x128xf32>
    %457 = tpu.matmul %455, %456, %cst_119 {dimension_numbers = #tpu.dot_dimension_numbers<[1], [0], [0], [1], [0, 0, 1, 1], [], []>} : vector<64x128xbf16>, vector<128x128xbf16>, vector<64x128xf32> -> vector<64x128xf32>
    %c0_120 = arith.constant 0 : index
    %c0_121 = arith.constant 0 : index
    %458 = vector.load %arg12[%c0_120, %c0_121] : memref<1x128xf32, #tpu.memory_space<vmem>>, vector<1x128xf32>
    %459 = vector.broadcast %458 : vector<1x128xf32> to vector<64x128xf32>
    %460 = arith.addf %457, %459 : vector<64x128xf32>
    %461 = arith.addf %243, %460 : vector<64x128xf32>
    %c1 = arith.constant 1 : index
    %c0_122 = arith.constant 0 : index
    %462 = vector.load %arg17[%c1, %c0_122] : memref<3x128xf32, #tpu.memory_space<vmem>>, vector<1x128xf32>
    %463 = vector.shape_cast %462 : vector<1x128xf32> to vector<128xf32>
    %c1_123 = arith.constant 1 : index
    %c0_124 = arith.constant 0 : index
    %464 = vector.load %arg18[%c1_123, %c0_124] : memref<3x128xf32, #tpu.memory_space<vmem>>, vector<1x128xf32>
    %465 = vector.shape_cast %464 : vector<1x128xf32> to vector<128xf32>
    %cst_125 = arith.constant dense<0.000000e+00> : vector<64xf32>
    %466 = vector.multi_reduction <add>, %461, %cst_125 [1] : vector<64x128xf32> to vector<64xf32>
    %467 = vector.shape_cast %466 : vector<64xf32> to vector<64x1xf32>
    %cst_126 = arith.constant 1.280000e+02 : f32
    %468 = vector.broadcast %cst_126 : f32 to vector<64x1xf32>
    %469 = arith.divf %467, %468 : vector<64x1xf32>
    %470 = vector.broadcast %469 : vector<64x1xf32> to vector<64x128xf32>
    %471 = arith.subf %461, %470 : vector<64x128xf32>
    %472 = arith.mulf %471, %471 : vector<64x128xf32>
    %cst_127 = arith.constant dense<0.000000e+00> : vector<64xf32>
    %473 = vector.multi_reduction <add>, %472, %cst_127 [1] : vector<64x128xf32> to vector<64xf32>
    %474 = vector.shape_cast %473 : vector<64xf32> to vector<64x1xf32>
    %cst_128 = arith.constant 1.280000e+02 : f32
    %475 = vector.broadcast %cst_128 : f32 to vector<64x1xf32>
    %476 = arith.divf %474, %475 : vector<64x1xf32>
    %477 = vector.broadcast %469 : vector<64x1xf32> to vector<64x128xf32>
    %478 = arith.subf %461, %477 : vector<64x128xf32>
    %cst_129 = arith.constant 9.99999974E-6 : f32
    %479 = vector.broadcast %cst_129 : f32 to vector<64x1xf32>
    %480 = arith.addf %476, %479 : vector<64x1xf32>
    %481 = math.rsqrt %480 : vector<64x1xf32>
    %482 = vector.broadcast %481 : vector<64x1xf32> to vector<64x128xf32>
    %483 = arith.mulf %478, %482 : vector<64x128xf32>
    %484 = vector.shape_cast %463 : vector<128xf32> to vector<1x128xf32>
    %485 = vector.broadcast %484 : vector<1x128xf32> to vector<64x128xf32>
    %486 = arith.mulf %483, %485 : vector<64x128xf32>
    %487 = vector.shape_cast %465 : vector<128xf32> to vector<1x128xf32>
    %488 = vector.broadcast %487 : vector<1x128xf32> to vector<64x128xf32>
    %489 = arith.addf %486, %488 : vector<64x128xf32>
    %490 = arith.truncf %489 : vector<64x128xf32> to vector<64x128xbf16>
    %c0_130 = arith.constant 0 : index
    %c0_131 = arith.constant 0 : index
    %491 = vector.load %arg13[%c0_130, %c0_131] : memref<128x256xbf16, #tpu.memory_space<vmem>>, vector<128x256xbf16>
    %cst_132 = arith.constant dense<0.000000e+00> : vector<64x256xf32>
    %492 = tpu.matmul %490, %491, %cst_132 {dimension_numbers = #tpu.dot_dimension_numbers<[1], [0], [0], [1], [0, 0, 1, 1], [], []>} : vector<64x128xbf16>, vector<128x256xbf16>, vector<64x256xf32> -> vector<64x256xf32>
    %c0_133 = arith.constant 0 : index
    %c0_134 = arith.constant 0 : index
    %493 = vector.load %arg14[%c0_133, %c0_134] : memref<1x256xf32, #tpu.memory_space<vmem>>, vector<1x256xf32>
    %494 = vector.broadcast %493 : vector<1x256xf32> to vector<64x256xf32>
    %495 = arith.addf %492, %494 : vector<64x256xf32>
    %cst_135 = arith.constant 0.000000e+00 : f32
    %496 = vector.broadcast %cst_135 : f32 to vector<64x256xf32>
    %497 = arith.maximumf %495, %496 : vector<64x256xf32>
    %498 = arith.truncf %497 : vector<64x256xf32> to vector<64x256xbf16>
    %c0_136 = arith.constant 0 : index
    %c0_137 = arith.constant 0 : index
    %499 = vector.load %arg15[%c0_136, %c0_137] : memref<256x128xbf16, #tpu.memory_space<vmem>>, vector<256x128xbf16>
    %cst_138 = arith.constant dense<0.000000e+00> : vector<64x128xf32>
    %500 = tpu.matmul %498, %499, %cst_138 {dimension_numbers = #tpu.dot_dimension_numbers<[1], [0], [0], [1], [0, 0, 1, 1], [], []>} : vector<64x256xbf16>, vector<256x128xbf16>, vector<64x128xf32> -> vector<64x128xf32>
    %c0_139 = arith.constant 0 : index
    %c0_140 = arith.constant 0 : index
    %501 = vector.load %arg16[%c0_139, %c0_140] : memref<1x128xf32, #tpu.memory_space<vmem>>, vector<1x128xf32>
    %502 = vector.broadcast %501 : vector<1x128xf32> to vector<64x128xf32>
    %503 = arith.addf %500, %502 : vector<64x128xf32>
    %504 = arith.addf %489, %503 : vector<64x128xf32>
    %c2 = arith.constant 2 : index
    %c0_141 = arith.constant 0 : index
    %505 = vector.load %arg17[%c2, %c0_141] : memref<3x128xf32, #tpu.memory_space<vmem>>, vector<1x128xf32>
    %506 = vector.shape_cast %505 : vector<1x128xf32> to vector<128xf32>
    %c2_142 = arith.constant 2 : index
    %c0_143 = arith.constant 0 : index
    %507 = vector.load %arg18[%c2_142, %c0_143] : memref<3x128xf32, #tpu.memory_space<vmem>>, vector<1x128xf32>
    %508 = vector.shape_cast %507 : vector<1x128xf32> to vector<128xf32>
    %cst_144 = arith.constant dense<0.000000e+00> : vector<64xf32>
    %509 = vector.multi_reduction <add>, %504, %cst_144 [1] : vector<64x128xf32> to vector<64xf32>
    %510 = vector.shape_cast %509 : vector<64xf32> to vector<64x1xf32>
    %cst_145 = arith.constant 1.280000e+02 : f32
    %511 = vector.broadcast %cst_145 : f32 to vector<64x1xf32>
    %512 = arith.divf %510, %511 : vector<64x1xf32>
    %513 = vector.broadcast %512 : vector<64x1xf32> to vector<64x128xf32>
    %514 = arith.subf %504, %513 : vector<64x128xf32>
    %515 = arith.mulf %514, %514 : vector<64x128xf32>
    %cst_146 = arith.constant dense<0.000000e+00> : vector<64xf32>
    %516 = vector.multi_reduction <add>, %515, %cst_146 [1] : vector<64x128xf32> to vector<64xf32>
    %517 = vector.shape_cast %516 : vector<64xf32> to vector<64x1xf32>
    %cst_147 = arith.constant 1.280000e+02 : f32
    %518 = vector.broadcast %cst_147 : f32 to vector<64x1xf32>
    %519 = arith.divf %517, %518 : vector<64x1xf32>
    %520 = vector.broadcast %512 : vector<64x1xf32> to vector<64x128xf32>
    %521 = arith.subf %504, %520 : vector<64x128xf32>
    %cst_148 = arith.constant 9.99999974E-6 : f32
    %522 = vector.broadcast %cst_148 : f32 to vector<64x1xf32>
    %523 = arith.addf %519, %522 : vector<64x1xf32>
    %524 = math.rsqrt %523 : vector<64x1xf32>
    %525 = vector.broadcast %524 : vector<64x1xf32> to vector<64x128xf32>
    %526 = arith.mulf %521, %525 : vector<64x128xf32>
    %527 = vector.shape_cast %506 : vector<128xf32> to vector<1x128xf32>
    %528 = vector.broadcast %527 : vector<1x128xf32> to vector<64x128xf32>
    %529 = arith.mulf %526, %528 : vector<64x128xf32>
    %530 = vector.shape_cast %508 : vector<128xf32> to vector<1x128xf32>
    %531 = vector.broadcast %530 : vector<1x128xf32> to vector<64x128xf32>
    %532 = arith.addf %529, %531 : vector<64x128xf32>
    %c0_149 = arith.constant 0 : index
    %c0_150 = arith.constant 0 : index
    %533 = vector.load %arg20[%c0_149, %c0_150] : memref<64x128xf32, #tpu.memory_space<vmem>>, vector<64x128xf32>
    tpu.vector_store %arg20[%c0_149, %c0_150], %532 {strides = array<i32>} : memref<64x128xf32, #tpu.memory_space<vmem>>, vector<64x128xf32>,
    return
  }
  func.func @transform_0(%arg0: i32) -> (i32, i32) {
    %c0_i32 = arith.constant 0 : i32
    %c0_i32_0 = arith.constant 0 : i32
    return %arg0, %c0_i32 : i32, i32
  }
  func.func @transform_1(%arg0: i32) -> (i32, i32) {
    %c0_i32 = arith.constant 0 : i32
    %c0_i32_0 = arith.constant 0 : i32
    return %arg0, %c0_i32 : i32, i32
  }
  func.func @transform_2(%arg0: i32) -> (i32, i32) {
    %c0_i32 = arith.constant 0 : i32
    %c0_i32_0 = arith.constant 0 : i32
    %c0_i32_1 = arith.constant 0 : i32
    return %c0_i32, %c0_i32_0 : i32, i32
  }
  func.func @transform_3(%arg0: i32) -> (i32, i32) {
    %c0_i32 = arith.constant 0 : i32
    %c0_i32_0 = arith.constant 0 : i32
    %c0_i32_1 = arith.constant 0 : i32
    return %c0_i32, %c0_i32_0 : i32, i32
  }
  func.func @transform_4(%arg0: i32) -> (i32, i32) {
    %c0_i32 = arith.constant 0 : i32
    %c0_i32_0 = arith.constant 0 : i32
    %c0_i32_1 = arith.constant 0 : i32
    return %c0_i32, %c0_i32_0 : i32, i32
  }
  func.func @transform_5(%arg0: i32) -> (i32, i32) {
    %c0_i32 = arith.constant 0 : i32
    %c0_i32_0 = arith.constant 0 : i32
    %c0_i32_1 = arith.constant 0 : i32
    return %c0_i32, %c0_i32_0 : i32, i32
  }
  func.func @transform_6(%arg0: i32) -> (i32, i32) {
    %c0_i32 = arith.constant 0 : i32
    %c0_i32_0 = arith.constant 0 : i32
    %c0_i32_1 = arith.constant 0 : i32
    return %c0_i32, %c0_i32_0 : i32, i32
  }
  func.func @transform_7(%arg0: i32) -> (i32, i32) {
    %c0_i32 = arith.constant 0 : i32
    %c0_i32_0 = arith.constant 0 : i32
    %c0_i32_1 = arith.constant 0 : i32
    return %c0_i32, %c0_i32_0 : i32, i32
  }
  func.func @transform_8(%arg0: i32) -> (i32, i32) {
    %c0_i32 = arith.constant 0 : i32
    %c0_i32_0 = arith.constant 0 : i32
    %c0_i32_1 = arith.constant 0 : i32
    return %c0_i32, %c0_i32_0 : i32, i32
  }
  func.func @transform_9(%arg0: i32) -> (i32, i32) {
    %c0_i32 = arith.constant 0 : i32
    %c0_i32_0 = arith.constant 0 : i32
    %c0_i32_1 = arith.constant 0 : i32
    return %c0_i32, %c0_i32_0 : i32, i32
  }
  func.func @transform_10(%arg0: i32) -> (i32, i32) {
    %c0_i32 = arith.constant 0 : i32
    %c0_i32_0 = arith.constant 0 : i32
    %c0_i32_1 = arith.constant 0 : i32
    return %c0_i32, %c0_i32_0 : i32, i32
  }
  func.func @transform_11(%arg0: i32) -> (i32, i32) {
    %c0_i32 = arith.constant 0 : i32
    %c0_i32_0 = arith.constant 0 : i32
    %c0_i32_1 = arith.constant 0 : i32
    return %c0_i32, %c0_i32_0 : i32, i32
  }
  func.func @transform_12(%arg0: i32) -> (i32, i32) {
    %c0_i32 = arith.constant 0 : i32
    %c0_i32_0 = arith.constant 0 : i32
    %c0_i32_1 = arith.constant 0 : i32
    return %c0_i32, %c0_i32_0 : i32, i32
  }
  func.func @transform_13(%arg0: i32) -> (i32, i32) {
    %c0_i32 = arith.constant 0 : i32
    %c0_i32_0 = arith.constant 0 : i32
    %c0_i32_1 = arith.constant 0 : i32
    return %c0_i32, %c0_i32_0 : i32, i32
  }
  func.func @transform_14(%arg0: i32) -> (i32, i32) {
    %c0_i32 = arith.constant 0 : i32
    %c0_i32_0 = arith.constant 0 : i32
    %c0_i32_1 = arith.constant 0 : i32
    return %c0_i32, %c0_i32_0 : i32, i32
  }
  func.func @transform_15(%arg0: i32) -> (i32, i32) {
    %c0_i32 = arith.constant 0 : i32
    %c0_i32_0 = arith.constant 0 : i32
    %c0_i32_1 = arith.constant 0 : i32
    return %c0_i32, %c0_i32_0 : i32, i32
  }
  func.func @transform_16(%arg0: i32) -> (i32, i32) {
    %c0_i32 = arith.constant 0 : i32
    %c0_i32_0 = arith.constant 0 : i32
    %c0_i32_1 = arith.constant 0 : i32
    return %c0_i32, %c0_i32_0 : i32, i32
  }
  func.func @transform_17(%arg0: i32) -> (i32, i32) {
    %c0_i32 = arith.constant 0 : i32
    %c0_i32_0 = arith.constant 0 : i32
    %c0_i32_1 = arith.constant 0 : i32
    return %c0_i32, %c0_i32_0 : i32, i32
  }
  func.func @transform_18(%arg0: i32) -> (i32, i32) {
    %c0_i32 = arith.constant 0 : i32
    %c0_i32_0 = arith.constant 0 : i32
    %c0_i32_1 = arith.constant 0 : i32
    return %c0_i32, %c0_i32_0 : i32, i32
  }
  func.func @transform_19(%arg0: i32) -> (i32, i32) {
    %c0_i32 = arith.constant 0 : i32
    %c0_i32_0 = arith.constant 0 : i32
    return %arg0, %c0_i32 : i32, i32
  }
}

</mosaic_0001>

<bundles_post_ra>
// kernel: tpu_custom_call.1
= control target key start
LH: loop header
LB: loop body
LE: loop exit
PB: predicated region body
PF: predicated region fallthrough
CT: control target
= control target key end

     0   :  { %s9040_s0 = inlined_call_operand.hbm [shape: f32[256,128], index: 0, kind: input, shape index: {}]   ;;  %s9041_s1 = inlined_call_operand.hbm [shape: f32[256,128], index: 1, kind: input, shape index: {}]   ;;  %s9042_s2 = inlined_call_operand.hbm [shape: bf16[128,384], index: 2, kind: input, shape index: {}]   ;;  %s9043_s3 = inlined_call_operand.hbm [shape: f32[1,384], index: 3, kind: input, shape index: {}]   ;;  %s9044_s4 = inlined_call_operand.hbm [shape: bf16[128,128], index: 4, kind: input, shape index: {}]   ;;  %s9045_s5 = inlined_call_operand.hbm [shape: f32[1,128], index: 5, kind: input, shape index: {}]   ;;  %s9046_s6 = inlined_call_operand.hbm [shape: bf16[128,256], index: 6, kind: input, shape index: {}]   ;;  %s9047_s7 = inlined_call_operand.hbm [shape: f32[1,256], index: 7, kind: input, shape index: {}]   ;;  %s9048_s8 = inlined_call_operand.hbm [shape: bf16[128,128], index: 8, kind: input, shape index: {}]   ;;  %s9049_s9 = inlined_call_operand.vmem [shape: f32[1,128], index: 9, kind: input, shape index: {}]   ;;  %s9050_s10 = inlined_call_operand.hbm [shape: bf16[128,128], index: 10, kind: input, shape index: {}]   ;;  %s9051_s11 = inlined_call_operand.vmem [shape: f32[1,128], index: 11, kind: input, shape index: {}]   ;;  %s9052_s12 = inlined_call_operand.hbm [shape: bf16[128,256], index: 12, kind: input, shape index: {}]   ;;  %s9053_s13 = inlined_call_operand.vmem [shape: f32[1,256], index: 13, kind: input, shape index: {}]   ;;  %s9054_s14 = inlined_call_operand.hbm [shape: bf16[256,128], index: 14, kind: input, shape index: {}]   ;;  %s9055_s15 = inlined_call_operand.vmem [shape: f32[1,128], index: 15, kind: input, shape index: {}]   ;;  %s9056_s16 = inlined_call_operand.vmem [shape: f32[3,128], index: 16, kind: input, shape index: {}]   ;;  %s9057_s17 = inlined_call_operand.vmem [shape: f32[3,128], index: 17, kind: input, shape index: {}]   ;;  %s9058_s18 = inlined_call_operand.vmem [shape: f32[4,128], index: 18, kind: input, shape index: {}]   ;;  %s9059_s19 = inlined_call_operand.hbm [shape: f32[256,128], index: 19, kind: output, shape index: {}]  }
   0x1   :  { %9077 = sst [smem:[#allocation38_spill]] %s9040_s0 }
   0x2   :  { %9078 = sst [smem:[#allocation39_spill]] %s9041_s1 }
   0x3   :  { %9079 = sst [smem:[#allocation40_spill]] %s9042_s2 }
   0x4   :  { %9080 = sst [smem:[#allocation41_spill]] %s9043_s3 }
   0x5   :  { %9081 = sst [smem:[#allocation42_spill]] %s9044_s4 }
   0x6   :  { %9082 = sst [smem:[#allocation43_spill]] %s9045_s5 }
   0x7   :  { %9083 = sst [smem:[#allocation44_spill]] %s9046_s6 }
   0x8   :  { %9084 = sst [smem:[#allocation45_spill]] %s9047_s7 }
   0x9   :  { %9085 = sst [smem:[#allocation46_spill]] %s9048_s8 }
   0xa   :  { %9086 = sst [smem:[#allocation47_spill]] %s9049_s9 }
   0xb   :  { %9087 = sst [smem:[#allocation48_spill]] %s9050_s10 }
   0xc   :  { %9088 = sst [smem:[#allocation49_spill]] %s9051_s11 }
   0xd   :  { %9089 = sst [smem:[#allocation50_spill]] %s9052_s12 }
   0xe   :  { %9090 = sst [smem:[#allocation51_spill]] %s9053_s13 }
   0xf   :  { %9091 = sst [smem:[#allocation52_spill]] %s9054_s14 }
  0x10   :  { %9092 = sst [smem:[#allocation53_spill]] %s9055_s15 }
  0x11   :  { %9093 = sst [smem:[#allocation54_spill]] %s9057_s17 }
  0x12   :  { %9094 = sst [smem:[#allocation55_spill]] %s9059_s19 }
  0x13   :  { %24 = vsyncpa [#allocation5], 0 }
  0x14   :  { %26 = vsyncpa [#allocation5 + $0x1], 0 }
  0x15   :  { %27 = vsyncpa [#allocation8], 0 }
  0x16   :  { %29 = vsyncpa [#allocation8 + $0x1], 0 }
  0x17   :  { %30 = vsyncpa [#allocation11], 0 }
  0x18   :  { %31 = vsyncpa [#allocation14], 0 }
  0x19   :  { %32 = vsyncpa [#allocation17], 0 }
  0x1a   :  { %33 = vsyncpa [#allocation20], 0 }
  0x1b   :  { %34 = vsyncpa [#allocation23], 0 }
  0x1c   :  { %35 = vsyncpa [#allocation6], 0 }
  0x1d   :  { %37 = vsyncpa [#allocation6 + $0x1], 0  ;;  %s7526_s0 = smov 0   ;;  %s7528_s30 = smov 0  }
  0x1e   :  { %s7530_s20 = smov 0   ;;  %s7532_s21 = smov 0  }
  0x1f LB: > { %s7403_s1 = smov [#allocation9]   ;;  %s7547_s2 = sadd.s32 4294967295, %s7401_s21   ;;  %s7401_s21 = sphi %s7532_s21, %s9150_s21   ;;  %s7397_s20 = sphi %s7530_s20, %s9149_s20   ;;  %s7393_s30 = sphi %s7528_s30, %s9148_s30   ;;  %s7389_s0 = sphi %s7526_s0, %s9147_s0  }
  0x20   : > { %s495_s22 = sshll.u32 %s7403_s1, 4  ;;  %p5574_p0 = scmp.ge.s32.totalorder %s7401_s21, 1  ;;  %s496_s22 = int_to_ptr.vmem [resolvable:$true] %s495_s22 }
  0x21   : > { %p9068_p1 = scmp.eq.s32.totalorder %s7547_s2, 0  ;;  %p483_p2 = scmp.lt.s32.totalorder %s7401_s21, 5 }
  0x22   : > { %s7404_s24 = smov [#allocation10]   ;;  %s7405_s26 = smov [#allocation13]  }
  0x23   : > { %p7552_p3 = pnand %p5574_p0, %p483_p2  ;;  %s509_s25 = sshll.u32 %s7404_s24, 4  ;;  %s510_s25 = int_to_ptr.vmem [resolvable:$true] %s509_s25 }
  0x24   : > { %s533_s27 = sshll.u32 %s7405_s26, 4  ;;  %s7004_s29 = scalar_lea.vmem %s496_s22, 3072  ;;  %s7564_s27 = int_to_ptr.vmem [resolvable:$true] %s533_s27 }
  0x25   : > { %p6420_p4 = pneg %p7552_p3  ;;  %p7005_p7 = scmp.ne.s32.totalorder %s496_s22, %s7004_s29 }
  0x26   : > { %p7012_p10 = scmp.lt.s32.totalorder %s496_s22, %s496_s22  ;;  %p7013_p11 = scmp.lt.s32.totalorder %s7004_s29, %s7004_s29 }
  0x27   : > { %p7560_p5 = pnand %p6420_p4, %p9068_p1 }
  0x28   : > { %p7014_p12 = por %p7013_p11, %p7012_p10 }
  0x29   : > { %p7568_p6 = pneg %p7560_p5 }
  0x2b   : > { %p7007_p8 = pnand %p7005_p7, %p7568_p6 }
  0x2d   : > { %p7008_p9 = pneg %p7007_p8 }
  0x2f   : > { %p7015_p13 = pnand %p7014_p12, %p7008_p9 }
  0x31   : > { %7018 = shalt.err (!%p7015_p13)
}
  0x32   : > { %s7406_s1 = smov 192   ;;  %s7407_s24 = smov 12  }
  0x33   : > { %s9098_s15 = sld [smem:[#allocation40_spill]]  ;;  %s7030_s13 = scalar_lea.vmem %s510_s25, 48 }
  0x34   : > { %p7031_p0 = scmp.ne.s32.totalorder %s510_s25, %s7030_s13  ;;  %s7037_s11 = scalar_lea.vmem %s510_s25, 64 }
  0x35   : > { %p7038_p7 = scmp.lt.s32.totalorder %s510_s25, %s510_s25  ;;  %p7039_p8 = scmp.lt.s32.totalorder %s7037_s11, %s7030_s13 }
  0x36   : > { %p7033_p2 = pnand %p7031_p0, %p7568_p6 }
  0x37   : > { %p7040_p10 = por %p7039_p8, %p7038_p7 }
  0x38   : > { %p7034_p4 = pneg %p7033_p2 }
  0x39   : > { %6423 = dma.hbm_to_vmem [thread:$0]  (!%p7560_p5), %s9098_s15, 3072, %s496_s22, [#allocation8], %s7406_s1, %s7406_s1, %s7407_s24  }
  0x3a   : > { %p7041_p9 = pnand %p7040_p10, %p7034_p4 }
  0x3c   : > { %7044 = shalt.err (!%p7041_p9)
}
  0x3d   : > { %s9099_s17 = sld [smem:[#allocation41_spill]]  ;;  %s7056_s15 = scalar_lea.vmem %s7564_s27, 16 }
  0x3e   : > { %p7057_p11 = scmp.ne.s32.totalorder %s7564_s27, %s7056_s15  ;;  %s7063_s11 = scalar_lea.vmem %s7564_s27, 32 }
  0x3f   : > { %p7064_p0 = scmp.lt.s32.totalorder %s7564_s27, %s7564_s27  ;;  %p7065_p2 = scmp.lt.s32.totalorder %s7063_s11, %s7056_s15 }
  0x40   : > { %p7059_p12 = pnand %p7057_p11, %p7568_p6 }
  0x41   : > { %p7066_p4 = por %p7065_p2, %p7064_p0 }
  0x42   : > { %p7060_p13 = pneg %p7059_p12 }
  0x43   : > { %6426 = dma.hbm_to_vmem [thread:$0]  (!%p7560_p5), %s9099_s17, 48, %s510_s25, [#allocation11]  }
  0x44   : > { %p7067_p7 = pnand %p7066_p4, %p7060_p13 }
  0x46   : > { %7070 = shalt.err (!%p7067_p7)
}
  0x47   : > { %s9100_s5 = sld [smem:[#allocation43_spill]]  ;;  %s7408_s17 = smov [#allocation16]  }
  0x48   : > { %s557_s19 = sshll.u32 %s7408_s17, 4  ;;  %s558_s19 = int_to_ptr.vmem [resolvable:$true] %s557_s19 }
  0x49   : > { %s7082_s22 = scalar_lea.vmem %s558_s19, 32  ;;  %p7090_p11 = scmp.lt.s32.totalorder %s558_s19, %s558_s19 }
  0x4a   : > { %p7083_p8 = scmp.ne.s32.totalorder %s558_s19, %s7082_s22  ;;  %p7091_p12 = scmp.lt.s32.totalorder %s7082_s22, %s7082_s22 }
  0x4c   : > { %p7085_p10 = pnand %p7083_p8, %p7568_p6  ;;  %p7092_p13 = por %p7091_p12, %p7090_p11 }
  0x4d   : > { %6432 = dma.hbm_to_vmem [thread:$0]  (!%p7560_p5), %s9100_s5, 16, %s7564_s27, [#allocation14]  }
  0x4e   : > { %p7086_p9 = pneg %p7085_p10 }
  0x50   : > { %p7093_p0 = pnand %p7092_p13, %p7086_p9 }
  0x52   : > { %7096 = shalt.err (!%p7093_p0)
}
  0x53   : > { %s9101_s7 = sld [smem:[#allocation45_spill]]  ;;  %s7409_s27 = smov [#allocation19]  }
  0x54   : > { %s583_s24 = sshll.u32 %s7409_s27, 4  ;;  %s7410_s26 = smov [#allocation12]   ;;  %s584_s24 = int_to_ptr.vmem [resolvable:$true] %s583_s24 }
  0x55   : > { %s519_s29 = sshll.u32 %s7410_s26, 4  ;;  %s7108_s15 = scalar_lea.vmem %s584_s24, 1024  ;;  %s520_s29 = int_to_ptr.vmem [resolvable:$true] %s519_s29 }
  0x56   : > { %p7109_p2 = scmp.ne.s32.totalorder %s584_s24, %s7108_s15  ;;  %p7116_p8 = scmp.lt.s32.totalorder %s584_s24, %s584_s24 }
  0x57   : > { %p7117_p10 = scmp.lt.s32.totalorder %s7108_s15, %s7108_s15 }
  0x58   : > { %p7111_p4 = pnand %p7109_p2, %p7568_p6 }
  0x59   : > { %6438 = dma.hbm_to_vmem [thread:$0]  (!%p7560_p5), %s9101_s7, 32, %s558_s19, [#allocation17]  }
  0x5a   : > { %p7112_p7 = pneg %p7111_p4  ;;  %p7118_p9 = por %p7117_p10, %p7116_p8 }
  0x5c   : > { %p7119_p11 = pnand %p7118_p9, %p7112_p7 }
  0x5e   : > { %7122 = shalt.err (!%p7119_p11)
}
  0x5f   : > { %s7411_s11 = smov 64   ;;  %s7412_s9 = smov 4  }
  0x60   : > { %s9102_s10 = sld [smem:[#allocation48_spill]]  ;;  %s7134_s19 = scalar_lea.vmem %s520_s29, 1024 }
  0x61   : > { %p7135_p12 = scmp.ne.s32.totalorder %s520_s29, %s7134_s19  ;;  %p7142_p2 = scmp.lt.s32.totalorder %s520_s29, %s520_s29 }
  0x62   : > { %p7143_p4 = scmp.lt.s32.totalorder %s7134_s19, %s7134_s19 }
  0x63   : > { %p7137_p13 = pnand %p7135_p12, %p7568_p6 }
  0x64   : > { %p7144_p7 = por %p7143_p4, %p7142_p2 }
  0x65   : > { %p7138_p0 = pneg %p7137_p13 }
  0x66   : > { %6444 = dma.hbm_to_vmem [thread:$0]  (!%p7560_p5), %s9102_s10, 1024, %s584_s24, [#allocation20], %s7411_s11, %s7411_s11, %s7412_s9  }
  0x67   : > { %p7145_p8 = pnand %p7144_p7, %p7138_p0 }
  0x69   : > { %7148 = shalt.err (!%p7145_p8)
}
  0x6a   : > { %s9103_s4 = sld [smem:[#allocation42_spill]]  ;;  %s7413_s1 = smov [#allocation15]  }
  0x6b   : > { %s543_s27 = sshll.u32 %s7413_s1, 4  ;;  %s544_s27 = int_to_ptr.vmem [resolvable:$true] %s543_s27 }
  0x6c   : > { %s7160_s24 = scalar_lea.vmem %s544_s27, 2048  ;;  %p7168_p12 = scmp.lt.s32.totalorder %s544_s27, %s544_s27 }
  0x6d   : > { %p7161_p10 = scmp.ne.s32.totalorder %s544_s27, %s7160_s24  ;;  %p7169_p13 = scmp.lt.s32.totalorder %s7160_s24, %s7160_s24 }
  0x6f   : > { %p7163_p9 = pnand %p7161_p10, %p7568_p6  ;;  %p7170_p0 = por %p7169_p13, %p7168_p12 }
  0x70   : > { %6429 = dma.hbm_to_vmem [thread:$0]  (!%p7560_p5), %s9103_s4, 1024, %s520_s29, [#allocation11], %s7411_s11, %s7411_s11, %s7412_s9  }
  0x71   : > { %p7164_p11 = pneg %p7163_p9 }
  0x73   : > { %p7171_p2 = pnand %p7170_p0, %p7164_p11 }
  0x75   : > { %7174 = shalt.err (!%p7171_p2)
}
  0x76   : > { %s9064_s26 = smov 128   ;;  %s9066_s15 = smov 8  }
  0x77   : > { %s9104_s6 = sld [smem:[#allocation44_spill]]  ;;  %s7416_s17 = smov [#allocation18]  }
  0x78   : > { %s567_s19 = sshll.u32 %s7416_s17, 4  ;;  %s7417_s22 = smov [#allocation21]   ;;  %s568_s19 = int_to_ptr.vmem [resolvable:$true] %s567_s19 }
  0x79   : > { %s599_s25 = sshll.u32 %s7417_s22, 4  ;;  %s7186_s1 = scalar_lea.vmem %s568_s19, 1024  ;;  %s600_s25 = int_to_ptr.vmem [resolvable:$true] %s599_s25 }
  0x7a   : > { %p7187_p4 = scmp.ne.s32.totalorder %s568_s19, %s7186_s1  ;;  %p7194_p10 = scmp.lt.s32.totalorder %s568_s19, %s568_s19 }
  0x7b   : > { %p7195_p9 = scmp.lt.s32.totalorder %s7186_s1, %s7186_s1 }
  0x7c   : > { %p7189_p7 = pnand %p7187_p4, %p7568_p6 }
  0x7d   : > { %6435 = dma.hbm_to_vmem [thread:$0]  (!%p7560_p5), %s9104_s6, 2048, %s544_s27, [#allocation14], %s9064_s26, %s9064_s26, %s9066_s15  }
  0x7e   : > { %p7190_p8 = pneg %p7189_p7  ;;  %p7196_p11 = por %p7195_p9, %p7194_p10 }
  0x80   : > { %p7197_p12 = pnand %p7196_p11, %p7190_p8 }
  0x82   : > { %7200 = shalt.err (!%p7197_p12)
}
  0x83   : > { %s9105_s8 = sld [smem:[#allocation46_spill]]  ;;  %s7212_s29 = scalar_lea.vmem %s600_s25, 2048 }
  0x84   : > { %p7213_p13 = scmp.ne.s32.totalorder %s600_s25, %s7212_s29  ;;  %p7220_p4 = scmp.lt.s32.totalorder %s600_s25, %s600_s25 }
  0x85   : > { %p7221_p7 = scmp.lt.s32.totalorder %s7212_s29, %s7212_s29 }
  0x86   : > { %p7215_p0 = pnand %p7213_p13, %p7568_p6 }
  0x87   : > { %p7222_p8 = por %p7221_p7, %p7220_p4 }
  0x88   : > { %p7216_p2 = pneg %p7215_p0 }
  0x89   : > { %6441 = dma.hbm_to_vmem [thread:$0]  (!%p7560_p5), %s9105_s8, 1024, %s568_s19, [#allocation17], %s7411_s11, %s7411_s11, %s7412_s9  }
  0x8a   : > { %p7223_p10 = pnand %p7222_p8, %p7216_p2 }
  0x8c   : > { %7226 = shalt.err (!%p7223_p10)
}
  0x8d   : > { %s9106_s12 = sld [smem:[#allocation50_spill]]  ;;  %s7418_s19 = smov [#allocation22]  }
  0x8e   : > { %s615_s22 = sshll.u32 %s7418_s19, 4  ;;  %s616_s22 = int_to_ptr.vmem [resolvable:$true] %s615_s22 }
  0x8f   : > { %s7238_s1 = scalar_lea.vmem %s616_s22, 2048  ;;  %p7246_p13 = scmp.lt.s32.totalorder %s616_s22, %s616_s22 }
  0x90   : > { %p7239_p9 = scmp.ne.s32.totalorder %s616_s22, %s7238_s1  ;;  %p7247_p0 = scmp.lt.s32.totalorder %s7238_s1, %s7238_s1 }
  0x92   : > { %p7241_p11 = pnand %p7239_p9, %p7568_p6  ;;  %p7248_p2 = por %p7247_p0, %p7246_p13 }
  0x93   : > { %6447 = dma.hbm_to_vmem [thread:$0]  (!%p7560_p5), %s9106_s12, 2048, %s600_s25, [#allocation20], %s9064_s26, %s9064_s26, %s9066_s15  }
  0x94   : > { %p7242_p12 = pneg %p7241_p11 }
  0x96   : > { %p7249_p4 = pnand %p7248_p2, %p7242_p12 }
  0x98   : > { %7252 = shalt.err (!%p7249_p4)
}
  0x99   : > { %s9107_s14 = sld [smem:[#allocation52_spill]]  ;;  %s5573_s3 = sadd.s32 4294967294, %s7401_s21  }
  0x9a   : > { %s7668_s28 = sadd.s32 1, %s7401_s21   ;;  %s50_s29 = sadd.s32 1, %s7397_s20 }
  0x9b   : > { %s47_s24 = ssub.s32 %s7401_s21, %s7668_s28  ;;  %p57_p7 = scmp.ne.s32.totalorder %s7397_s20, %s7393_s30 }
  0x9c   : > { %p48_p6 = scmp.eq.s32.totalorder %s47_s24, 0  ;;  %p58_p8 = scmp.eq.s32.totalorder %s7401_s21, 0 }
  0x9d   : > { %p63_p10 = scmp.ne.s32.totalorder %s7393_s30, %s7389_s0  ;;  %p470_p11 = scmp.eq.s32.totalorder %s7547_s2, 3 }
  0x9e   : > { %s7679_s13 = scalar_select %p48_p6, %s7397_s20, %s50_s29  }
  0x9f   : > { %6450 = dma.hbm_to_vmem [thread:$0]  (!%p7560_p5), %s9107_s14, 2048, %s616_s22, [#allocation23], %s7411_s11, %s7411_s11, %s7412_s9  }
  0xa0   : > { %p7681_p9 = por %p58_p8, %p57_p7  ;;  %p7687_p5 = por %p9068_p1, %p63_p10 }
  0xa1   : > { %p476_p12 = scmp.eq.s32.totalorder %s5573_s3, 3  ;;  %p6472_p13 = scmp.lt.s32.totalorder %s7401_s21, 4 }
  0xa2   : > { %s9109_s11 = scalar_select %p7687_p5, 1, 0 }
  0xa3   : > { %s641_s9 = sand.u32 1, %s7397_s20   ;;  %p7694_p0 = por %p470_p11, %p57_p7 }
  0xa4   : > { %p7698_p2 = por %p476_p12, %p63_p10  ;;  %s5586_s1 = sshll.u32 %s641_s9, 6 }
  0xa5   : > { %s9110_s19 = scalar_select %p7694_p0, 1, 0 }
  0xa6   : > { %s9111_s22 = scalar_select %p7698_p2, 1, 0 }
  0xa7   : > { %s5859_s27 = sshll.u32 %s7401_s21, 10  ;;  %s9112_s29 = sld [smem:[#allocation38_spill]] }
  0xa8   : > { %s645_s3 = scalar_lea.vmem [#allocation4], %s5586_s1  ;;  %p7712_p4 = pnand %p6472_p13, %p7681_p9 }
  0xa9   : > { %s652_s15 = sshll.u32 %s645_s3, 4  ;;  %s9114_s7 = sld [smem:[#allocation39_spill]]  ;;  %s7708_s15 = int_to_ptr.vmem [resolvable:$true] %s652_s15 }
  0xaa   : > { %s666_s24 = scalar_lea.vmem [#allocation7], %s5586_s1  ;;  %s7723_s10 = scalar_lea.sflag [#allocation5], %s641_s9 }
  0xab   : > { %s7721_s8 = sshll.u32 %s666_s24, 4  ;;  %p7255_p7 = pneg %p7712_p4  ;;  %s7754_s8 = int_to_ptr.vmem [resolvable:$true] %s7721_s8 }
  0xad   : > { %s7706_s26 = scalar_lea.hbm %s9112_s29, %s5859_s27  ;;  %s7258_s5 = scalar_lea.hbm %s9112_s29, 4096 }
  0xae   : > { %s7253_s3 = scalar_lea.hbm %s7706_s26, 1024  ;;  %p7259_p9 = scmp.lt.s32.totalorder %s7706_s26, %s9112_s29 }
  0xaf   : > { %s7719_s25 = scalar_lea.hbm %s9114_s7, %s5859_s27  ;;  %p7254_p6 = scmp.ne.s32.totalorder %s7706_s26, %s7253_s3 }
  0xb0   : > { %p7260_p11 = scmp.lt.s32.totalorder %s7258_s5, %s7253_s3 }
  0xb1   : > { %p7256_p8 = pnand %p7255_p7, %p7254_p6 }
  0xb2   : > { %p7261_p12 = por %p7260_p11, %p7259_p9 }
  0xb3   : > { %p7257_p10 = pneg %p7256_p8 }
  0xb5   : > { %p7262_p13 = pnand %p7261_p12, %p7257_p10 }
  0xb7   : > { %7265 = shalt.err (!%p7262_p13)
}
  0xb8   : > { %s7266_s9 = scalar_lea.vmem %s7708_s15, 1024  ;;  %s7419_s12 = smov [#allocation4]  }
  0xb9   : > { %p7267_p1 = scmp.ne.s32.totalorder %s7708_s15, %s7266_s9  ;;  %s7271_s1 = sshll.u32 %s7419_s12, 4  ;;  %s7272_s1 = int_to_ptr.vmem [resolvable:$false] %s7271_s1 }
  0xba   : > { %s7273_s24 = scalar_lea.vmem %s7272_s1, 2048  ;;  %p7274_p2 = scmp.lt.s32.totalorder %s7708_s15, %s7272_s1 }
  0xbb   : > { %p7269_p6 = pnand %p7267_p1, %p7255_p7  ;;  %p7275_p0 = scmp.lt.s32.totalorder %s7273_s24, %s7266_s9 }
  0xbd   : > { %p7270_p8 = pneg %p7269_p6  ;;  %p7276_p5 = por %p7275_p0, %p7274_p2 }
  0xbf   : > { %p7277_p9 = pnand %p7276_p5, %p7270_p8 }
  0xc1   : > { %7280 = shalt.err (!%p7277_p9)
}
  0xc2   : > { %s9115_s3 = smov 8   ;;  %s9116_s17 = smov 128  }
  0xc3   : > { %6454 = dma.hbm_to_vmem [thread:$0]  (!%p7712_p4), %s7706_s26, 1024, %s7708_s15, %s7723_s10, %s9116_s17, %s9116_s17, %s9115_s3  }
  0xc4   : > { %s662_s5 = sand.u32 1, %s7401_s21   ;;  %s7281_s27 = scalar_lea.hbm %s7719_s25, 1024 }
  0xc5   : > { %s663_s6 = scalar_lea.sflag [#allocation8], %s662_s5  ;;  %p7282_p1 = scmp.ne.s32.totalorder %s7719_s25, %s7281_s27 }
  0xc6   : > { %s7286_s1 = scalar_lea.hbm %s9114_s7, 4096  ;;  %p7287_p2 = scmp.lt.s32.totalorder %s7719_s25, %s9114_s7 }
  0xc7   : > { %p7284_p5 = pnand %p7282_p1, %p7255_p7  ;;  %p7288_p10 = scmp.lt.s32.totalorder %s7286_s1, %s7281_s27 }
  0xc9   : > { %p7285_p0 = pneg %p7284_p5  ;;  %p7289_p11 = por %p7288_p10, %p7287_p2 }
  0xcb   : > { %p7290_p12 = pnand %p7289_p11, %p7285_p0 }
  0xcd   : > { %7293 = shalt.err (!%p7290_p12)
}
  0xce   : > { %s7294_s10 = scalar_lea.vmem %s7754_s8, 1024  ;;  %s7420_s26 = smov [#allocation7]  }
  0xcf   : > { %p7295_p13 = scmp.ne.s32.totalorder %s7754_s8, %s7294_s10  ;;  %s7299_s15 = sshll.u32 %s7420_s26, 4  ;;  %s7300_s15 = int_to_ptr.vmem [resolvable:$false] %s7299_s15 }
  0xd0   : > { %s7301_s5 = scalar_lea.vmem %s7300_s15, 2048  ;;  %p7302_p9 = scmp.lt.s32.totalorder %s7754_s8, %s7300_s15 }
  0xd1   : > { %p7297_p6 = pnand %p7295_p13, %p7255_p7  ;;  %p7303_p1 = scmp.lt.s32.totalorder %s7301_s5, %s7294_s10 }
  0xd3   : > { %p7298_p8 = pneg %p7297_p6  ;;  %p7304_p5 = por %p7303_p1, %p7302_p9 }
  0xd5   : > { %p7305_p2 = pnand %p7304_p5, %p7298_p8 }
  0xd7   : > { %7308 = shalt.err (!%p7305_p2)
}
  0xd8   : > { %6457 = dma.hbm_to_vmem [thread:$0]  (!%p7712_p4), %s7719_s25, 1024, %s7754_s8, %s663_s6, %s9116_s17, %s9116_s17, %s9115_s3  }
  0xd9   : > { %685 = sbr.rel (%p7552_p3) target bundleno = 4026 (0xfba), region = 96 }
  0xde   : > { %s7785_s14 = sand.u32 1, %s7393_s30   ;;  %p9117_p7 = scmp.ne.s32.totalorder %s9109_s11, 0 }
  0xdf   : > { %s7788_s27 = sshll.u32 %s7785_s14, 6  ;;  %s688_s9 = scalar_lea.sflag [#allocation5], %s7785_s14 }
  0xe0   : > { %s7792_s4 = scalar_lea.vmem [#allocation4], %s7788_s27 }
  0xe1   : > { %7352 = dma.done.wait (%p9117_p7), %s688_s9, 1024  }
  0xe2   : > { %7354 = vsyncadd (%p9117_p7), %s688_s9, 4294966272  ;;  %s696_s8 = sand.u32 1, %s7547_s2   ;;  %s7800_s25 = scalar_lea.vmem [#allocation7], %s7788_s27 }
  0xe3   : > { %s697_s23 = scalar_lea.sflag [#allocation8], %s696_s8 }
  0xe4   : > { %7356 = dma.done.wait (%p9117_p7), %s697_s23, 1024  }
  0xe5   : > { %7358 = vsyncadd (%p9117_p7), %s697_s23, 4294966272  ;;  %p9118_p3 = scmp.eq.s32.totalorder %s7547_s2, 0 }
  0xe7   : > { %7360 = dma.done.wait (%p9118_p3), [#allocation8], 3072   ;;  %p9119_p4 = pmov %p9118_p3 }
  0xe8   : > { %p9120_p0 = pmov %p9118_p3 }
  0xe9   : > { %7362 = vsyncadd (%p9119_p4), [#allocation8], 4294964224 }
  0xea   : > { %7364 = dma.done.wait (%p9120_p0), [#allocation11], 1072   ;;  %p9121_p10 = pmov %p9120_p0 }
  0xeb   : > { %p9122_p11 = pmov %p9120_p0 }
  0xec   : > { %7366 = vsyncadd (%p9121_p10), [#allocation11], 4294966224 }
  0xed   : > { %7368 = dma.done.wait (%p9122_p11), [#allocation14], 2064   ;;  %p9123_p12 = pmov %p9120_p0 }
  0xee   : > { %p9124_p13 = pmov %p9120_p0 }
  0xef   : > { %7370 = vsyncadd (%p9123_p12), [#allocation14], 4294965232 }
  0xf0   : > { %7372 = dma.done.wait (%p9124_p13), [#allocation17], 1056   ;;  %p9125_p6 = pmov %p9120_p0 }
  0xf1   : > { %p9126_p8 = pmov %p9120_p0 }
  0xf2   : > { %7374 = vsyncadd (%p9125_p6), [#allocation17], 4294966240 }
  0xf3   : > { %7376 = dma.done.wait (%p9126_p8), [#allocation20], 3072   ;;  %p9127_p9 = pmov %p9120_p0 }
  0xf4   : > { %p9128_p1 = pmov %p9120_p0 }
  0xf5   : > { %7378 = vsyncadd (%p9127_p9), [#allocation20], 4294964224 }
  0xf6   : > { %7380 = dma.done.wait (%p9128_p1), [#allocation23], 2048   ;;  %p9129_p5 = pmov %p9120_p0 }
  0xf7   : > { %v9071_v0 = vmov 0   ;;  %v6536_v1 = vld [vmem:[#allocation9 + $0xac] ss:$12 sps:$4 sm:$0xff]   ;;  %v6538_v2 = vld [vmem:[#allocation9 + $0xa8] ss:$12 sps:$4 sm:$0xff]   ;;  %v806_v10 = vld [vmem:[%s7792_s4] sm:$0xff]  ;;  %v864_v37 = vlaneseq }
  0xf8   : > { %7382 = vsyncadd (%p9129_p5), [#allocation23], 4294965248  ;;  %1039 = vmatprep.mubr.bf16.mxu0 %v9071_v0  ;;  %1007 = vmatprep.subr.bf16.mxu0 %v6536_v1  ;;  %v6539_v3 = vld [vmem:[#allocation9 + $0x94] ss:$12 sps:$4 sm:$0xff]   ;;  %v6541_v4 = vld [vmem:[#allocation9 + $0x90] ss:$12 sps:$4 sm:$0xff]  }
  0xf9   : > { %1008 = vmatpush1.bf16.msra.mxu0 %v6538_v2  ;;  %v6542_v5 = vld [vmem:[#allocation9 + $0x7c] ss:$12 sps:$4 sm:$0xff]   ;;  %v6544_v6 = vld [vmem:[#allocation9 + $0x78] ss:$12 sps:$4 sm:$0xff]   ;;  %v6547_v8 = vld [vmem:[#allocation9 + $0x60] ss:$12 sps:$4 sm:$0xff]  }
  0xfa   : > { %1009 = vmatprep.subr.bf16.mxu0 %v6539_v3  ;;  %v6545_v7 = vld [vmem:[#allocation9 + $0x64] ss:$12 sps:$4 sm:$0xff]   ;;  %v6548_v9 = vld [vmem:[#allocation9 + $0x4c] ss:$12 sps:$4 sm:$0xff]   ;;  %v6550_v15 = vld [vmem:[#allocation9 + $0x48] ss:$12 sps:$4 sm:$0xff]  }
  0xfb   : > { %v807_v11 = vld [vmem:[%s7792_s4 + $0x8] sm:$0xff]  ;;  %v6560_v13 = vld [vmem:[#allocation9 + $0xb0] ss:$12 sps:$4 sm:$0xff]   ;;  %v6561_v14 = vld [vmem:[#allocation9 + $0x98] ss:$12 sps:$4 sm:$0xff]   ;;  %v7842_v40 = vshrl.u32 %v864_v37, 7 }
  0xfc   : > { %v826_v12 = vpack.c.bf16 %v807_v11, %v806_v10  ;;  %6118 = vmatprep.subr.bf16.mxu1 %v6560_v13  ;;  %v6551_v16 = vld [vmem:[#allocation9 + $0x34] ss:$12 sps:$4 sm:$0xff]   ;;  %v6553_v18 = vld [vmem:[#allocation9 + $0x30] ss:$12 sps:$4 sm:$0xff]   ;;  %v6556_v21 = vld [vmem:[#allocation9 + $0x18] ss:$12 sps:$4 sm:$0xff]  }
  0xfd   : > { %1010 = vmatpush1.bf16.msra.mxu0 %v6541_v4  ;;  %6119 = vmatpush3.bf16.msra.mxu1 %v6560_v13  ;;  %v6562_v17 = vld [vmem:[#allocation9 + $0x80] ss:$12 sps:$4 sm:$0xff]   ;;  %v6554_v19 = vld [vmem:[#allocation9 + $0x1c] ss:$12 sps:$4 sm:$0xff]   ;;  %v6557_v22 = vld [vmem:[#allocation9 + $0x4] ss:$12 sps:$4 sm:$0xff]  }
  0xfe   : > { %1011 = vmatprep.subr.bf16.mxu0 %v6542_v5  ;;  %6134 = vmatprep.mubr.bf16.mxu1 %v826_v12  ;;  %v6563_v20 = vld [vmem:[#allocation9 + $0x68] ss:$12 sps:$4 sm:$0xff]   ;;  %v6564_v23 = vld [vmem:[#allocation9 + $0x50] ss:$12 sps:$4 sm:$0xff]   ;;  %v6559_v24 = vld [vmem:[#allocation9] ss:$12 sps:$4 sm:$0xff]  }
  0xff   : > { %6120 = vmatprep.subr.bf16.mxu1 %v6561_v14  ;;  %v6565_v25 = vld [vmem:[#allocation9 + $0x38] ss:$12 sps:$4 sm:$0xff]   ;;  %v6566_v26 = vld [vmem:[#allocation9 + $0x20] ss:$12 sps:$4 sm:$0xff]   ;;  %v6567_v27 = vld [vmem:[#allocation9 + $0x8] ss:$12 sps:$4 sm:$0xff]  }
 0x100   : > { %v808_v28 = vld [vmem:[%s7792_s4 + $0x10] sm:$0xff]  ;;  %v809_v29 = vld [vmem:[%s7792_s4 + $0x18] sm:$0xff]  ;;  %v810_v31 = vld [vmem:[%s7792_s4 + $0x20] sm:$0xff]  ;;  %v7422_v38 = vmov 1966171168   ;;  %v7853_v46 = vsub.s32 0, %v7842_v40 }
 0x101   : > { %1012 = vmatpush1.bf16.msra.mxu0 %v6544_v6  ;;  %6121 = vmatpush3.bf16.msra.mxu1 %v6561_v14  ;;  %v827_v30 = vpack.c.bf16 %v809_v29, %v808_v28  ;;  %v811_v32 = vld [vmem:[%s7792_s4 + $0x28] sm:$0xff]  ;;  %v812_v34 = vld [vmem:[%s7792_s4 + $0x30] sm:$0xff]  ;;  %v813_v35 = vld [vmem:[%s7792_s4 + $0x38] sm:$0xff]  ;;  %v1252_v39 = vunpack.c.l.s4 %v7422_v38  ;;  %v7856_v47 = vsub.s32 1, %v7842_v40  ;;  %v874_v38 = vsub.s32 2, %v7842_v40  ;;  %s9132_s24 = sld [smem:[#allocation54_spill]] }
 0x102   : > { %1013 = vmatprep.subr.bf16.mxu0 %v6545_v7  ;;  %6122 = vmatprep.subr.bf16.mxu1 %v6562_v17  ;;  %v828_v33 = vpack.c.bf16 %v811_v32, %v810_v31  ;;  %v829_v36 = vpack.c.bf16 %v813_v35, %v812_v34  ;;  %v7847_v42 = vld [vmem:[%s9058_s18] sm:$0xf]  ;;  %9130 = vst [vmem:[#allocation34_spill] sm:$0xff] %v7853_v46  ;;  %vm1444_vm0 = vcmask 130048   ;;  %s9135_s15 = sld [smem:[#allocation47_spill]]  ;;  %s5366_s17 = scalar_lea.sflag [#allocation6], %s7785_s14 }
 0x103   : > { %v1253_v41 = vunpack.c.0.s8 %v1252_v39  ;;  %v805_v43 = vpack.c.bf16 %v7847_v42, %v7847_v42  ;;  %9131 = vst [vmem:[#allocation35_spill] sm:$0xff] %v7856_v47  ;;  %v862_v48 = vld [vmem:[#allocation10] sm:$0x7]  ;;  %s9140_s6 = sld [smem:[#allocation51_spill]]  ;;  %p9145_p7 = scmp.ne.s32.totalorder %s9110_s19, 0 }
 0x104   : > { %v7859_v50 = vrot.slane %v862_v48, %v7853_v46  ;;  %v7862_v53 = vrot.slane %v862_v48, %v7856_v47  ;;  %v875_v39 = vrot.slane %v862_v48, %v874_v38  ;;  %s9143_s10 = sld [smem:[#allocation53_spill]] }
 0x105   : > { %1014 = vmatpush1.bf16.msra.mxu0 %v6547_v8  ;;  %6123 = vmatpush3.bf16.msra.mxu1 %v6562_v17  ;;  %v1256_v44 = vsub.s32 %v1253_v41, %v7842_v40  ;;  %s9144_s11 = sld [smem:[#allocation55_spill]] }
 0x106   : > { %1015 = vmatprep.subr.bf16.mxu0 %v6548_v9  ;;  %6124 = vmatprep.subr.bf16.mxu1 %v6563_v20 }
 0x107   : > { %v1257_v45 = vrot.slane %v805_v43, %v1256_v44 }
 0x109   : > { %1016 = vmatpush1.bf16.msra.mxu0 %v6550_v15  ;;  %6125 = vmatpush3.bf16.msra.mxu1 %v6563_v20  ;;  %v1265_v49 = vrot.slane %v1257_v45, %v1256_v44  ;;  %v1258_v51 = vcombine.high %v1257_v45, %v1257_v45 }
 0x10a   : > { %1017 = vmatprep.subr.bf16.mxu0 %v6551_v16  ;;  %6126 = vmatprep.subr.bf16.mxu1 %v6564_v23 }
 0x10b   : > { %v5646_v52 = vpack.i.b16 %v1265_v49, %v1265_v49  ;;  %v1274_v55 = vunpack.i.h.s16 %v1265_v49  ;;  %v1272_v58 = vrot.slane %v1258_v51, %v1256_v44 }
 0x10d   : > { %1018 = vmatpush1.bf16.msra.mxu0 %v6553_v18  ;;  %6127 = vmatpush3.bf16.msra.mxu1 %v6564_v23  ;;  %v1284_v60 = vrot.slane %v5646_v52, %v7853_v46  ;;  %v1278_v61 = vpack.i.b16 %v1274_v55, %v1274_v55  ;;  %v5647_v63 = vpack.i.b16 %v1272_v58, %v1272_v58  ;;  %v1276_v6 = vunpack.i.h.s16 %v1272_v58 }
 0x10e   : > { %1019 = vmatprep.subr.bf16.mxu0 %v6554_v19  ;;  %6128 = vmatprep.subr.bf16.mxu1 %v6565_v25 }
 0x10f   : > { %v1298_v5 = vpack.i.b16 %v1284_v60, %v1284_v60  ;;  %v1288_v7 = vrot.slane %v1278_v61, %v7853_v46  ;;  %v1292_v9 = vrot.slane %v5647_v63, %v7853_v46  ;;  %v1280_v11 = vpack.i.b16 %v1276_v6, %v1276_v6 }
 0x111   : > { %1020 = vmatpush1.bf16.msra.mxu0 %v6556_v21  ;;  %6129 = vmatpush3.bf16.msra.mxu1 %v6565_v25  ;;  %v1303_v10 = vrot.slane %v1298_v5, %v7853_v46  ;;  %v1312_v13 = vpack.i.b16 %v1292_v9, %v1292_v9  ;;  %v1296_v17 = vrot.slane %v1280_v11, %v7853_v46 }
 0x112   : > { %1021 = vmatprep.subr.bf16.mxu0 %v6557_v22  ;;  %6130 = vmatprep.subr.bf16.mxu1 %v6566_v26 }
 0x113   : > { %v7872_v14 = vcombine.low %v1303_v10, %v1303_v10  ;;  %v1317_v18 = vrot.slane %v1312_v13, %v7853_v46 }
 0x115   : > { %1022 = vmatpush1.bf16.msra.mxu0 %v6559_v24  ;;  %6131 = vmatpush3.bf16.msra.mxu1 %v6566_v26  ;;  %v1319_v24 = vpack.i.b16 %v1296_v17, %v1296_v17  ;;  %v7881_v26 = vcombine.low %v1317_v18, %v1317_v18 }
 0x116   : > { %6132 = vmatprep.subr.bf16.mxu1 %v6567_v27 }
 0x118   : > { %1040 = vmatmul.mubr.bf16.vlgmr.msra.gmra.mxu0 %v826_v12  ;;  %v1305_v12 = vpack.i.b16 %v1288_v7, %v1288_v7 }
 0x119   : > { %1049 = vmatprep.mubr.bf16.mxu0 %v9071_v0  ;;  %6133 = vmatpush3.bf16.msra.mxu1 %v6567_v27 }
 0x11a   : > { %v1310_v15 = vrot.slane %v1305_v12, %v7853_v46 }
 0x11c   : > { %6135 = vmatmul.mubr.bf16.vlgmr.msra.gmra.mxu1 %v827_v30  ;;  %v7879_v23 = vcombine.low %v1310_v15, %v1310_v15 }
 0x11d   : > { %6138 = vmatprep.mubr.bf16.mxu1 %v828_v33 }
 0x120   : > { %1050 = vmatmul.mubr.bf16.gmra.mxu0 %v827_v30  ;;  %v1324_v30 = vrot.slane %v1319_v24, %v7853_v46 }
 0x121   : > { %1059 = vmatprep.mubr.bf16.mxu0 %v9071_v0 }
 0x122   : > { %v7888_v34 = vcombine.low %v1324_v30, %v1324_v30 }
 0x124   : > { %6139 = vmatmul.mubr.bf16.gmra.mxu1 %v829_v36 }
 0x128   : > { %1060 = vmatmul.mubr.bf16.gmra.mxu0 %v828_v33 }
 0x129   : > { %1069 = vmatprep.mubr.bf16.mxu0 %v9071_v0 }
 0x130   : > { %1070 = vmatmul.mubr.bf16.gmra.mxu0 %v829_v36 }
 0x1d8   : > { %v1041_v54 = vpop.f32.mrf.mxu0 }
 0x1d9   : > { %v1042_v57 = vadd.f32 %v1041_v54, %v7859_v50 }
 0x1da   : > { %v1043_v56 = vpop.f32.mrf.mxu0 }
 0x1db   : > { %v1044_v59 = vadd.f32 %v1043_v56, %v7862_v53 }
 0x1dc   : > { %v1045_v62 = vpop.f32.mrf.mxu0  ;;  %v6136_v41 = vpop.f32.mrf.mxu1 }
 0x1dd   : > { %v5861_v1 = vpack.c.bf16 %v1044_v59, %v1042_v57  ;;  %v1046_v3 = vadd.f32 %v1045_v62, %v7859_v50  ;;  %v1123_v43 = vadd.f32 %v6136_v41, %v875_v39 }
 0x1de   : > { %v1047_v2 = vpop.f32.mrf.mxu0  ;;  %v1114_v44 = vpop.f32.mrf.mxu1 }
 0x1df   : > { %1225 = vst [vmem:[#allocation2] sm:$0xff] %v5861_v1  ;;  %v1048_v4 = vadd.f32 %v1047_v2, %v7862_v53  ;;  %v5866_v45 = vpack.c.bf16 %v1123_v43, %v1123_v43  ;;  %v1115_v49 = vadd.f32 %v1114_v44, %v875_v39 }
 0x1e0   : > { %v6137_v51 = vpop.f32.mrf.mxu1 }
 0x1e1   : > { %v5863_v8 = vpack.c.bf16 %v1048_v4, %v1046_v3  ;;  %1230 = vst [vmem:[#allocation2 + $0x20] sm:$0xf] %v5866_v45  ;;  %v5862_v52 = vpack.c.bf16 %v1115_v49, %v1115_v49  ;;  %v1126_v54 = vadd.f32 %v6137_v51, %v875_v39 }
 0x1e2   : > { %v1117_v55 = vpop.f32.mrf.mxu1 }
 0x1e3   : > { %1227 = vst [vmem:[#allocation2 + $0xc] sm:$0xff] %v5863_v8  ;;  %1226 = vst [vmem:[#allocation2 + $0x8] sm:$0xf] %v5862_v52  ;;  %v5868_v56 = vpack.c.bf16 %v1126_v54, %v1126_v54  ;;  %v1118_v57 = vadd.f32 %v1117_v55, %v875_v39 }
 0x1e4   : > { %v6140_v58 = vpop.f32.mrf.mxu1 }
 0x1e5   : > { %1232 = vst [vmem:[#allocation2 + $0x2c] sm:$0xf] %v5868_v56  ;;  %v5864_v59 = vpack.c.bf16 %v1118_v57, %v1118_v57  ;;  %v1139_v60 = vadd.f32 %v6140_v58, %v875_v39 }
 0x1e6   : > { %v1244_v16 = vld [vmem:[#allocation2] sm:$0xf]  ;;  %v1130_v61 = vpop.f32.mrf.mxu1 }
 0x1e7   : > { %v1341_v21 = vmul.bf16 %v7872_v14, %v1244_v16  ;;  %v1343_v29 = vmul.bf16 %v7879_v23, %v1244_v16  ;;  %v1345_v31 = vmul.bf16 %v7881_v26, %v1244_v16  ;;  %v1347_v36 = vmul.bf16 %v7888_v34, %v1244_v16  ;;  %1228 = vst [vmem:[#allocation2 + $0x14] sm:$0xf] %v5864_v59 }
 0x1e8   : > { %v5874_v48 = vpack.c.bf16 %v1139_v60, %v1139_v60  ;;  %v1131_v62 = vadd.f32 %v1130_v61, %v875_v39  ;;  %v6141_v63 = vpop.f32.mrf.mxu1 }
 0x1e9   : > { %v1142_v2 = vadd.f32 %v6141_v63, %v875_v39 }
 0x1ea   : > { %v6568_v19 = vld [vmem:[#allocation2 + $0x4] ss:$12 sps:$4 sm:$0xff]   ;;  %v1245_v20 = vld [vmem:[#allocation2 + $0xc] sm:$0xf]  ;;  %1238 = vst [vmem:[#allocation2 + $0x50] sm:$0xf] %v5874_v48  ;;  %v5870_v1 = vpack.c.bf16 %v1131_v62, %v1131_v62  ;;  %v1133_v3 = vpop.f32.mrf.mxu1 }
 0x1eb   : > { %v1342_v22 = vmul.bf16 %v7872_v14, %v1245_v20  ;;  %6142 = vmatprep.subr.bf16.mxu1 %v6568_v19  ;;  %v1344_v27 = vmul.bf16 %v7879_v23, %v1245_v20  ;;  %v1346_v28 = vmul.bf16 %v7881_v26, %v1245_v20  ;;  %v1348_v35 = vmul.bf16 %v7888_v34, %v1245_v20 }
 0x1ec   : > { %6143 = vmatpush3.bf16.xpose.msra.mxu1 %v6568_v19  ;;  %1234 = vst [vmem:[#allocation2 + $0x38] sm:$0xf] %v5870_v1  ;;  %v5876_v4 = vpack.c.bf16 %v1142_v2, %v1142_v2  ;;  %v1134_v5 = vadd.f32 %v1133_v3, %v875_v39  ;;  %v6570_v6 = vld [vmem:[#allocation2 + $0x20] ss:$12 sps:$4 sm:$0xff]  }
 0x1ed   : > { %v5652_v25 = vcombine.low %v1341_v21, %v1342_v22  ;;  %v5653_v32 = vcombine.low %v1343_v29, %v1344_v27  ;;  %v5654_v33 = vcombine.low %v1345_v31, %v1346_v28  ;;  %v5655_v37 = vcombine.low %v1347_v36, %v1348_v35  ;;  %6172 = vmatprep.subr.bf16.mxu0 %v6570_v6 }
 0x1ee   : > { %1240 = vst [vmem:[#allocation2 + $0x5c] sm:$0xf] %v5876_v4  ;;  %v5872_v7 = vpack.c.bf16 %v1134_v5, %v1134_v5  ;;  %v6569_v8 = vld [vmem:[#allocation2 + $0x8] ss:$12 sps:$4 sm:$0xff]   ;;  %6173 = vmatpush3.bf16.msra.mxu0 %v6570_v6 }
 0x1ef   : > { %6144 = vmatprep.mubr.bf16.mxu1 %v5652_v25  ;;  %6152 = vmatprep.subr.bf16.mxu1 %v6569_v8 }
 0x1f0   : > { %1236 = vst [vmem:[#allocation2 + $0x44] sm:$0xf] %v5872_v7 }
 0x1f3   : > { %6145 = vmatmul.mubr.bf16.vlgmr.msra.gmra.mxu1 %v5653_v32 }
 0x1f4   : > { %6148 = vmatprep.mubr.bf16.mxu1 %v5654_v33  ;;  %6153 = vmatpush3.bf16.msra.mxu1 %v6569_v8 }
 0x1f7   : > { %v6571_v9 = vld [vmem:[#allocation2 + $0x38] ss:$12 sps:$4 sm:$0xff]  }
 0x1f8   : > { %6192 = vmatprep.subr.bf16.mxu0 %v6571_v9 }
 0x1fb   : > { %6149 = vmatmul.mubr.bf16.gmra.mxu1 %v5655_v37 }
 0x2b3   : > { %v6146_v10 = vpop.f32.mrf.mxu1 }
 0x2b4   : > { %v1451_v11 = vsel %vm1444_vm0, %v6146_v10, -inf }
 0x2b5   : > { %1452 = vmax.xlane.f32.xlu1 %v1451_v11  ;;  %v1413_v12 = vpop.f32.mrf.mxu1 }
 0x2b6   : > { %v1445_v13 = vsel %vm1444_vm0, %v1413_v12, -inf }
 0x2b7   : > { %1446 = vmax.xlane.f32.xlu0 %v1445_v13  ;;  %v6147_v15 = vpop.f32.mrf.mxu1 }
 0x2b8   : > { %v1454_v16 = vsel %vm1444_vm0, %v6147_v15, -inf }
 0x2b9   : > { %1455 = vmax.xlane.f32.xlu1 %v1454_v16  ;;  %v1416_v17 = vpop.f32.mrf.mxu1 }
 0x2ba   : > { %v1448_v18 = vsel %vm1444_vm0, %v1416_v17, -inf }
 0x2bb   : > { %1449 = vmax.xlane.f32.xlu0 %v1448_v18  ;;  %v6150_v19 = vpop.f32.mrf.mxu1 }
 0x2bc   : > { %v1463_v25 = vsel %vm1444_vm0, %v6150_v19, -inf }
 0x2bd   : > { %v1429_v20 = vpop.f32.mrf.mxu1 }
 0x2be   : > { %v1457_v21 = vsel %vm1444_vm0, %v1429_v20, -inf }
 0x2bf   : > { %1458 = vmax.xlane.f32.xlu0 %v1457_v21  ;;  %v6151_v22 = vpop.f32.mrf.mxu1 }
 0x2c0   : > { %v1466_v28 = vsel %vm1444_vm0, %v6151_v22, -inf }
 0x2c1   : > { %v1432_v24 = vpop.f32.mrf.mxu1 }
 0x2c2   : > { %v1460_v27 = vsel %vm1444_vm0, %v1432_v24, -inf }
 0x2c3   : > { %1464 = vmax.xlane.f32.xlu0 %v1463_v25  ;;  %1461 = vmax.xlane.f32.xlu1 %v1460_v27 }
 0x2c7   : > { %1467 = vmax.xlane.f32.xlu1 %v1466_v28 }
 0x33e   : > { %v1453_v29 = vpop.xlane.xlu1 %1452 }
 0x33f   : > { %v1471_v30 = vsub.f32 %v6146_v10, %v1453_v29 }
 0x340   : > { %v1447_v31 = vpop.xlane.xlu0 %1446 }
 0x341   : > { %v1469_v32 = vsub.f32 %v1413_v12, %v1447_v31  ;;  %v1481_v35 = vmul.f32 1.442695, %v1471_v30 }
 0x342   : > { %v1456_v33 = vpop.xlane.xlu1 %1455 }
 0x343   : > { %v1477_v36 = vmul.f32 1.442695, %v1469_v32  ;;  %v1472_v37 = vsub.f32 %v6147_v15, %v1456_v33  ;;  %v1051_v15 = vpop.f32.mrf.mxu0 }
 0x344   : > { %v1450_v39 = vpop.xlane.xlu0 %1449 }
 0x345   : > { %6680 = vpow2.f32 %v1477_v36  ;;  %v1470_v41 = vsub.f32 %v1416_v17, %v1450_v39  ;;  %v1483_v43 = vmul.f32 1.442695, %v1472_v37  ;;  %v1053_v16 = vpop.f32.mrf.mxu0 }
 0x346   : > { %6682 = vpow2.f32 %v1481_v35 }
 0x347   : > { %v1479_v44 = vmul.f32 1.442695, %v1470_v41  ;;  %v1055_v17 = vpop.f32.mrf.mxu0 }
 0x348   : > { %v1459_v45 = vpop.xlane.xlu0 %1458  ;;  %v1056_v21 = vadd.f32 %v1055_v17, %v7859_v50 }
 0x349   : > { %6684 = vpow2.f32 %v1479_v44  ;;  %v1473_v49 = vsub.f32 %v1429_v20, %v1459_v45  ;;  %v1057_v18 = vpop.f32.mrf.mxu0  ;;  %v1054_v20 = vadd.f32 %v1053_v16, %v7862_v53 }
 0x34a   : > { %6686 = vpow2.f32 %v1483_v43 }
 0x34b   : > { %v1485_v51 = vmul.f32 1.442695, %v1473_v49  ;;  %v1061_v27 = vpop.f32.mrf.mxu0 }
 0x34c   : > { %v1465_v52 = vpop.xlane.xlu0 %1464  ;;  %v1462_v54 = vpop.xlane.xlu1 %1461  ;;  %v1062_v28 = vadd.f32 %v1061_v27, %v7859_v50 }
 0x34d   : > { %6688 = vpow2.f32 %v1485_v51  ;;  %v1475_v55 = vsub.f32 %v6150_v19, %v1465_v52  ;;  %v1474_v56 = vsub.f32 %v1432_v24, %v1462_v54  ;;  %v1052_v19 = vadd.f32 %v1051_v15, %v7859_v50  ;;  %v1063_v29 = vpop.f32.mrf.mxu0 }
 0x34e   : > { %v1064_v30 = vadd.f32 %v1063_v29, %v7862_v53 }
 0x34f   : > { %v1489_v57 = vmul.f32 1.442695, %v1475_v55  ;;  %v1487_v58 = vmul.f32 1.442695, %v1474_v56  ;;  %v5865_v24 = vpack.c.bf16 %v1054_v20, %v1052_v19  ;;  %v1065_v32 = vpop.f32.mrf.mxu0 }
 0x350   : > { %v1468_v59 = vpop.xlane.xlu1 %1467  ;;  %v5869_v33 = vpack.c.bf16 %v1064_v30, %v1062_v28  ;;  %v1066_v35 = vadd.f32 %v1065_v32, %v7859_v50 }
 0x351   : > { %6690 = vpow2.f32 %v1489_v57  ;;  %v1476_v60 = vsub.f32 %v6151_v22, %v1468_v59  ;;  %v1058_v22 = vadd.f32 %v1057_v18, %v7862_v53  ;;  %1229 = vst [vmem:[#allocation2 + $0x18] sm:$0xff] %v5865_v24  ;;  %v1067_v36 = vpop.f32.mrf.mxu0 }
 0x352   : > { %v7903_v61 = vpop.eup %6680  ;;  %6692 = vpow2.f32 %v1487_v58  ;;  %1233 = vst [vmem:[#allocation2 + $0x30] sm:$0xff] %v5869_v33  ;;  %v1068_v37 = vadd.f32 %v1067_v36, %v7862_v53 }
 0x353   : > { %v1491_v48 = vmul.f32 1.442695, %v1476_v60  ;;  %v1493_v62 = vsel %vm1444_vm0, %v7903_v61, 0.0  ;;  %v7907_v63 = vpop.eup %6682  ;;  %v5867_v25 = vpack.c.bf16 %v1058_v22, %v1056_v21  ;;  %v1071_v41 = vpop.f32.mrf.mxu0 }
 0x354   : > { %1494 = vadd.xlane.f32.xlu0 %v1493_v62  ;;  %v1499_v2 = vsel %vm1444_vm0, %v7907_v63, 0.0  ;;  %v5871_v39 = vpack.c.bf16 %v1068_v37, %v1066_v35  ;;  %v1072_v43 = vadd.f32 %v1071_v41, %v7859_v50 }
 0x355   : > { %6694 = vpow2.f32 %v1491_v48  ;;  %1231 = vst [vmem:[#allocation2 + $0x24] sm:$0xff] %v5867_v25  ;;  %v1073_v44 = vpop.f32.mrf.mxu0 }
 0x356   : > { %v7909_v1 = vpop.eup %6684  ;;  %1235 = vst [vmem:[#allocation2 + $0x3c] sm:$0xff] %v5871_v39  ;;  %v1074_v45 = vadd.f32 %v1073_v44, %v7862_v53 }
 0x357   : > { %v1496_v3 = vsel %vm1444_vm0, %v7909_v1, 0.0  ;;  %v7915_v4 = vpop.eup %6686  ;;  %v1075_v49 = vpop.f32.mrf.mxu0 }
 0x358   : > { %1500 = vadd.xlane.f32.xlu0 %v1499_v2  ;;  %1497 = vadd.xlane.f32.xlu1 %v1496_v3  ;;  %v1502_v7 = vsel %vm1444_vm0, %v7915_v4, 0.0  ;;  %v5873_v51 = vpack.c.bf16 %v1074_v45, %v1072_v43  ;;  %v1076_v52 = vadd.f32 %v1075_v49, %v7859_v50 }
 0x359   : > { %v1077_v54 = vpop.f32.mrf.mxu0 }
 0x35a   : > { %v7917_v5 = vpop.eup %6688  ;;  %1237 = vst [vmem:[#allocation2 + $0x48] sm:$0xff] %v5873_v51  ;;  %v1078_v55 = vadd.f32 %v1077_v54, %v7862_v53 }
 0x35b   : > { %v1505_v6 = vsel %vm1444_vm0, %v7917_v5, 0.0 }
 0x35c   : > { %1506 = vadd.xlane.f32.xlu0 %v1505_v6  ;;  %1503 = vadd.xlane.f32.xlu1 %v1502_v7  ;;  %v6572_v31 = vld [vmem:[#allocation2 + $0x1c] ss:$12 sps:$4 sm:$0xff]   ;;  %v5875_v56 = vpack.c.bf16 %v1078_v55, %v1076_v52  ;;  %v1664_v22 = vld [vmem:[#allocation2 + $0x24] sm:$0xf] }
 0x35d   : > { %6162 = vmatprep.subr.bf16.mxu1 %v6572_v31  ;;  %v6573_v19 = vld [vmem:[#allocation2 + $0x34] ss:$12 sps:$4 sm:$0xff]   ;;  %v1670_v27 = vmul.bf16 %v7872_v14, %v1664_v22  ;;  %v1674_v33 = vmul.bf16 %v7881_v26, %v1664_v22  ;;  %v1976_v39 = vld [vmem:[#allocation2 + $0x3c] sm:$0xf]  ;;  %v1676_v41 = vmul.bf16 %v7888_v34, %v1664_v22 }
 0x35e   : > { %v7923_v8 = vpop.eup %6690  ;;  %1239 = vst [vmem:[#allocation2 + $0x54] sm:$0xff] %v5875_v56  ;;  %v1982_v44 = vmul.bf16 %v7872_v14, %v1976_v39  ;;  %v1984_v52 = vmul.bf16 %v7879_v23, %v1976_v39  ;;  %v1986_v55 = vmul.bf16 %v7881_v26, %v1976_v39 }
 0x35f   : > { %v7925_v9 = vpop.eup %6692  ;;  %v1511_v10 = vsel %vm1444_vm0, %v7923_v8, 0.0 }
 0x360   : > { %1512 = vadd.xlane.f32.xlu0 %v1511_v10  ;;  %v1508_v11 = vsel %vm1444_vm0, %v7925_v9, 0.0 }
 0x361   : > { %1509 = vadd.xlane.f32.xlu1 %v1508_v11 }
 0x362   : > { %v7931_v12 = vpop.eup %6694 }
 0x363   : > { %v1514_v13 = vsel %vm1444_vm0, %v7931_v12, 0.0 }
 0x365   : > { %1515 = vadd.xlane.f32.xlu1 %v1514_v13  ;;  %v6574_v36 = vld [vmem:[#allocation2 + $0x4c] ss:$12 sps:$4 sm:$0xff]  }
 0x3dd   : > { %v1495_v57 = vpop.xlane.xlu0 %1494 }
 0x3de   : > { %6696 = vrcp.f32 %v1495_v57 }
 0x3e1   : > { %v1501_v58 = vpop.xlane.xlu0 %1500  ;;  %v1498_v59 = vpop.xlane.xlu1 %1497 }
 0x3e2   : > { %6698 = vrcp.f32 %v1498_v59  ;;  %v2288_v59 = vld [vmem:[#allocation2 + $0x54] sm:$0xf] }
 0x3e3   : > { %6700 = vrcp.f32 %v1501_v58  ;;  %v2287_v58 = vld [vmem:[#allocation2 + $0x48] sm:$0xf] }
 0x3e5   : > { %v1507_v60 = vpop.xlane.xlu0 %1506  ;;  %v1504_v48 = vpop.xlane.xlu1 %1503 }
 0x3e6   : > { %6702 = vrcp.f32 %v1504_v48  ;;  %v1988_v48 = vmul.bf16 %v7888_v34, %v1976_v39 }
 0x3e7   : > { %6704 = vrcp.f32 %v1507_v60 }
 0x3e9   : > { %v1513_v62 = vpop.xlane.xlu0 %1512 }
 0x3ea   : > { %v1510_v2 = vpop.xlane.xlu1 %1509 }
 0x3eb   : > { %6706 = vrcp.f32 %v1510_v2  ;;  %v6697_v50 = vpop.eup %6696  ;;  %v2294_v2 = vmul.bf16 %v7872_v14, %v2288_v59 }
 0x3ec   : > { %6708 = vrcp.f32 %v1513_v62  ;;  %v1525_v6 = vmul.f32 %v6697_v50, %v7903_v61  ;;  %v2293_v62 = vmul.bf16 %v7872_v14, %v2287_v58 }
 0x3ee   : > { %v1516_v3 = vpop.xlane.xlu1 %1515 }
 0x3ef   : > { %6710 = vrcp.f32 %v1516_v3  ;;  %v6699_v53 = vpop.eup %6698  ;;  %v5688_v3 = vcombine.low %v2293_v62, %v2294_v2 }
 0x3f0   : > { %v1526_v7 = vmul.f32 %v6699_v53, %v7909_v1  ;;  %v6701_v10 = vpop.eup %6700  ;;  %v1663_v1 = vld [vmem:[#allocation2 + $0x18] sm:$0xf]  ;;  %v2295_v53 = vmul.bf16 %v7879_v23, %v2287_v58 }
 0x3f1   : > { %v1527_v15 = vmul.f32 %v6701_v10, %v7907_v63  ;;  %v1673_v32 = vmul.bf16 %v7881_v26, %v1663_v1  ;;  %v2298_v10 = vmul.bf16 %v7881_v26, %v2288_v59 }
 0x3f2   : > { %v1533_v11 = vpack.c.bf16 %v1526_v7, %v1525_v6  ;;  %v2296_v6 = vmul.bf16 %v7879_v23, %v2288_v59  ;;  %v2297_v7 = vmul.bf16 %v7881_v26, %v2287_v58 }
 0x3f3   : > { %v6703_v13 = vpop.eup %6702  ;;  %v5666_v37 = vcombine.low %v1673_v32, %v1674_v33 }
 0x3f4   : > { %v1528_v16 = vmul.f32 %v6703_v13, %v7915_v4  ;;  %6154 = vmatprep.mubr.msk.bf16.mxu1 %vm1444_vm0, %v1533_v11  ;;  %v6705_v17 = vpop.eup %6704  ;;  %v1669_v4 = vmul.bf16 %v7872_v14, %v1663_v1  ;;  %v5689_v11 = vcombine.low %v2295_v53, %v2296_v6  ;;  %v5690_v13 = vcombine.low %v2297_v7, %v2298_v10 }
 0x3f5   : > { %v1529_v21 = vmul.f32 %v6705_v17, %v7917_v5 }
 0x3f6   : > { %v1534_v18 = vpack.c.bf16 %v1528_v16, %v1527_v15  ;;  %v5664_v30 = vcombine.low %v1669_v4, %v1670_v27  ;;  %v2299_v15 = vmul.bf16 %v7888_v34, %v2287_v58  ;;  %v2300_v16 = vmul.bf16 %v7888_v34, %v2288_v59 }
 0x3f8   : > { %v6707_v20 = vpop.eup %6706  ;;  %6155 = vmatmul.mubr.msk.bf16.vlgmr.msra.gmra.mxu1 %vm1444_vm0, %v1534_v18  ;;  %v5691_v17 = vcombine.low %v2299_v15, %v2300_v16 }
 0x3f9   : > { %v1530_v61 = vmul.f32 %v6707_v20, %v7925_v9  ;;  %v6709_v24 = vpop.eup %6708  ;;  %6163 = vmatpush3.bf16.xpose.msra.mxu1 %v6572_v31  ;;  %v1671_v9 = vmul.bf16 %v7879_v23, %v1663_v1  ;;  %v1672_v31 = vmul.bf16 %v7879_v23, %v1664_v22  ;;  %v7994_v22 = vrot.slane %v7847_v42, %v874_v38 }
 0x3fa   : > { %6182 = vmatprep.subr.bf16.mxu1 %v6573_v19  ;;  %v1531_v28 = vmul.f32 %v6709_v24, %v7923_v8  ;;  %v1975_v8 = vld [vmem:[#allocation2 + $0x30] sm:$0xf] }
 0x3fb   : > { %v1535_v25 = vpack.c.bf16 %v1530_v61, %v1529_v21  ;;  %v5665_v35 = vcombine.low %v1671_v9, %v1672_v31  ;;  %v1981_v43 = vmul.bf16 %v7872_v14, %v1975_v8  ;;  %v1983_v51 = vmul.bf16 %v7879_v23, %v1975_v8 }
 0x3fc   : > { %v6711_v63 = vpop.eup %6710  ;;  %v1985_v54 = vmul.bf16 %v7881_v26, %v1975_v8  ;;  %v1987_v60 = vmul.bf16 %v7888_v34, %v1975_v8  ;;  %v7985_v21 = vrot.slane %v7847_v42, %v7853_v46 }
 0x3fd   : > { %6158 = vmatprep.mubr.msk.bf16.mxu1 %vm1444_vm0, %v1535_v25  ;;  %v1532_v29 = vmul.f32 %v6711_v63, %v7931_v12  ;;  %v1675_v12 = vmul.bf16 %v7888_v34, %v1663_v1  ;;  %v5676_v49 = vcombine.low %v1981_v43, %v1982_v44  ;;  %v5677_v56 = vcombine.low %v1983_v51, %v1984_v52 }
 0x3fe   : > { %v5678_v57 = vcombine.low %v1985_v54, %v1986_v55  ;;  %v5679_v50 = vcombine.low %v1987_v60, %v1988_v48  ;;  %v7989_v1 = vrot.slane %v7847_v42, %v7856_v47  ;;  %v1644_v25 = vsub.s32 3, %v7842_v40 }
 0x3ff   : > { %v1536_v5 = vpack.c.bf16 %v1532_v29, %v1531_v28  ;;  %v5667_v45 = vcombine.low %v1675_v12, %v1676_v41 }
 0x400   : > { %v8003_v31 = vrot.slane %v7847_v42, %v1644_v25 }
 0x401   : > { %6159 = vmatmul.mubr.msk.bf16.gmra.mxu1 %vm1444_vm0, %v1536_v5 }
 0x402   : > { %6164 = vmatprep.mubr.bf16.mxu1 %v5664_v30 }
 0x409   : > { %6165 = vmatmul.mubr.bf16.vlgmr.msra.gmra.mxu1 %v5665_v35 }
 0x40a   : > { %6168 = vmatprep.mubr.bf16.mxu1 %v5666_v37  ;;  %6183 = vmatpush3.bf16.xpose.msra.mxu1 %v6573_v19 }
 0x40b   : > { %6202 = vmatprep.subr.bf16.mxu1 %v6574_v36 }
 0x411   : > { %6169 = vmatmul.mubr.bf16.gmra.mxu1 %v5667_v45 }
 0x412   : > { %6184 = vmatprep.mubr.bf16.mxu1 %v5676_v49 }
 0x419   : > { %6185 = vmatmul.mubr.bf16.vlgmr.msra.gmra.mxu1 %v5677_v56 }
 0x41a   : > { %6188 = vmatprep.mubr.bf16.mxu1 %v5678_v57  ;;  %6203 = vmatpush3.bf16.xpose.msra.mxu1 %v6574_v36 }
 0x421   : > { %6189 = vmatmul.mubr.bf16.gmra.mxu1 %v5679_v50 }
 0x422   : > { %6204 = vmatprep.mubr.bf16.mxu1 %v5688_v3 }
 0x429   : > { %6205 = vmatmul.mubr.bf16.vlgmr.msra.gmra.mxu1 %v5689_v11 }
 0x42a   : > { %6208 = vmatprep.mubr.bf16.mxu1 %v5690_v13 }
 0x431   : > { %6209 = vmatmul.mubr.bf16.gmra.mxu1 %v5691_v17 }
 0x4b8   : > { %v6156_v18 = vpop.f32.mrf.mxu1 }
 0x4b9   : > { %v1630_v27 = vmul.f32 %v6156_v18, %v7989_v1 }
 0x4ba   : > { %v1589_v19 = vpop.f32.mrf.mxu1 }
 0x4bb   : > { %v1624_v63 = vmul.f32 %v7985_v21, %v1589_v19 }
 0x4bc   : > { %v6157_v20 = vpop.f32.mrf.mxu1 }
 0x4bd   : > { %v1632_v30 = vadd.f32 %v1630_v27, %v1624_v63  ;;  %v1631_v9 = vmul.f32 %v6157_v20, %v7989_v1 }
 0x4be   : > { %v1592_v61 = vpop.f32.mrf.mxu1 }
 0x4bf   : > { %v1625_v28 = vmul.f32 %v7985_v21, %v1592_v61 }
 0x4c1   : > { %v6160_v24 = vpop.f32.mrf.mxu1  ;;  %v1633_v32 = vadd.f32 %v1631_v9, %v1625_v28 }
 0x4c2   : > { %v1646_v36 = vmul.f32 %v6160_v24, %v8003_v31 }
 0x4c3   : > { %v1605_v4 = vpop.f32.mrf.mxu1 }
 0x4c4   : > { %v1638_v29 = vmul.f32 %v7994_v22, %v1605_v4 }
 0x4c5   : > { %v6161_v5 = vpop.f32.mrf.mxu1 }
 0x4c6   : > { %v1640_v33 = vadd.f32 %v1638_v29, %v1632_v30  ;;  %v1647_v37 = vmul.f32 %v6161_v5, %v8003_v31 }
 0x4c7   : > { %v1608_v38 = vpop.f32.mrf.mxu1 }
 0x4c8   : > { %v1639_v40 = vmul.f32 %v7994_v22, %v1608_v38  ;;  %v1648_v12 = vadd.f32 %v1646_v36, %v1640_v33 }
 0x4c9   : > { %v8006_v35 = vpop.f32.mrf.mxu1 }
 0x4ca   : > { %v1641_v8 = vadd.f32 %v1639_v40, %v1633_v32  ;;  %v1778_v49 = vsel %vm1444_vm0, %v8006_v35, -inf }
 0x4cb   : > { %v8010_v39 = vpop.f32.mrf.mxu1 }
 0x4cc   : > { %v1649_v41 = vadd.f32 %v1647_v37, %v1641_v8  ;;  %v1772_v42 = vsel %vm1444_vm0, %v8010_v39, -inf }
 0x4cd   : > { %1773 = vmax.xlane.f32.xlu0 %v1772_v42  ;;  %v8014_v43 = vpop.f32.mrf.mxu1 }
 0x4ce   : > { %v5913_v44 = vpack.c.bf16 %v1649_v41, %v1648_v12  ;;  %v1781_v55 = vsel %vm1444_vm0, %v8014_v43, -inf }
 0x4cf   : > { %v8016_v45 = vpop.f32.mrf.mxu1 }
 0x4d0   : > { %5914 = vst [vmem:[#allocation3] sm:$0xff] %v5913_v44   ;;  %v1775_v51 = vsel %vm1444_vm0, %v8016_v45, -inf }
 0x4d1   : > { %1779 = vmax.xlane.f32.xlu0 %v1778_v49  ;;  %1776 = vmax.xlane.f32.xlu1 %v1775_v51  ;;  %v8022_v52 = vpop.f32.mrf.mxu1 }
 0x4d2   : > { %v1790_v60 = vsel %vm1444_vm0, %v8022_v52, -inf }
 0x4d3   : > { %v8024_v54 = vpop.f32.mrf.mxu1 }
 0x4d4   : > { %v1784_v56 = vsel %vm1444_vm0, %v8024_v54, -inf }
 0x4d5   : > { %1782 = vmax.xlane.f32.xlu1 %v1781_v55  ;;  %1785 = vmax.xlane.f32.xlu0 %v1784_v56  ;;  %v8030_v57 = vpop.f32.mrf.mxu1 }
 0x4d6   : > { %v1793_v3 = vsel %vm1444_vm0, %v8030_v57, -inf }
 0x4d7   : > { %v8032_v58 = vpop.f32.mrf.mxu1  ;;  %v6575_v59 = vld [vmem:[#allocation3] sm:$0xff]  }
 0x4d8   : > { %v1787_v48 = vsel %vm1444_vm0, %v8032_v58, -inf  ;;  %6238 = vmatprep.mubr.bf16.mxu1 %v6575_v59 }
 0x4d9   : > { %1791 = vmax.xlane.f32.xlu0 %v1790_v60  ;;  %v8038_v62 = vpop.f32.mrf.mxu1  ;;  %1788 = vmax.xlane.f32.xlu1 %v1787_v48 }
 0x4da   : > { %v2090_v7 = vsel %vm1444_vm0, %v8038_v62, -inf }
 0x4db   : > { %v8040_v2 = vpop.f32.mrf.mxu1 }
 0x4dc   : > { %v2084_v50 = vsel %vm1444_vm0, %v8040_v2, -inf }
 0x4dd   : > { %2085 = vmax.xlane.f32.xlu0 %v2084_v50  ;;  %v8046_v53 = vpop.f32.mrf.mxu1  ;;  %1794 = vmax.xlane.f32.xlu1 %v1793_v3 }
 0x4de   : > { %v2093_v16 = vsel %vm1444_vm0, %v8046_v53, -inf }
 0x4df   : > { %v8048_v6 = vpop.f32.mrf.mxu1 }
 0x4e0   : > { %v2087_v10 = vsel %vm1444_vm0, %v8048_v6, -inf }
 0x4e1   : > { %2091 = vmax.xlane.f32.xlu0 %v2090_v7  ;;  %v8054_v11 = vpop.f32.mrf.mxu1  ;;  %2088 = vmax.xlane.f32.xlu1 %v2087_v10 }
 0x4e2   : > { %v2102_v19 = vsel %vm1444_vm0, %v8054_v11, -inf }
 0x4e3   : > { %v8056_v13 = vpop.f32.mrf.mxu1 }
 0x4e4   : > { %v2096_v15 = vsel %vm1444_vm0, %v8056_v13, -inf }
 0x4e5   : > { %2097 = vmax.xlane.f32.xlu0 %v2096_v15  ;;  %v8062_v17 = vpop.f32.mrf.mxu1  ;;  %2094 = vmax.xlane.f32.xlu1 %v2093_v16 }
 0x4e6   : > { %v2105_v63 = vsel %vm1444_vm0, %v8062_v17, -inf }
 0x4e7   : > { %v8064_v18 = vpop.f32.mrf.mxu1 }
 0x4e8   : > { %v2099_v20 = vsel %vm1444_vm0, %v8064_v18, -inf }
 0x4e9   : > { %2103 = vmax.xlane.f32.xlu0 %v2102_v19  ;;  %v8070_v61 = vpop.f32.mrf.mxu1  ;;  %2100 = vmax.xlane.f32.xlu1 %v2099_v20 }
 0x4ea   : > { %v2402_v28 = vsel %vm1444_vm0, %v8070_v61, -inf }
 0x4eb   : > { %v8072_v24 = vpop.f32.mrf.mxu1 }
 0x4ec   : > { %v2396_v25 = vsel %vm1444_vm0, %v8072_v24, -inf }
 0x4ed   : > { %2397 = vmax.xlane.f32.xlu0 %v2396_v25  ;;  %v8078_v4 = vpop.f32.mrf.mxu1  ;;  %2106 = vmax.xlane.f32.xlu1 %v2105_v63 }
 0x4ee   : > { %v2405_v38 = vsel %vm1444_vm0, %v8078_v4, -inf }
 0x4ef   : > { %v8080_v27 = vpop.f32.mrf.mxu1 }
 0x4f0   : > { %v2399_v29 = vsel %vm1444_vm0, %v8080_v27, -inf }
 0x4f1   : > { %2403 = vmax.xlane.f32.xlu0 %v2402_v28  ;;  %v8086_v5 = vpop.f32.mrf.mxu1  ;;  %2400 = vmax.xlane.f32.xlu1 %v2399_v29 }
 0x4f2   : > { %v2414_v40 = vsel %vm1444_vm0, %v8086_v5, -inf }
 0x4f3   : > { %v8088_v30 = vpop.f32.mrf.mxu1 }
 0x4f4   : > { %v2408_v9 = vsel %vm1444_vm0, %v8088_v30, -inf }
 0x4f5   : > { %2409 = vmax.xlane.f32.xlu0 %v2408_v9  ;;  %v8094_v32 = vpop.f32.mrf.mxu1  ;;  %2406 = vmax.xlane.f32.xlu1 %v2405_v38 }
 0x4f6   : > { %v2417_v37 = vsel %vm1444_vm0, %v8094_v32, -inf }
 0x4f7   : > { %v8096_v33 = vpop.f32.mrf.mxu1 }
 0x4f8   : > { %v2411_v36 = vsel %vm1444_vm0, %v8096_v33, -inf }
 0x4f9   : > { %2415 = vmax.xlane.f32.xlu0 %v2414_v40  ;;  %2412 = vmax.xlane.f32.xlu1 %v2411_v36 }
 0x4fd   : > { %2418 = vmax.xlane.f32.xlu1 %v2417_v37 }
 0x556   : > { %v1774_v8 = vpop.xlane.xlu0 %1773 }
 0x557   : > { %v1796_v12 = vsub.f32 %v8010_v39, %v1774_v8 }
 0x559   : > { %v1804_v41 = vmul.f32 1.442695, %v1796_v12 }
 0x55a   : > { %v1780_v42 = vpop.xlane.xlu0 %1779  ;;  %v1777_v44 = vpop.xlane.xlu1 %1776 }
 0x55b   : > { %6712 = vpow2.f32 %v1804_v41  ;;  %v1798_v49 = vsub.f32 %v8006_v35, %v1780_v42  ;;  %v1797_v51 = vsub.f32 %v8016_v45, %v1777_v44 }
 0x55d   : > { %v1808_v55 = vmul.f32 1.442695, %v1798_v49  ;;  %v1806_v56 = vmul.f32 1.442695, %v1797_v51 }
 0x55e   : > { %v1783_v59 = vpop.xlane.xlu1 %1782  ;;  %v1786_v60 = vpop.xlane.xlu0 %1785 }
 0x55f   : > { %6714 = vpow2.f32 %v1808_v55  ;;  %v1799_v48 = vsub.f32 %v8014_v43, %v1783_v59  ;;  %v1800_v50 = vsub.f32 %v8024_v54, %v1786_v60 }
 0x560   : > { %6716 = vpow2.f32 %v1806_v56 }
 0x561   : > { %v1810_v3 = vmul.f32 1.442695, %v1799_v48  ;;  %v1812_v39 = vmul.f32 1.442695, %v1800_v50 }
 0x562   : > { %v1792_v7 = vpop.xlane.xlu0 %1791  ;;  %v1789_v10 = vpop.xlane.xlu1 %1788 }
 0x563   : > { %6718 = vpow2.f32 %v1810_v3  ;;  %v1802_v15 = vsub.f32 %v8022_v52, %v1792_v7  ;;  %v1801_v35 = vsub.f32 %v8032_v58, %v1789_v10 }
 0x564   : > { %6720 = vpow2.f32 %v1812_v39 }
 0x565   : > { %v1816_v45 = vmul.f32 1.442695, %v1802_v15  ;;  %v1814_v16 = vmul.f32 1.442695, %v1801_v35 }
 0x566   : > { %v2086_v19 = vpop.xlane.xlu0 %2085  ;;  %v1795_v20 = vpop.xlane.xlu1 %1794 }
 0x567   : > { %6722 = vpow2.f32 %v1816_v45  ;;  %v2108_v43 = vsub.f32 %v8040_v2, %v2086_v19  ;;  %v1803_v54 = vsub.f32 %v8030_v57, %v1795_v20 }
 0x568   : > { %v8113_v25 = vpop.eup %6712  ;;  %6724 = vpow2.f32 %v1814_v16 }
 0x569   : > { %v2116_v63 = vmul.f32 1.442695, %v2108_v43  ;;  %v1818_v28 = vmul.f32 1.442695, %v1803_v54  ;;  %v1820_v52 = vsel %vm1444_vm0, %v8113_v25, 0.0 }
 0x56a   : > { %v2092_v29 = vpop.xlane.xlu0 %2091  ;;  %1821 = vadd.xlane.f32.xlu0 %v1820_v52  ;;  %v2089_v58 = vpop.xlane.xlu1 %2088 }
 0x56b   : > { %6726 = vpow2.f32 %v2116_v63  ;;  %v2110_v9 = vsub.f32 %v8038_v62, %v2092_v29  ;;  %v2109_v38 = vsub.f32 %v8048_v6, %v2089_v58 }
 0x56c   : > { %v8119_v40 = vpop.eup %6714  ;;  %6728 = vpow2.f32 %v1818_v28 }
 0x56d   : > { %v8121_v57 = vpop.eup %6716  ;;  %v2120_v2 = vmul.f32 1.442695, %v2110_v9  ;;  %v2118_v36 = vmul.f32 1.442695, %v2109_v38  ;;  %v1826_v37 = vsel %vm1444_vm0, %v8119_v40, 0.0 }
 0x56e   : > { %v2098_v8 = vpop.xlane.xlu0 %2097  ;;  %1827 = vadd.xlane.f32.xlu0 %v1826_v37  ;;  %v1823_v12 = vsel %vm1444_vm0, %v8121_v57, 0.0  ;;  %v2095_v41 = vpop.xlane.xlu1 %2094 }
 0x56f   : > { %6730 = vpow2.f32 %v2120_v2  ;;  %v2112_v62 = vsub.f32 %v8056_v13, %v2098_v8  ;;  %1824 = vadd.xlane.f32.xlu1 %v1823_v12  ;;  %v2111_v6 = vsub.f32 %v8046_v53, %v2095_v41 }
 0x570   : > { %v8129_v42 = vpop.eup %6718  ;;  %6732 = vpow2.f32 %v2118_v36 }
 0x571   : > { %v8131_v44 = vpop.eup %6720  ;;  %v2124_v49 = vmul.f32 1.442695, %v2112_v62  ;;  %v2122_v51 = vmul.f32 1.442695, %v2111_v6  ;;  %v1829_v55 = vsel %vm1444_vm0, %v8129_v42, 0.0 }
 0x572   : > { %v2104_v56 = vpop.xlane.xlu0 %2103  ;;  %v1832_v59 = vsel %vm1444_vm0, %v8131_v44, 0.0  ;;  %v2101_v60 = vpop.xlane.xlu1 %2100 }
 0x573   : > { %6734 = vpow2.f32 %v2124_v49  ;;  %v2114_v13 = vsub.f32 %v8054_v11, %v2104_v56  ;;  %1833 = vadd.xlane.f32.xlu0 %v1832_v59  ;;  %1830 = vadd.xlane.f32.xlu1 %v1829_v55  ;;  %v2113_v53 = vsub.f32 %v8064_v18, %v2101_v60 }
 0x574   : > { %v8139_v48 = vpop.eup %6722  ;;  %6736 = vpow2.f32 %v2122_v51 }
 0x575   : > { %v8141_v50 = vpop.eup %6724  ;;  %v2128_v3 = vmul.f32 1.442695, %v2114_v13  ;;  %v2126_v39 = vmul.f32 1.442695, %v2113_v53  ;;  %v1838_v7 = vsel %vm1444_vm0, %v8139_v48, 0.0 }
 0x576   : > { %v2398_v10 = vpop.xlane.xlu0 %2397  ;;  %v1835_v15 = vsel %vm1444_vm0, %v8141_v50, 0.0  ;;  %v2107_v35 = vpop.xlane.xlu1 %2106 }
 0x577   : > { %6738 = vpow2.f32 %v2128_v3  ;;  %v2420_v11 = vsub.f32 %v8072_v24, %v2398_v10  ;;  %1839 = vadd.xlane.f32.xlu0 %v1838_v7  ;;  %1836 = vadd.xlane.f32.xlu1 %v1835_v15  ;;  %v2115_v18 = vsub.f32 %v8062_v17, %v2107_v35 }
 0x578   : > { %v8149_v45 = vpop.eup %6726  ;;  %6740 = vpow2.f32 %v2126_v39 }
 0x579   : > { %v8151_v16 = vpop.eup %6728  ;;  %v2428_v19 = vmul.f32 1.442695, %v2420_v11  ;;  %v2130_v20 = vmul.f32 1.442695, %v2115_v18  ;;  %v2132_v43 = vsel %vm1444_vm0, %v8149_v45, 0.0 }
 0x57a   : > { %v2404_v54 = vpop.xlane.xlu0 %2403  ;;  %v1841_v63 = vsel %vm1444_vm0, %v8151_v16, 0.0  ;;  %v2401_v28 = vpop.xlane.xlu1 %2400 }
 0x57b   : > { %6742 = vpow2.f32 %v2428_v19  ;;  %v2422_v24 = vsub.f32 %v8070_v61, %v2404_v54  ;;  %2133 = vadd.xlane.f32.xlu0 %v2132_v43  ;;  %1842 = vadd.xlane.f32.xlu1 %v1841_v63  ;;  %v2421_v17 = vsub.f32 %v8080_v27, %v2401_v28 }
 0x57c   : > { %v8159_v52 = vpop.eup %6730  ;;  %6744 = vpow2.f32 %v2130_v20 }
 0x57d   : > { %v8161_v29 = vpop.eup %6732  ;;  %v2432_v58 = vmul.f32 1.442695, %v2422_v24  ;;  %v2430_v9 = vmul.f32 1.442695, %v2421_v17  ;;  %v2138_v38 = vsel %vm1444_vm0, %v8159_v52, 0.0 }
 0x57e   : > { %v2410_v2 = vpop.xlane.xlu0 %2409  ;;  %v2135_v36 = vsel %vm1444_vm0, %v8161_v29, 0.0  ;;  %v2407_v37 = vpop.xlane.xlu1 %2406 }
 0x57f   : > { %6746 = vpow2.f32 %v2432_v58  ;;  %2139 = vadd.xlane.f32.xlu0 %v2138_v38  ;;  %v2424_v61 = vsub.f32 %v8088_v30, %v2410_v2  ;;  %2136 = vadd.xlane.f32.xlu1 %v2135_v36  ;;  %v2423_v27 = vsub.f32 %v8078_v4, %v2407_v37 }
 0x580   : > { %v8169_v8 = vpop.eup %6734  ;;  %6748 = vpow2.f32 %v2430_v9 }
 0x581   : > { %v8171_v12 = vpop.eup %6736  ;;  %v2436_v41 = vmul.f32 1.442695, %v2424_v61  ;;  %v2434_v62 = vmul.f32 1.442695, %v2423_v27  ;;  %v2144_v6 = vsel %vm1444_vm0, %v8169_v8, 0.0 }
 0x582   : > { %v2416_v49 = vpop.xlane.xlu0 %2415  ;;  %v2141_v51 = vsel %vm1444_vm0, %v8171_v12, 0.0  ;;  %v2413_v55 = vpop.xlane.xlu1 %2412 }
 0x583   : > { %6750 = vpow2.f32 %v2436_v41  ;;  %2145 = vadd.xlane.f32.xlu0 %v2144_v6  ;;  %v2426_v30 = vsub.f32 %v8086_v5, %v2416_v49  ;;  %2142 = vadd.xlane.f32.xlu1 %v2141_v51  ;;  %v2425_v4 = vsub.f32 %v8096_v33, %v2413_v55 }
 0x584   : > { %v8179_v56 = vpop.eup %6738  ;;  %6752 = vpow2.f32 %v2434_v62 }
 0x585   : > { %v8181_v59 = vpop.eup %6740  ;;  %v2440_v60 = vmul.f32 1.442695, %v2426_v30  ;;  %v2438_v13 = vmul.f32 1.442695, %v2425_v4  ;;  %v2150_v53 = vsel %vm1444_vm0, %v8179_v56, 0.0 }
 0x586   : > { %v2147_v3 = vsel %vm1444_vm0, %v8181_v59, 0.0  ;;  %v2419_v39 = vpop.xlane.xlu1 %2418 }
 0x587   : > { %6754 = vpow2.f32 %v2440_v60  ;;  %2151 = vadd.xlane.f32.xlu0 %v2150_v53  ;;  %2148 = vadd.xlane.f32.xlu1 %v2147_v3  ;;  %v2427_v5 = vsub.f32 %v8094_v32, %v2419_v39 }
 0x588   : > { %v8188_v33 = vpop.eup %6742  ;;  %6756 = vpow2.f32 %v2438_v13 }
 0x589   : > { %v8190_v7 = vpop.eup %6744  ;;  %v2442_v10 = vmul.f32 1.442695, %v2427_v5  ;;  %v2444_v15 = vsel %vm1444_vm0, %v8188_v33, 0.0 }
 0x58a   : > { %v2153_v35 = vsel %vm1444_vm0, %v8190_v7, 0.0 }
 0x58b   : > { %6758 = vpow2.f32 %v2442_v10  ;;  %2445 = vadd.xlane.f32.xlu0 %v2444_v15  ;;  %2154 = vadd.xlane.f32.xlu1 %v2153_v35 }
 0x58c   : > { %v8196_v11 = vpop.eup %6746 }
 0x58d   : > { %v8198_v18 = vpop.eup %6748  ;;  %v2450_v32 = vsel %vm1444_vm0, %v8196_v11, 0.0 }
 0x58e   : > { %v2447_v19 = vsel %vm1444_vm0, %v8198_v18, 0.0 }
 0x58f   : > { %2451 = vadd.xlane.f32.xlu0 %v2450_v32  ;;  %2448 = vadd.xlane.f32.xlu1 %v2447_v19 }
 0x590   : > { %v8204_v20 = vpop.eup %6750 }
 0x591   : > { %v8206_v43 = vpop.eup %6752  ;;  %v2456_v54 = vsel %vm1444_vm0, %v8204_v20, 0.0 }
 0x592   : > { %v2453_v63 = vsel %vm1444_vm0, %v8206_v43, 0.0 }
 0x593   : > { %2457 = vadd.xlane.f32.xlu0 %v2456_v54  ;;  %2454 = vadd.xlane.f32.xlu1 %v2453_v63  ;;  %v6576_v54 = vld [vmem:[#allocation2 + $0x50] ss:$12 sps:$4 sm:$0xff]  }
 0x594   : > { %v8212_v28 = vpop.eup %6754 }
 0x595   : > { %v8214_v24 = vpop.eup %6756  ;;  %v2462_v17 = vsel %vm1444_vm0, %v8212_v28, 0.0 }
 0x596   : > { %v2459_v58 = vsel %vm1444_vm0, %v8214_v24, 0.0 }
 0x597   : > { %2463 = vadd.xlane.f32.xlu0 %v2462_v17  ;;  %2460 = vadd.xlane.f32.xlu1 %v2459_v58 }
 0x598   : > { %v8220_v9 = vpop.eup %6758 }
 0x599   : > { %v2465_v38 = vsel %vm1444_vm0, %v8220_v9, 0.0 }
 0x59b   : > { %2466 = vadd.xlane.f32.xlu1 %v2465_v38  ;;  %v6984_v38 = vld [vmem:[#allocation2 + $0x38] ss:$12 sps:$4 sm:$0xff]  }
 0x5f3   : > { %v1822_v2 = vpop.xlane.xlu0 %1821 }
 0x5f4   : > { %6760 = vrcp.f32 %v1822_v2 }
 0x5f7   : > { %v1828_v36 = vpop.xlane.xlu0 %1827 }
 0x5f8   : > { %v1825_v37 = vpop.xlane.xlu1 %1824 }
 0x5f9   : > { %6762 = vrcp.f32 %v1825_v37 }
 0x5fa   : > { %6764 = vrcp.f32 %v1828_v36 }
 0x5fc   : > { %v1834_v61 = vpop.xlane.xlu0 %1833  ;;  %v1831_v27 = vpop.xlane.xlu1 %1830 }
 0x5fd   : > { %6766 = vrcp.f32 %v1831_v27 }
 0x5fe   : > { %6768 = vrcp.f32 %v1834_v61 }
 0x600   : > { %v1840_v41 = vpop.xlane.xlu0 %1839  ;;  %v1837_v62 = vpop.xlane.xlu1 %1836 }
 0x601   : > { %6770 = vrcp.f32 %v1837_v62  ;;  %v6761_v6 = vpop.eup %6760 }
 0x602   : > { %6772 = vrcp.f32 %v1840_v41  ;;  %v1852_v30 = vmul.f32 %v6761_v6, %v8113_v25 }
 0x604   : > { %v2134_v49 = vpop.xlane.xlu0 %2133  ;;  %v1843_v51 = vpop.xlane.xlu1 %1842 }
 0x605   : > { %6774 = vrcp.f32 %v1843_v51 }
 0x606   : > { %v6763_v55 = vpop.eup %6762  ;;  %6776 = vrcp.f32 %v2134_v49 }
 0x607   : > { %v1853_v4 = vmul.f32 %v6763_v55, %v8121_v57  ;;  %v6765_v53 = vpop.eup %6764 }
 0x608   : > { %v2140_v60 = vpop.xlane.xlu0 %2139  ;;  %v2137_v13 = vpop.xlane.xlu1 %2136  ;;  %v1854_v5 = vmul.f32 %v6765_v53, %v8119_v40 }
 0x609   : > { %v1860_v3 = vpack.c.bf16 %v1853_v4, %v1852_v30  ;;  %6778 = vrcp.f32 %v2137_v13 }
 0x60a   : > { %v6767_v39 = vpop.eup %6766  ;;  %6780 = vrcp.f32 %v2140_v60 }
 0x60b   : > { %6174 = vmatprep.mubr.msk.bf16.mxu0 %vm1444_vm0, %v1860_v3  ;;  %v1855_v10 = vmul.f32 %v6767_v39, %v8129_v42  ;;  %v6769_v32 = vpop.eup %6768  ;;  %v6579_v39 = vld [vmem:[#allocation15 + $0x74] ss:$8 sps:$4 sm:$0xff]  }
 0x60c   : > { %v2146_v15 = vpop.xlane.xlu0 %2145  ;;  %v2143_v35 = vpop.xlane.xlu1 %2142  ;;  %v1856_v17 = vmul.f32 %v6769_v32, %v8131_v44 }
 0x60d   : > { %6782 = vrcp.f32 %v2143_v35  ;;  %v1861_v25 = vpack.c.bf16 %v1855_v10, %v1854_v5 }
 0x60e   : > { %v6771_v57 = vpop.eup %6770  ;;  %6784 = vrcp.f32 %v2146_v15 }
 0x60f   : > { %6175 = vmatmul.mubr.msk.bf16.vlgmr.msra.gmra.mxu0 %vm1444_vm0, %v1861_v25  ;;  %v1857_v58 = vmul.f32 %v6771_v57, %v8141_v50  ;;  %v6773_v40 = vpop.eup %6772 }
 0x610   : > { %v2152_v19 = vpop.xlane.xlu0 %2151  ;;  %v2149_v63 = vpop.xlane.xlu1 %2148  ;;  %6193 = vmatpush3.bf16.msra.mxu0 %v6984_v38  ;;  %v1858_v61 = vmul.f32 %v6773_v40, %v8139_v48 }
 0x611   : > { %6212 = vmatprep.subr.bf16.mxu0 %v6576_v54  ;;  %6786 = vrcp.f32 %v2149_v63  ;;  %v1862_v42 = vpack.c.bf16 %v1857_v58, %v1856_v17 }
 0x612   : > { %v6775_v2 = vpop.eup %6774  ;;  %6788 = vrcp.f32 %v2152_v19 }
 0x613   : > { %6178 = vmatprep.mubr.msk.bf16.mxu0 %vm1444_vm0, %v1862_v42  ;;  %v1859_v27 = vmul.f32 %v6775_v2, %v8151_v16  ;;  %v6777_v41 = vpop.eup %6776 }
 0x614   : > { %v2446_v36 = vpop.xlane.xlu0 %2445  ;;  %v2155_v37 = vpop.xlane.xlu1 %2154  ;;  %v2164_v49 = vmul.f32 %v6777_v41, %v8149_v45 }
 0x615   : > { %6790 = vrcp.f32 %v2155_v37  ;;  %v1863_v44 = vpack.c.bf16 %v1859_v27, %v1858_v61  ;;  %v6580_v27 = vld [vmem:[#allocation15 + $0x60] ss:$8 sps:$4 sm:$0xff]  }
 0x616   : > { %v6779_v50 = vpop.eup %6778  ;;  %6792 = vrcp.f32 %v2446_v36  ;;  %v6582_v36 = vld [vmem:[#allocation15 + $0x64] ss:$8 sps:$4 sm:$0xff]  }
 0x617   : > { %6179 = vmatmul.mubr.msk.bf16.gmra.mxu0 %vm1444_vm0, %v1863_v44  ;;  %v2165_v51 = vmul.f32 %v6779_v50, %v8161_v29  ;;  %v6781_v55 = vpop.eup %6780 }
 0x618   : > { %v2452_v62 = vpop.xlane.xlu0 %2451  ;;  %v2449_v6 = vpop.xlane.xlu1 %2448  ;;  %v2166_v48 = vmul.f32 %v6781_v55, %v8159_v52  ;;  %v6597_v55 = vld [vmem:[#allocation15 + $0x14] ss:$8 sps:$4 sm:$0xff]  }
 0x619   : > { %6794 = vrcp.f32 %v2449_v6  ;;  %v2172_v30 = vpack.c.bf16 %v2165_v51, %v2164_v49  ;;  %v6583_v6 = vld [vmem:[#allocation15 + $0x50] ss:$8 sps:$4 sm:$0xff]   ;;  %v6588_v49 = vld [vmem:[#allocation15 + $0x44] ss:$8 sps:$4 sm:$0xff]   ;;  %v6592_v51 = vld [vmem:[#allocation15 + $0x20] ss:$8 sps:$4 sm:$0xff]  }
 0x61a   : > { %v6783_v4 = vpop.eup %6782  ;;  %6796 = vrcp.f32 %v2452_v62 }
 0x61b   : > { %v2167_v16 = vmul.f32 %v6783_v4, %v8171_v12  ;;  %6194 = vmatprep.mubr.msk.bf16.mxu0 %vm1444_vm0, %v2172_v30  ;;  %v6785_v53 = vpop.eup %6784  ;;  %v6595_v30 = vld [vmem:[#allocation15 + $0x10] ss:$8 sps:$4 sm:$0xff]   ;;  %v6600_v4 = vld [vmem:[#allocation15 + $0x4] ss:$8 sps:$4 sm:$0xff]  }
 0x61c   : > { %v2458_v60 = vpop.xlane.xlu0 %2457  ;;  %v2455_v13 = vpop.xlane.xlu1 %2454  ;;  %v2168_v10 = vmul.f32 %v6785_v53, %v8169_v8  ;;  %v6601_v53 = vld [vmem:[#allocation12 + $0x38] sm:$0xff]  }
 0x61d   : > { %6798 = vrcp.f32 %v2455_v13  ;;  %v2173_v3 = vpack.c.bf16 %v2167_v16, %v2166_v48  ;;  %v6598_v48 = vld [vmem:[#allocation15] ss:$8 sps:$4 sm:$0xff]   ;;  %6222 = vmatprep.subr.bf16.mxu1 %v6601_v53 }
 0x61e   : > { %v6787_v45 = vpop.eup %6786  ;;  %6800 = vrcp.f32 %v2458_v60  ;;  %v814_v16 = vld [vmem:[%s7800_s25] sm:$0xff]  ;;  %v815_v60 = vld [vmem:[%s7800_s25 + $0x8] sm:$0xff]  ;;  %6223 = vmatpush3.bf16.msra.mxu1 %v6601_v53 }
 0x61f   : > { %6195 = vmatmul.mubr.msk.bf16.vlgmr.msra.gmra.mxu0 %vm1444_vm0, %v2173_v3  ;;  %v2169_v52 = vmul.f32 %v6787_v45, %v8181_v59  ;;  %v6789_v12 = vpop.eup %6788  ;;  %v822_v13 = vpack.c.bf16 %v815_v60, %v814_v16  ;;  %v6602_v3 = vld [vmem:[#allocation12 + $0x30] sm:$0xff]   ;;  %v6604_v45 = vld [vmem:[#allocation12 + $0x20] sm:$0xff]  }
 0x620   : > { %v2464_v29 = vpop.xlane.xlu0 %2463  ;;  %v2461_v5 = vpop.xlane.xlu1 %2460  ;;  %6213 = vmatpush3.bf16.msra.mxu0 %v6576_v54  ;;  %v2170_v25 = vmul.f32 %v6789_v12, %v8179_v56  ;;  %6224 = vmatprep.subr.bf16.mxu1 %v6602_v3  ;;  %v6606_v12 = vld [vmem:[#allocation12 + $0x10] sm:$0xff]  }
 0x621   : > { %6802 = vrcp.f32 %v2461_v5  ;;  %v2174_v15 = vpack.c.bf16 %v2169_v52, %v2168_v10  ;;  %2999 = vmatprep.subr.bf16.mxu0 %v6579_v39  ;;  %v6603_v39 = vld [vmem:[#allocation12 + $0x28] sm:$0xff]   ;;  %v817_v5 = vld [vmem:[%s7800_s25 + $0x18] sm:$0xff] }
 0x622   : > { %v6791_v35 = vpop.eup %6790  ;;  %6804 = vrcp.f32 %v2464_v29  ;;  %6225 = vmatpush3.bf16.msra.mxu1 %v6602_v3  ;;  %v816_v29 = vld [vmem:[%s7800_s25 + $0x10] sm:$0xff]  ;;  %v6605_v52 = vld [vmem:[#allocation12 + $0x18] sm:$0xff]  }
 0x623   : > { %6198 = vmatprep.mubr.msk.bf16.mxu0 %vm1444_vm0, %v2174_v15  ;;  %v2171_v57 = vmul.f32 %v6791_v35, %v8190_v7  ;;  %v6793_v19 = vpop.eup %6792  ;;  %v6577_v7 = vld [vmem:[#allocation15 + $0x70] ss:$8 sps:$4 sm:$0xff]   ;;  %6226 = vmatprep.subr.bf16.mxu1 %v6603_v39  ;;  %v823_v10 = vpack.c.bf16 %v817_v5, %v816_v29  ;;  %v6607_v15 = vld [vmem:[#allocation12 + $0x8] sm:$0xff]   ;;  %v6608_v35 = vld [vmem:[#allocation12] sm:$0xff]  }
 0x624   : > { %v2467_v32 = vpop.xlane.xlu1 %2466  ;;  %v2476_v59 = vmul.f32 %v6793_v19, %v8188_v33  ;;  %v820_v19 = vld [vmem:[%s7800_s25 + $0x30] sm:$0xff] }
 0x625   : > { %6806 = vrcp.f32 %v2467_v32  ;;  %v2175_v63 = vpack.c.bf16 %v2171_v57, %v2170_v25  ;;  %v818_v32 = vld [vmem:[%s7800_s25 + $0x20] sm:$0xff]  ;;  %v819_v25 = vld [vmem:[%s7800_s25 + $0x28] sm:$0xff] }
 0x626   : > { %v6795_v8 = vpop.eup %6794  ;;  %6227 = vmatpush3.bf16.msra.mxu1 %v6603_v39  ;;  %v824_v57 = vpack.c.bf16 %v819_v25, %v818_v32 }
 0x627   : > { %6199 = vmatmul.mubr.msk.bf16.gmra.mxu0 %vm1444_vm0, %v2175_v63  ;;  %v2477_v54 = vmul.f32 %v6795_v8, %v8198_v18  ;;  %v6797_v17 = vpop.eup %6796  ;;  %6228 = vmatprep.subr.bf16.mxu1 %v6604_v45  ;;  %v821_v63 = vld [vmem:[%s7800_s25 + $0x38] sm:$0xff] }
 0x628   : > { %v2478_v38 = vmul.f32 %v6797_v17, %v8196_v11  ;;  %v825_v8 = vpack.c.bf16 %v821_v63, %v820_v19 }
 0x629   : > { %v2484_v58 = vpack.c.bf16 %v2477_v54, %v2476_v59 }
 0x62a   : > { %v6799_v40 = vpop.eup %6798  ;;  %6229 = vmatpush3.bf16.msra.mxu1 %v6604_v45 }
 0x62b   : > { %v2479_v42 = vmul.f32 %v6799_v40, %v8206_v43  ;;  %6214 = vmatprep.mubr.msk.bf16.mxu0 %vm1444_vm0, %v2484_v58  ;;  %v6801_v56 = vpop.eup %6800  ;;  %v6585_v43 = vld [vmem:[#allocation15 + $0x54] ss:$8 sps:$4 sm:$0xff]   ;;  %6230 = vmatprep.subr.bf16.mxu1 %v6605_v52 }
 0x62c   : > { %v2480_v33 = vmul.f32 %v6801_v56, %v8204_v20  ;;  %v6586_v20 = vld [vmem:[#allocation15 + $0x40] ss:$8 sps:$4 sm:$0xff]  }
 0x62d   : > { %v2485_v2 = vpack.c.bf16 %v2479_v42, %v2478_v38 }
 0x62e   : > { %v6803_v37 = vpop.eup %6802  ;;  %6231 = vmatpush3.bf16.msra.mxu1 %v6605_v52 }
 0x62f   : > { %v6805_v61 = vpop.eup %6804  ;;  %6215 = vmatmul.mubr.msk.bf16.vlgmr.msra.gmra.mxu0 %vm1444_vm0, %v2485_v2  ;;  %v2481_v18 = vmul.f32 %v6803_v37, %v8214_v24  ;;  %v6591_v24 = vld [vmem:[#allocation15 + $0x34] ss:$8 sps:$4 sm:$0xff]   ;;  %6232 = vmatprep.subr.bf16.mxu1 %v6606_v12 }
 0x630   : > { %3000 = vmatpush1.bf16.msra.mxu0 %v6577_v7  ;;  %v2482_v44 = vmul.f32 %v6805_v61, %v8212_v28  ;;  %v6589_v28 = vld [vmem:[#allocation15 + $0x30] ss:$8 sps:$4 sm:$0xff]  }
 0x631   : > { %v2486_v11 = vpack.c.bf16 %v2481_v18, %v2480_v33  ;;  %3001 = vmatprep.subr.bf16.mxu0 %v6582_v36 }
 0x632   : > { %v6807_v41 = vpop.eup %6806  ;;  %6233 = vmatpush3.bf16.msra.mxu1 %v6606_v12 }
 0x633   : > { %v2483_v50 = vmul.f32 %v6807_v41, %v8220_v9  ;;  %6218 = vmatprep.mubr.msk.bf16.mxu0 %vm1444_vm0, %v2486_v11  ;;  %v6594_v9 = vld [vmem:[#allocation15 + $0x24] ss:$8 sps:$4 sm:$0xff]   ;;  %6234 = vmatprep.subr.bf16.mxu1 %v6607_v15 }
 0x634   : > { %3002 = vmatpush1.bf16.msra.mxu0 %v6580_v27 }
 0x635   : > { %v2487_v62 = vpack.c.bf16 %v2483_v50, %v2482_v44  ;;  %3003 = vmatprep.subr.bf16.mxu0 %v6585_v43 }
 0x636   : > { %6235 = vmatpush3.bf16.msra.mxu1 %v6607_v15 }
 0x637   : > { %6219 = vmatmul.mubr.msk.bf16.gmra.mxu0 %vm1444_vm0, %v2487_v62  ;;  %6236 = vmatprep.subr.bf16.mxu1 %v6608_v35 }
 0x638   : > { %3004 = vmatpush1.bf16.msra.mxu0 %v6583_v6  ;;  %3031 = vmatprep.mubr.bf16.mxu0 %v9071_v0 }
 0x639   : > { %3005 = vmatprep.subr.bf16.mxu0 %v6588_v49 }
 0x63a   : > { %6237 = vmatpush3.bf16.msra.mxu1 %v6608_v35 }
 0x63c   : > { %3006 = vmatpush1.bf16.msra.mxu0 %v6586_v20 }
 0x63d   : > { %3007 = vmatprep.subr.bf16.mxu0 %v6591_v24 }
 0x640   : > { %3008 = vmatpush1.bf16.msra.mxu0 %v6589_v28 }
 0x641   : > { %3009 = vmatprep.subr.bf16.mxu0 %v6594_v9 }
 0x644   : > { %3010 = vmatpush1.bf16.msra.mxu0 %v6592_v51 }
 0x645   : > { %3011 = vmatprep.subr.bf16.mxu0 %v6597_v55 }
 0x648   : > { %3012 = vmatpush1.bf16.msra.mxu0 %v6595_v30 }
 0x649   : > { %3013 = vmatprep.subr.bf16.mxu0 %v6600_v4 }
 0x64c   : > { %3014 = vmatpush1.bf16.msra.mxu0 %v6598_v48 }
 0x64f   : > { %3032 = vmatmul.mubr.bf16.vlgmr.msra.gmra.mxu0 %v822_v13 }
 0x650   : > { %3041 = vmatprep.mubr.bf16.mxu0 %v9071_v0 }
 0x657   : > { %3042 = vmatmul.mubr.bf16.gmra.mxu0 %v823_v10 }
 0x658   : > { %3051 = vmatprep.mubr.bf16.mxu0 %v9071_v0 }
 0x65f   : > { %3052 = vmatmul.mubr.bf16.gmra.mxu0 %v824_v57 }
 0x660   : > { %3061 = vmatprep.mubr.bf16.mxu0 %v9071_v0 }
 0x667   : > { %3062 = vmatmul.mubr.bf16.gmra.mxu0 %v825_v8 }
 0x6cf   : > { %v6176_v59 = vpop.f32.mrf.mxu0 }
 0x6d0   : > { %v1949_v56 = vmul.f32 %v6176_v59, %v7989_v1 }
 0x6d1   : > { %v1916_v54 = vpop.f32.mrf.mxu0 }
 0x6d2   : > { %v1947_v38 = vmul.f32 %v1916_v54, %v7985_v21 }
 0x6d3   : > { %v6177_v17 = vpop.f32.mrf.mxu0 }
 0x6d4   : > { %v1951_v37 = vadd.f32 %v1949_v56, %v1947_v38  ;;  %v1950_v61 = vmul.f32 %v6177_v17, %v7989_v1 }
 0x6d5   : > { %v1919_v58 = vpop.f32.mrf.mxu0 }
 0x6d6   : > { %v1948_v7 = vmul.f32 %v1919_v58, %v7985_v21 }
 0x6d7   : > { %v6180_v40 = vpop.f32.mrf.mxu0 }
 0x6d8   : > { %v1952_v18 = vadd.f32 %v1950_v61, %v1948_v7  ;;  %v1957_v43 = vmul.f32 %v6180_v40, %v8003_v31 }
 0x6d9   : > { %v1932_v42 = vpop.f32.mrf.mxu0 }
 0x6da   : > { %v1953_v2 = vmul.f32 %v1932_v42, %v7994_v22 }
 0x6db   : > { %v6181_v36 = vpop.f32.mrf.mxu0 }
 0x6dc   : > { %v1955_v27 = vadd.f32 %v1953_v2, %v1951_v37  ;;  %v1958_v44 = vmul.f32 %v6181_v36, %v8003_v31 }
 0x6dd   : > { %v1935_v33 = vpop.f32.mrf.mxu0 }
 0x6de   : > { %v1954_v41 = vmul.f32 %v1935_v33, %v7994_v22  ;;  %v1959_v6 = vadd.f32 %v1957_v43, %v1955_v27  ;;  %v2907_v43 = vld [vmem:[#allocation16] sm:$0x3] }
 0x6df   : > { %v6196_v11 = vpop.f32.mrf.mxu0 }
 0x6e0   : > { %v1956_v50 = vadd.f32 %v1954_v41, %v1952_v18  ;;  %v2261_v30 = vmul.f32 %v6196_v11, %v7989_v1 }
 0x6e1   : > { %v2228_v62 = vpop.f32.mrf.mxu0 }
 0x6e2   : > { %v1960_v49 = vadd.f32 %v1958_v44, %v1956_v50  ;;  %v2259_v51 = vmul.f32 %v2228_v62, %v7985_v21  ;;  %v8297_v44 = vrot.slane %v2907_v43, %v7853_v46  ;;  %v8300_v62 = vrot.slane %v2907_v43, %v7856_v47 }
 0x6e3   : > { %v6197_v20 = vpop.f32.mrf.mxu0 }
 0x6e4   : > { %v5918_v24 = vpack.c.bf16 %v1960_v49, %v1959_v6  ;;  %v2263_v60 = vadd.f32 %v2261_v30, %v2259_v51  ;;  %v2262_v13 = vmul.f32 %v6197_v20, %v7989_v1 }
 0x6e5   : > { %v2231_v28 = vpop.f32.mrf.mxu0 }
 0x6e6   : > { %5919 = vst [vmem:[#allocation3 + $0x8] sm:$0xff] %v5918_v24   ;;  %v2260_v4 = vmul.f32 %v2231_v28, %v7985_v21 }
 0x6e7   : > { %v6200_v9 = vpop.f32.mrf.mxu0 }
 0x6e8   : > { %v2264_v39 = vadd.f32 %v2262_v13, %v2260_v4  ;;  %v2269_v10 = vmul.f32 %v6200_v9, %v8003_v31 }
 0x6e9   : > { %v2244_v55 = vpop.f32.mrf.mxu0 }
 0x6ea   : > { %v2265_v48 = vmul.f32 %v2244_v55, %v7994_v22 }
 0x6eb   : > { %v6201_v16 = vpop.f32.mrf.mxu0 }
 0x6ec   : > { %v2267_v45 = vadd.f32 %v2265_v48, %v2263_v60  ;;  %v2270_v52 = vmul.f32 %v6201_v16, %v8003_v31 }
 0x6ed   : > { %v2247_v53 = vpop.f32.mrf.mxu0  ;;  %v6609_v3 = vld [vmem:[#allocation3 + $0x8] sm:$0xff]  }
 0x6ee   : > { %v2266_v29 = vmul.f32 %v2247_v53, %v7994_v22  ;;  %6239 = vmatmul.mubr.bf16.vlgmr.msra.gmra.mxu1 %v6609_v3  ;;  %v2271_v35 = vadd.f32 %v2269_v10, %v2267_v45 }
 0x6ef   : > { %v6216_v5 = vpop.f32.mrf.mxu0 }
 0x6f0   : > { %v2268_v12 = vadd.f32 %v2266_v29, %v2264_v39  ;;  %v2573_v54 = vmul.f32 %v6216_v5, %v7989_v1 }
 0x6f1   : > { %v2540_v15 = vpop.f32.mrf.mxu0 }
 0x6f2   : > { %v2272_v32 = vadd.f32 %v2270_v52, %v2268_v12  ;;  %v2571_v8 = vmul.f32 %v2540_v15, %v7985_v21 }
 0x6f3   : > { %v6217_v25 = vpop.f32.mrf.mxu0 }
 0x6f4   : > { %v5923_v57 = vpack.c.bf16 %v2272_v32, %v2271_v35  ;;  %v2575_v38 = vadd.f32 %v2573_v54, %v2571_v8  ;;  %v2574_v42 = vmul.f32 %v6217_v25, %v7989_v1 }
 0x6f5   : > { %v2543_v19 = vpop.f32.mrf.mxu0 }
 0x6f6   : > { %5924 = vst [vmem:[#allocation3 + $0x10] sm:$0xff] %v5923_v57   ;;  %v2572_v17 = vmul.f32 %v2543_v19, %v7985_v21 }
 0x6f7   : > { %v6220_v63 = vpop.f32.mrf.mxu0 }
 0x6f8   : > { %v2576_v2 = vadd.f32 %v2574_v42, %v2572_v17  ;;  %v2581_v61 = vmul.f32 %v6220_v63, %v8003_v31 }
 0x6f9   : > { %v2556_v59 = vpop.f32.mrf.mxu0 }
 0x6fa   : > { %v2577_v58 = vmul.f32 %v2556_v59, %v7994_v22 }
 0x6fb   : > { %v6221_v40 = vpop.f32.mrf.mxu0 }
 0x6fc   : > { %v2579_v36 = vadd.f32 %v2577_v58, %v2575_v38  ;;  %v2582_v33 = vmul.f32 %v6221_v40, %v8003_v31 }
 0x6fd   : > { %v2559_v56 = vpop.f32.mrf.mxu0  ;;  %v6610_v7 = vld [vmem:[#allocation3 + $0x10] sm:$0xff]  }
 0x6fe   : > { %v2578_v37 = vmul.f32 %v2559_v56, %v7994_v22  ;;  %6242 = vmatprep.mubr.bf16.mxu1 %v6610_v7  ;;  %v2583_v27 = vadd.f32 %v2581_v61, %v2579_v36 }
 0x700   : > { %v2580_v18 = vadd.f32 %v2578_v37, %v2576_v2 }
 0x702   : > { %v2584_v41 = vadd.f32 %v2582_v33, %v2580_v18 }
 0x704   : > { %v5928_v11 = vpack.c.bf16 %v2584_v41, %v2583_v27 }
 0x706   : > { %5929 = vst [vmem:[#allocation3 + $0x18] sm:$0xff] %v5928_v11  }
 0x70d   : > { %v6611_v50 = vld [vmem:[#allocation3 + $0x18] sm:$0xff]  }
 0x70e   : > { %6243 = vmatmul.mubr.bf16.gmra.mxu1 %v6611_v50 }
 0x70f   : > { %v3033_v6 = vpop.f32.mrf.mxu0 }
 0x710   : > { %v3034_v49 = vadd.f32 %v3033_v6, %v8297_v44 }
 0x711   : > { %v3035_v20 = vpop.f32.mrf.mxu0 }
 0x712   : > { %v3036_v24 = vadd.f32 %v3035_v20, %v8300_v62 }
 0x713   : > { %v3037_v28 = vpop.f32.mrf.mxu0 }
 0x714   : > { %v5885_v9 = vpack.c.bf16 %v3036_v24, %v3034_v49  ;;  %v3038_v51 = vadd.f32 %v3037_v28, %v8297_v44 }
 0x715   : > { %v3039_v55 = vpop.f32.mrf.mxu0 }
 0x716   : > { %3256 = vst [vmem:[#allocation2] sm:$0xff] %v5885_v9  ;;  %v3040_v30 = vadd.f32 %v3039_v55, %v8300_v62 }
 0x717   : > { %v3043_v16 = vpop.f32.mrf.mxu0 }
 0x718   : > { %v5886_v4 = vpack.c.bf16 %v3040_v30, %v3038_v51  ;;  %v3044_v60 = vadd.f32 %v3043_v16, %v8297_v44 }
 0x719   : > { %v3045_v3 = vpop.f32.mrf.mxu0 }
 0x71a   : > { %3257 = vst [vmem:[#allocation2 + $0xc] sm:$0xff] %v5886_v4  ;;  %v3046_v45 = vadd.f32 %v3045_v3, %v8300_v62 }
 0x71b   : > { %v3047_v52 = vpop.f32.mrf.mxu0 }
 0x71c   : > { %v5887_v15 = vpack.c.bf16 %v3046_v45, %v3044_v60  ;;  %v3048_v32 = vadd.f32 %v3047_v52, %v8297_v44 }
 0x71d   : > { %v3304_v48 = vld [vmem:[#allocation2] sm:$0xf]  ;;  %v3049_v57 = vpop.f32.mrf.mxu0 }
 0x71e   : > { %v3310_v13 = vmul.bf16 %v7872_v14, %v3304_v48  ;;  %v3312_v5 = vmul.bf16 %v7879_v23, %v3304_v48  ;;  %v3314_v12 = vmul.bf16 %v7881_v26, %v3304_v48  ;;  %3258 = vst [vmem:[#allocation2 + $0x18] sm:$0xff] %v5887_v15  ;;  %v3050_v19 = vadd.f32 %v3049_v57, %v8300_v62 }
 0x71f   : > { %v3316_v54 = vmul.bf16 %v7888_v34, %v3304_v48  ;;  %v3053_v40 = vpop.f32.mrf.mxu0 }
 0x720   : > { %v5888_v8 = vpack.c.bf16 %v3050_v19, %v3048_v32  ;;  %v3054_v38 = vadd.f32 %v3053_v40, %v8297_v44 }
 0x721   : > { %v6612_v53 = vld [vmem:[#allocation2 + $0x4] ss:$12 sps:$4 sm:$0xff]   ;;  %v3305_v39 = vld [vmem:[#allocation2 + $0xc] sm:$0xf]  ;;  %v3055_v42 = vpop.f32.mrf.mxu0 }
 0x722   : > { %v3311_v29 = vmul.bf16 %v7872_v14, %v3305_v39  ;;  %6270 = vmatprep.subr.bf16.mxu0 %v6612_v53  ;;  %v3313_v10 = vmul.bf16 %v7879_v23, %v3305_v39  ;;  %v3315_v25 = vmul.bf16 %v7881_v26, %v3305_v39  ;;  %3259 = vst [vmem:[#allocation2 + $0x24] sm:$0xff] %v5888_v8 }
 0x723   : > { %6271 = vmatpush3.bf16.xpose.msra.mxu0 %v6612_v53  ;;  %v3317_v17 = vmul.bf16 %v7888_v34, %v3305_v39  ;;  %v3056_v7 = vadd.f32 %v3055_v42, %v8300_v62  ;;  %v3057_v2 = vpop.f32.mrf.mxu0 }
 0x724   : > { %v5756_v35 = vcombine.low %v3310_v13, %v3311_v29  ;;  %v5757_v63 = vcombine.low %v3312_v5, %v3313_v10  ;;  %v5758_v59 = vcombine.low %v3314_v12, %v3315_v25  ;;  %v3058_v37 = vadd.f32 %v3057_v2, %v8297_v44 }
 0x725   : > { %v5759_v58 = vcombine.low %v3316_v54, %v3317_v17  ;;  %v5889_v36 = vpack.c.bf16 %v3056_v7, %v3054_v38  ;;  %v3059_v61 = vpop.f32.mrf.mxu0  ;;  %v3612_v33 = vld [vmem:[#allocation2 + $0x18] sm:$0xf] }
 0x726   : > { %6272 = vmatprep.mubr.bf16.mxu0 %v5756_v35  ;;  %v3060_v27 = vadd.f32 %v3059_v61, %v8300_v62  ;;  %v3618_v41 = vmul.bf16 %v7872_v14, %v3612_v33  ;;  %v3620_v43 = vmul.bf16 %v7879_v23, %v3612_v33  ;;  %v3622_v24 = vmul.bf16 %v7881_v26, %v3612_v33 }
 0x727   : > { %3260 = vst [vmem:[#allocation2 + $0x30] sm:$0xff] %v5889_v36  ;;  %v3624_v9 = vmul.bf16 %v7888_v34, %v3612_v33  ;;  %v3063_v30 = vpop.f32.mrf.mxu0 }
 0x728   : > { %v5890_v6 = vpack.c.bf16 %v3060_v27, %v3058_v37  ;;  %v3064_v4 = vadd.f32 %v3063_v30, %v8297_v44  ;;  %v5700_v27 = vld [vmem:[#allocation13] ss:$0 sm:$0xff] }
 0x729   : > { %v6613_v56 = vld [vmem:[#allocation2 + $0x1c] ss:$12 sps:$4 sm:$0xff]   ;;  %v3613_v18 = vld [vmem:[#allocation2 + $0x24] sm:$0xf]  ;;  %v3065_v13 = vpop.f32.mrf.mxu0 }
 0x72a   : > { %6273 = vmatmul.mubr.bf16.vlgmr.msra.gmra.mxu0 %v5757_v63  ;;  %6290 = vmatprep.subr.bf16.mxu0 %v6613_v56  ;;  %v3619_v11 = vmul.bf16 %v7872_v14, %v3613_v18  ;;  %v3621_v50 = vmul.bf16 %v7879_v23, %v3613_v18  ;;  %3261 = vst [vmem:[#allocation2 + $0x3c] sm:$0xff] %v5890_v6  ;;  %v6985_v6 = vld [vmem:[%s7792_s4] sm:$0xff] }
 0x72b   : > { %6276 = vmatprep.mubr.bf16.mxu0 %v5758_v59  ;;  %6291 = vmatpush3.bf16.xpose.msra.mxu0 %v6613_v56  ;;  %v3623_v28 = vmul.bf16 %v7881_v26, %v3613_v18  ;;  %v3625_v51 = vmul.bf16 %v7888_v34, %v3613_v18  ;;  %v3066_v39 = vadd.f32 %v3065_v13, %v8300_v62  ;;  %v3067_v29 = vpop.f32.mrf.mxu0 }
 0x72c   : > { %v5768_v49 = vcombine.low %v3618_v41, %v3619_v11  ;;  %v5769_v20 = vcombine.low %v3620_v43, %v3621_v50  ;;  %v3068_v12 = vadd.f32 %v3067_v29, %v8297_v44 }
 0x72d   : > { %v5770_v48 = vcombine.low %v3622_v24, %v3623_v28  ;;  %v5771_v16 = vcombine.low %v3624_v9, %v3625_v51  ;;  %v5891_v52 = vpack.c.bf16 %v3066_v39, %v3064_v4  ;;  %v3069_v35 = vpop.f32.mrf.mxu0  ;;  %v6986_v24 = vld [vmem:[%s7792_s4 + $0x8] sm:$0xff]  ;;  %v6987_v9 = vld [vmem:[%s7792_s4 + $0x10] sm:$0xff] }
 0x72e   : > { %v3920_v55 = vld [vmem:[#allocation2 + $0x30] sm:$0xf]  ;;  %v3070_v32 = vadd.f32 %v3069_v35, %v8300_v62 }
 0x72f   : > { %v3926_v60 = vmul.bf16 %v7872_v14, %v3920_v55  ;;  %v3928_v5 = vmul.bf16 %v7879_v23, %v3920_v55  ;;  %3262 = vst [vmem:[#allocation2 + $0x48] sm:$0xff] %v5891_v52  ;;  %v3930_v19 = vmul.bf16 %v7881_v26, %v3920_v55  ;;  %v3932_v8 = vmul.bf16 %v7888_v34, %v3920_v55  ;;  %v6988_v55 = vld [vmem:[%s7792_s4 + $0x18] sm:$0xff]  ;;  %v6991_v52 = vld [vmem:[%s7792_s4 + $0x30] sm:$0xff] }
 0x730   : > { %v5892_v57 = vpack.c.bf16 %v3070_v32, %v3068_v12 }
 0x731   : > { %v6614_v53 = vld [vmem:[#allocation2 + $0x34] ss:$12 sps:$4 sm:$0xff]   ;;  %v3921_v3 = vld [vmem:[#allocation2 + $0x3c] sm:$0xf] }
 0x732   : > { %6277 = vmatmul.mubr.bf16.gmra.mxu0 %v5759_v58  ;;  %v3927_v45 = vmul.bf16 %v7872_v14, %v3921_v3  ;;  %6310 = vmatprep.subr.bf16.mxu0 %v6614_v53  ;;  %v3929_v10 = vmul.bf16 %v7879_v23, %v3921_v3  ;;  %3263 = vst [vmem:[#allocation2 + $0x54] sm:$0xff] %v5892_v57 }
 0x733   : > { %6292 = vmatprep.mubr.bf16.mxu0 %v5768_v49  ;;  %v3931_v63 = vmul.bf16 %v7881_v26, %v3921_v3  ;;  %v3933_v59 = vmul.bf16 %v7888_v34, %v3921_v3 }
 0x734   : > { %v5780_v15 = vcombine.low %v3926_v60, %v3927_v45  ;;  %v5781_v25 = vcombine.low %v3928_v5, %v3929_v10  ;;  %v6990_v5 = vld [vmem:[%s7792_s4 + $0x28] sm:$0xff] }
 0x735   : > { %v5782_v44 = vcombine.low %v3930_v19, %v3931_v63  ;;  %v5783_v54 = vcombine.low %v3932_v8, %v3933_v59 }
 0x736   : > { %v4228_v62 = vld [vmem:[#allocation2 + $0x48] sm:$0xf] }
 0x737   : > { %v4234_v40 = vmul.bf16 %v7872_v14, %v4228_v62  ;;  %v4236_v42 = vmul.bf16 %v7879_v23, %v4228_v62  ;;  %v4238_v36 = vmul.bf16 %v7881_v26, %v4228_v62  ;;  %v4240_v61 = vmul.bf16 %v7888_v34, %v4228_v62 }
 0x739   : > { %v6615_v17 = vld [vmem:[#allocation2 + $0x4c] ss:$12 sps:$4 sm:$0xff]   ;;  %v4229_v58 = vld [vmem:[#allocation2 + $0x54] sm:$0xf] }
 0x73a   : > { %6293 = vmatmul.mubr.bf16.vlgmr.msra.gmra.mxu0 %v5769_v20  ;;  %v4235_v38 = vmul.bf16 %v7872_v14, %v4229_v58  ;;  %v4237_v56 = vmul.bf16 %v7879_v23, %v4229_v58  ;;  %v4239_v37 = vmul.bf16 %v7881_v26, %v4229_v58  ;;  %v4241_v33 = vmul.bf16 %v7888_v34, %v4229_v58 }
 0x73b   : > { %6296 = vmatprep.mubr.bf16.mxu0 %v5770_v48  ;;  %6311 = vmatpush3.bf16.xpose.msra.mxu0 %v6614_v53  ;;  %v6989_v53 = vld [vmem:[%s7792_s4 + $0x20] sm:$0xff] }
 0x73c   : > { %6330 = vmatprep.subr.bf16.mxu0 %v6615_v17  ;;  %v5792_v7 = vcombine.low %v4234_v40, %v4235_v38  ;;  %v5793_v2 = vcombine.low %v4236_v42, %v4237_v56  ;;  %v5794_v18 = vcombine.low %v4238_v36, %v4239_v37  ;;  %v5795_v14 = vcombine.low %v4240_v61, %v4241_v33 }
 0x742   : > { %6297 = vmatmul.mubr.bf16.gmra.mxu0 %v5771_v16 }
 0x743   : > { %6312 = vmatprep.mubr.bf16.mxu0 %v5780_v15  ;;  %v6992_v15 = vld [vmem:[%s7792_s4 + $0x38] sm:$0xff]  ;;  %s9137_s4 = sld [smem:[#allocation49_spill]] }
 0x74a   : > { %6313 = vmatmul.mubr.bf16.vlgmr.msra.gmra.mxu0 %v5781_v25 }
 0x74b   : > { %6316 = vmatprep.mubr.bf16.mxu0 %v5782_v44  ;;  %6331 = vmatpush3.bf16.xpose.msra.mxu0 %v6615_v17 }
 0x752   : > { %6317 = vmatmul.mubr.bf16.gmra.mxu0 %v5783_v54 }
 0x753   : > { %6332 = vmatprep.mubr.bf16.mxu0 %v5792_v7 }
 0x75a   : > { %6333 = vmatmul.mubr.bf16.vlgmr.msra.gmra.mxu0 %v5793_v2 }
 0x75b   : > { %6336 = vmatprep.mubr.bf16.mxu0 %v5794_v18 }
 0x762   : > { %6337 = vmatmul.mubr.bf16.gmra.mxu0 %v5795_v14 }
 0x7ae   : > { %v6240_v23 = vpop.f32.mrf.mxu1 }
 0x7af   : > { %v2742_v50 = vadd.f32 %v6240_v23, %v5700_v27 }
 0x7b0   : > { %v2733_v41 = vpop.f32.mrf.mxu1 }
 0x7b1   : > { %v2734_v11 = vadd.f32 %v5700_v27, %v2733_v41  ;;  %v2766_v51 = vadd.f32 %v6987_v9, %v2742_v50  ;;  %v6617_v50 = vld [vmem:[#allocation18 + $0x30] sm:$0xff]   ;;  %v6620_v9 = vld [vmem:[#allocation18 + $0x18] sm:$0xff]  }
 0x7b2   : > { %v6241_v43 = vpop.f32.mrf.mxu1 }
 0x7b3   : > { %v2764_v49 = vadd.f32 %v6985_v6, %v2734_v11  ;;  %v2745_v34 = vadd.f32 %v6241_v43, %v5700_v27  ;;  %v6616_v11 = vld [vmem:[#allocation18 + $0x38] sm:$0xff]  }
 0x7b4   : > { %v2736_v26 = vpop.f32.mrf.mxu1  ;;  %6246 = vmatprep.subr.bf16.mxu1 %v6616_v11 }
 0x7b5   : > { %v2737_v20 = vadd.f32 %v5700_v27, %v2736_v26  ;;  %2774 = vadd.xlane.f32.xlu0 %v2764_v49  ;;  %v2767_v30 = vadd.f32 %v6988_v55, %v2745_v34  ;;  %6247 = vmatpush3.bf16.msra.mxu1 %v6616_v11 }
 0x7b6   : > { %6248 = vmatprep.subr.bf16.mxu1 %v6617_v50 }
 0x7b7   : > { %v2765_v28 = vadd.f32 %v6986_v24, %v2737_v20  ;;  %v6619_v20 = vld [vmem:[#allocation18 + $0x20] sm:$0xff]  }
 0x7b9   : > { %2776 = vadd.xlane.f32.xlu1 %v2765_v28  ;;  %2778 = vadd.xlane.f32.xlu0 %v2766_v51 }
 0x7ba   : > { %6249 = vmatpush3.bf16.msra.mxu1 %v6617_v50 }
 0x7bd   : > { %2780 = vadd.xlane.f32.xlu1 %v2767_v30 }
 0x7ce   : > { %v6244_v4 = vpop.f32.mrf.mxu1 }
 0x7cf   : > { %v2758_v13 = vadd.f32 %v6244_v4, %v5700_v27 }
 0x7d0   : > { %v2749_v48 = vpop.f32.mrf.mxu1 }
 0x7d1   : > { %v2750_v16 = vadd.f32 %v5700_v27, %v2749_v48  ;;  %v8362_v12 = vadd.f32 %v6991_v52, %v2758_v13  ;;  %v6621_v13 = vld [vmem:[#allocation18 + $0x10] sm:$0xff]  }
 0x7d2   : > { %v6245_v60 = vpop.f32.mrf.mxu1 }
 0x7d3   : > { %v8355_v3 = vadd.f32 %v6989_v53, %v2750_v16  ;;  %v2761_v29 = vadd.f32 %v6245_v60, %v5700_v27 }
 0x7d4   : > { %v2752_v39 = vpop.f32.mrf.mxu1 }
 0x7d5   : > { %v2753_v45 = vadd.f32 %v5700_v27, %v2752_v39  ;;  %2782 = vadd.xlane.f32.xlu0 %v8355_v3  ;;  %v8367_v35 = vadd.f32 %v6992_v15, %v2761_v29  ;;  %v6622_v15 = vld [vmem:[#allocation18 + $0x8] sm:$0xff]  }
 0x7d7   : > { %v8359_v10 = vadd.f32 %v6990_v5, %v2753_v45 }
 0x7d9   : > { %2784 = vadd.xlane.f32.xlu1 %v8359_v10  ;;  %2786 = vadd.xlane.f32.xlu0 %v8362_v12 }
 0x7dd   : > { %2788 = vadd.xlane.f32.xlu1 %v8367_v35 }
 0x7ea   : > { %v8370_v32 = vpop.f32.mrf.mxu0 }
 0x7ec   : > { %v8372_v25 = vpop.f32.mrf.mxu0 }
 0x7ee   : > { %v8374_v57 = vpop.f32.mrf.mxu0 }
 0x7f0   : > { %v8376_v19 = vpop.f32.mrf.mxu0 }
 0x7f2   : > { %v8378_v63 = vpop.f32.mrf.mxu0 }
 0x7f4   : > { %v8380_v8 = vpop.f32.mrf.mxu0 }
 0x7f6   : > { %v8382_v54 = vpop.f32.mrf.mxu0 }
 0x7f7   : > { %v3434_v50 = vsel %vm1444_vm0, %v8382_v54, -inf }
 0x7f8   : > { %v8388_v56 = vpop.f32.mrf.mxu0 }
 0x7fa   : > { %v8398_v18 = vpop.f32.mrf.mxu0 }
 0x7fc   : > { %v8404_v27 = vpop.f32.mrf.mxu0 }
 0x7fe   : > { %v8406_v41 = vpop.f32.mrf.mxu0 }
 0x800   : > { %v8408_v43 = vpop.f32.mrf.mxu0 }
 0x802   : > { %v8410_v6 = vpop.f32.mrf.mxu0 }
 0x804   : > { %v8412_v26 = vpop.f32.mrf.mxu0 }
 0x83e   : > { %v2775_v59 = vpop.xlane.xlu0 %2774 }
 0x83f   : > { %v2791_v44 = vmul.f32 0.0078125, %v2775_v59  ;;  %v3413_v59 = vsel %vm1444_vm0, %v8372_v25, -inf }
 0x841   : > { %v8384_v17 = vsub.f32 %v2764_v49, %v2791_v44  ;;  %v6618_v49 = vld [vmem:[#allocation18 + $0x28] sm:$0xff]  }
 0x842   : > { %v2777_v62 = vpop.xlane.xlu1 %2776  ;;  %v2779_v58 = vpop.xlane.xlu0 %2778  ;;  %6250 = vmatprep.subr.bf16.mxu1 %v6618_v49 }
 0x843   : > { %v2792_v40 = vmul.f32 0.0078125, %v2777_v62  ;;  %v2793_v38 = vmul.f32 0.0078125, %v2779_v58  ;;  %v2807_v42 = vmul.f32 %v8384_v17, %v8384_v17  ;;  %6251 = vmatpush3.bf16.msra.mxu1 %v6618_v49  ;;  %v3416_v58 = vsel %vm1444_vm0, %v8376_v19, -inf }
 0x844   : > { %6252 = vmatprep.subr.bf16.mxu1 %v6619_v20  ;;  %v3724_v49 = vsel %vm1444_vm0, %v8408_v43, -inf }
 0x845   : > { %2815 = vadd.xlane.f32.xlu0 %v2807_v42  ;;  %v8390_v7 = vsub.f32 %v2765_v28, %v2792_v40  ;;  %v8392_v2 = vsub.f32 %v2766_v51, %v2793_v38  ;;  %v8414_v28 = vpop.f32.mrf.mxu0  ;;  %v3422_v38 = vsel %vm1444_vm0, %v8374_v57, -inf  ;;  %v3425_v42 = vsel %vm1444_vm0, %v8380_v8, -inf }
 0x846   : > { %v2781_v36 = vpop.xlane.xlu1 %2780 }
 0x847   : > { %v2794_v37 = vmul.f32 0.0078125, %v2781_v36  ;;  %v2808_v61 = vmul.f32 %v8390_v7, %v8390_v7  ;;  %v2809_v33 = vmul.f32 %v8392_v2, %v8392_v2  ;;  %6253 = vmatpush3.bf16.msra.mxu1 %v6619_v20  ;;  %v8421_v60 = vpop.f32.mrf.mxu0  ;;  %v3727_v20 = vsel %vm1444_vm0, %v8398_v18, -inf }
 0x848   : > { %6254 = vmatprep.subr.bf16.mxu1 %v6620_v9 }
 0x849   : > { %2817 = vadd.xlane.f32.xlu1 %v2808_v61  ;;  %2819 = vadd.xlane.f32.xlu0 %v2809_v33  ;;  %v8400_v14 = vsub.f32 %v2767_v30, %v2794_v37  ;;  %v8433_v52 = vpop.f32.mrf.mxu0  ;;  %v3428_v37 = vsel %vm1444_vm0, %v8388_v56, -inf  ;;  %v3431_v61 = vsel %vm1444_vm0, %v8378_v63, -inf }
 0x84b   : > { %v2810_v23 = vmul.f32 %v8400_v14, %v8400_v14  ;;  %6255 = vmatpush3.bf16.msra.mxu1 %v6620_v9  ;;  %v8442_v62 = vpop.f32.mrf.mxu0  ;;  %v3733_v9 = vsel %vm1444_vm0, %v8412_v26, -inf }
 0x84c   : > { %6256 = vmatprep.subr.bf16.mxu1 %v6621_v13 }
 0x84d   : > { %2821 = vadd.xlane.f32.xlu1 %v2810_v23  ;;  %v8448_v40 = vpop.f32.mrf.mxu0  ;;  %v3721_v23 = vsel %vm1444_vm0, %v8404_v27, -inf }
 0x84f   : > { %6257 = vmatpush3.bf16.msra.mxu1 %v6621_v13  ;;  %v8454_v36 = vpop.f32.mrf.mxu0 }
 0x850   : > { %6258 = vmatprep.subr.bf16.mxu1 %v6622_v15 }
 0x851   : > { %v8460_v33 = vpop.f32.mrf.mxu0 }
 0x853   : > { %6259 = vmatpush3.bf16.msra.mxu1 %v6622_v15  ;;  %v8464_v11 = vpop.f32.mrf.mxu0  ;;  %v4038_v15 = vsel %vm1444_vm0, %v8448_v40, -inf }
 0x85e   : > { %v2783_v34 = vpop.xlane.xlu0 %2782 }
 0x85f   : > { %v2795_v24 = vmul.f32 0.0078125, %v2783_v34  ;;  %v8472_v34 = vpop.f32.mrf.mxu0 }
 0x861   : > { %v8417_v51 = vsub.f32 %v8355_v3, %v2795_v24  ;;  %v3730_v24 = vsel %vm1444_vm0, %v8406_v41, -inf }
 0x862   : > { %v2785_v55 = vpop.xlane.xlu1 %2784  ;;  %v2787_v30 = vpop.xlane.xlu0 %2786 }
 0x863   : > { %v2796_v4 = vmul.f32 0.0078125, %v2785_v55  ;;  %v2797_v48 = vmul.f32 0.0078125, %v2787_v30  ;;  %v2811_v16 = vmul.f32 %v8417_v51, %v8417_v51  ;;  %v8478_v55 = vpop.f32.mrf.mxu0  ;;  %v3736_v30 = vsel %vm1444_vm0, %v8421_v60, -inf }
 0x865   : > { %2823 = vadd.xlane.f32.xlu0 %v2811_v16  ;;  %v8424_v53 = vsub.f32 %v8359_v10, %v2796_v4  ;;  %v8427_v39 = vsub.f32 %v8362_v12, %v2797_v48  ;;  %v6623_v12 = vld [vmem:[#allocation18] sm:$0xff]   ;;  %v3739_v4 = vsel %vm1444_vm0, %v8410_v6, -inf  ;;  %v8484_v48 = vpop.f32.mrf.mxu0  ;;  %v4029_v16 = vsel %vm1444_vm0, %v8442_v62, -inf }
 0x866   : > { %v2789_v3 = vpop.xlane.xlu1 %2788  ;;  %6260 = vmatprep.subr.bf16.mxu1 %v6623_v12 }
 0x867   : > { %v2798_v45 = vmul.f32 0.0078125, %v2789_v3  ;;  %v2812_v29 = vmul.f32 %v8424_v53, %v8424_v53  ;;  %v2813_v5 = vmul.f32 %v8427_v39, %v8427_v39  ;;  %6261 = vmatpush3.bf16.msra.mxu1 %v6623_v12  ;;  %v8488_v13 = vpop.f32.mrf.mxu0  ;;  %v3742_v3 = vsel %vm1444_vm0, %v8414_v28, -inf }
 0x868   : > { %v4041_v12 = vsel %vm1444_vm0, %v8464_v11, -inf }
 0x869   : > { %2825 = vadd.xlane.f32.xlu1 %v2812_v29  ;;  %2827 = vadd.xlane.f32.xlu0 %v2813_v5  ;;  %v8436_v10 = vsub.f32 %v8367_v35, %v2798_v45  ;;  %v3419_v35 = vsel %vm1444_vm0, %v8370_v32, -inf  ;;  %v4032_v45 = vsel %vm1444_vm0, %v8454_v36, -inf  ;;  %v4035_v29 = vsel %vm1444_vm0, %v8433_v52, -inf  ;;  %v8496_v5 = vpop.f32.mrf.mxu0 }
 0x86b   : > { %v2814_v44 = vmul.f32 %v8436_v10, %v8436_v10 }
 0x86d   : > { %2829 = vadd.xlane.f32.xlu1 %v2814_v44  ;;  %3414 = vmax.xlane.f32.xlu0 %v3413_v59  ;;  %v8502_v59 = vpop.f32.mrf.mxu0  ;;  %v4044_v44 = vsel %vm1444_vm0, %v8478_v55, -inf }
 0x871   : > { %3417 = vmax.xlane.f32.xlu1 %v3416_v58  ;;  %3420 = vmax.xlane.f32.xlu0 %v3419_v35  ;;  %v4047_v58 = vsel %vm1444_vm0, %v8460_v33, -inf  ;;  %v8508_v35 = vpop.f32.mrf.mxu0 }
 0x875   : > { %3423 = vmax.xlane.f32.xlu1 %v3422_v38  ;;  %3426 = vmax.xlane.f32.xlu0 %v3425_v42  ;;  %v4337_v38 = vsel %vm1444_vm0, %v8488_v13, -inf  ;;  %v8512_v42 = vpop.f32.mrf.mxu0 }
 0x879   : > { %3429 = vmax.xlane.f32.xlu1 %v3428_v37  ;;  %3432 = vmax.xlane.f32.xlu0 %v3431_v61  ;;  %v4050_v37 = vsel %vm1444_vm0, %v8472_v34, -inf  ;;  %v4340_v61 = vsel %vm1444_vm0, %v8502_v59, -inf }
 0x87d   : > { %3435 = vmax.xlane.f32.xlu1 %v3434_v50  ;;  %3722 = vmax.xlane.f32.xlu0 %v3721_v23  ;;  %v4343_v23 = vsel %vm1444_vm0, %v8484_v48, -inf  ;;  %v8520_v50 = vpop.f32.mrf.mxu0 }
 0x881   : > { %3725 = vmax.xlane.f32.xlu1 %v3724_v49  ;;  %3728 = vmax.xlane.f32.xlu0 %v3727_v20  ;;  %v4346_v49 = vsel %vm1444_vm0, %v8496_v5, -inf  ;;  %v4349_v20 = vsel %vm1444_vm0, %v8512_v42, -inf }
 0x885   : > { %3731 = vmax.xlane.f32.xlu1 %v3730_v24  ;;  %3734 = vmax.xlane.f32.xlu0 %v3733_v9  ;;  %v8526_v24 = vpop.f32.mrf.mxu0 }
 0x886   : > { %v4352_v9 = vsel %vm1444_vm0, %v8526_v24, -inf }
 0x889   : > { %3737 = vmax.xlane.f32.xlu1 %v3736_v30  ;;  %3740 = vmax.xlane.f32.xlu0 %v3739_v4  ;;  %v4355_v30 = vsel %vm1444_vm0, %v8508_v35, -inf  ;;  %v4358_v4 = vsel %vm1444_vm0, %v8520_v50, -inf }
 0x88d   : > { %3743 = vmax.xlane.f32.xlu1 %v3742_v3  ;;  %4030 = vmax.xlane.f32.xlu0 %v4029_v16 }
 0x891   : > { %4033 = vmax.xlane.f32.xlu1 %v4032_v45  ;;  %4036 = vmax.xlane.f32.xlu0 %v4035_v29 }
 0x895   : > { %4039 = vmax.xlane.f32.xlu1 %v4038_v15  ;;  %4042 = vmax.xlane.f32.xlu0 %v4041_v12 }
 0x899   : > { %4045 = vmax.xlane.f32.xlu1 %v4044_v44  ;;  %4048 = vmax.xlane.f32.xlu0 %v4047_v58 }
 0x89d   : > { %4051 = vmax.xlane.f32.xlu1 %v4050_v37  ;;  %4338 = vmax.xlane.f32.xlu0 %v4337_v38 }
 0x8a1   : > { %4341 = vmax.xlane.f32.xlu1 %v4340_v61  ;;  %4344 = vmax.xlane.f32.xlu0 %v4343_v23 }
 0x8a5   : > { %4347 = vmax.xlane.f32.xlu1 %v4346_v49  ;;  %4350 = vmax.xlane.f32.xlu0 %v4349_v20 }
 0x8a9   : > { %4353 = vmax.xlane.f32.xlu1 %v4352_v9  ;;  %4356 = vmax.xlane.f32.xlu0 %v4355_v30  ;;  %v8538_v9 = vld [vmem:[%s9056_s16] ss:$0 sm:$0xff] }
 0x8ad   : > { %4359 = vmax.xlane.f32.xlu1 %v4358_v4 }
 0x8ce   : > { %v2816_v16 = vpop.xlane.xlu0 %2815 }
 0x8cf   : > { %v2831_v3 = vmul.f32 0.0078125, %v2816_v16 }
 0x8d1   : > { %v2839_v45 = vadd.f32 1e-05, %v2831_v3 }
 0x8d2   : > { %v2818_v29 = vpop.xlane.xlu1 %2817  ;;  %v2820_v15 = vpop.xlane.xlu0 %2819 }
 0x8d3   : > { %6808 = vrsqrt.f32 %v2839_v45  ;;  %v2832_v12 = vmul.f32 0.0078125, %v2818_v29  ;;  %v2833_v44 = vmul.f32 0.0078125, %v2820_v15  ;;  %v8546_v29 = vld [vmem:[%s9132_s24] ss:$0 sm:$0xff] }
 0x8d5   : > { %v2840_v58 = vadd.f32 1e-05, %v2832_v12  ;;  %v2841_v38 = vadd.f32 1e-05, %v2833_v44 }
 0x8d6   : > { %v2822_v37 = vpop.xlane.xlu1 %2821 }
 0x8d7   : > { %6810 = vrsqrt.f32 %v2840_v58  ;;  %v2834_v61 = vmul.f32 0.0078125, %v2822_v37 }
 0x8d8   : > { %6812 = vrsqrt.f32 %v2841_v38 }
 0x8d9   : > { %v2842_v23 = vadd.f32 1e-05, %v2834_v61 }
 0x8db   : > { %6814 = vrsqrt.f32 %v2842_v23 }
 0x8e0   : > { %v6809_v49 = vpop.eup %6808 }
 0x8e1   : > { %v2855_v20 = vmul.f32 %v6809_v49, %v8384_v17 }
 0x8e3   : > { %v2867_v3 = vmul.f32 %v8538_v9, %v2855_v20 }
 0x8e4   : > { %v6811_v30 = vpop.eup %6810 }
 0x8e5   : > { %v6813_v4 = vpop.eup %6812  ;;  %v2856_v16 = vmul.f32 %v6811_v30, %v8390_v7  ;;  %v8551_v44 = vadd.f32 %v8546_v29, %v2867_v3 }
 0x8e6   : > { %v2857_v45 = vmul.f32 %v6813_v4, %v8392_v2 }
 0x8e7   : > { %v2868_v17 = vmul.f32 %v8538_v9, %v2856_v16 }
 0x8e8   : > { %v6815_v15 = vpop.eup %6814  ;;  %v2869_v7 = vmul.f32 %v8538_v9, %v2857_v45 }
 0x8e9   : > { %v2858_v12 = vmul.f32 %v6815_v15, %v8400_v14  ;;  %v8554_v58 = vadd.f32 %v8546_v29, %v2868_v17 }
 0x8ea   : > { %v8561_v37 = vadd.f32 %v8546_v29, %v2869_v7 }
 0x8eb   : > { %v2887_v2 = vpack.c.bf16 %v8554_v58, %v8551_v44  ;;  %v2870_v38 = vmul.f32 %v8538_v9, %v2858_v12 }
 0x8ed   : > { %6262 = vmatprep.mubr.bf16.mxu1 %v2887_v2  ;;  %v8564_v61 = vadd.f32 %v8546_v29, %v2870_v38 }
 0x8ee   : > { %v2824_v14 = vpop.xlane.xlu0 %2823 }
 0x8ef   : > { %v2835_v23 = vmul.f32 0.0078125, %v2824_v14  ;;  %v2888_v49 = vpack.c.bf16 %v8564_v61, %v8561_v37 }
 0x8f1   : > { %v2843_v20 = vadd.f32 1e-05, %v2835_v23  ;;  %6263 = vmatmul.mubr.bf16.vlgmr.msra.gmra.mxu1 %v2888_v49 }
 0x8f2   : > { %v2826_v30 = vpop.xlane.xlu1 %2825  ;;  %v2828_v4 = vpop.xlane.xlu0 %2827 }
 0x8f3   : > { %6816 = vrsqrt.f32 %v2843_v20  ;;  %v2836_v16 = vmul.f32 0.0078125, %v2826_v30  ;;  %v2837_v3 = vmul.f32 0.0078125, %v2828_v4 }
 0x8f5   : > { %v2844_v45 = vadd.f32 1e-05, %v2836_v16  ;;  %v2845_v17 = vadd.f32 1e-05, %v2837_v3 }
 0x8f6   : > { %v2830_v15 = vpop.xlane.xlu1 %2829  ;;  %v3415_v12 = vpop.xlane.xlu0 %3414 }
 0x8f7   : > { %6818 = vrsqrt.f32 %v2844_v45  ;;  %v2838_v7 = vmul.f32 0.0078125, %v2830_v15  ;;  %v3437_v2 = vsub.f32 %v8372_v25, %v3415_v12 }
 0x8f8   : > { %6820 = vrsqrt.f32 %v2845_v17 }
 0x8f9   : > { %v2846_v38 = vadd.f32 1e-05, %v2838_v7  ;;  %v3445_v14 = vmul.f32 1.442695, %v3437_v2 }
 0x8fa   : > { %v3418_v0 = vpop.xlane.xlu1 %3417  ;;  %v3421_v46 = vpop.xlane.xlu0 %3420 }
 0x8fb   : > { %6822 = vrsqrt.f32 %v2846_v38  ;;  %v3438_v23 = vsub.f32 %v8376_v19, %v3418_v0  ;;  %v3439_v49 = vsub.f32 %v8370_v32, %v3421_v46 }
 0x8fc   : > { %6824 = vpow2.f32 %v3445_v14 }
 0x8fd   : > { %v3447_v20 = vmul.f32 1.442695, %v3438_v23  ;;  %v3449_v30 = vmul.f32 1.442695, %v3439_v49 }
 0x8fe   : > { %v3424_v4 = vpop.xlane.xlu1 %3423  ;;  %v3427_v16 = vpop.xlane.xlu0 %3426 }
 0x8ff   : > { %6826 = vpow2.f32 %v3447_v20  ;;  %v3440_v3 = vsub.f32 %v8374_v57, %v3424_v4  ;;  %v3441_v25 = vsub.f32 %v8380_v8, %v3427_v16 }
 0x900   : > { %v6817_v45 = vpop.eup %6816  ;;  %6828 = vpow2.f32 %v3449_v30 }
 0x901   : > { %v3451_v17 = vmul.f32 1.442695, %v3440_v3  ;;  %v3453_v15 = vmul.f32 1.442695, %v3441_v25  ;;  %v2859_v12 = vmul.f32 %v6817_v45, %v8417_v51 }
 0x902   : > { %v3430_v7 = vpop.xlane.xlu1 %3429  ;;  %v3433_v0 = vpop.xlane.xlu0 %3432 }
 0x903   : > { %6830 = vpow2.f32 %v3451_v17  ;;  %v3442_v46 = vsub.f32 %v8388_v56, %v3430_v7  ;;  %v3443_v32 = vsub.f32 %v8378_v63, %v3433_v0  ;;  %v2871_v2 = vmul.f32 %v8538_v9, %v2859_v12 }
 0x904   : > { %v6819_v19 = vpop.eup %6818  ;;  %6832 = vpow2.f32 %v3453_v15 }
 0x905   : > { %v6821_v57 = vpop.eup %6820  ;;  %v3455_v38 = vmul.f32 1.442695, %v3442_v46  ;;  %v3457_v8 = vmul.f32 1.442695, %v3443_v32  ;;  %v2860_v14 = vmul.f32 %v6819_v19, %v8424_v53  ;;  %v8583_v4 = vadd.f32 %v8546_v29, %v2871_v2 }
 0x906   : > { %v3436_v23 = vpop.xlane.xlu1 %3435  ;;  %v3723_v49 = vpop.xlane.xlu0 %3722  ;;  %v2861_v51 = vmul.f32 %v6821_v57, %v8427_v39 }
 0x907   : > { %6834 = vpow2.f32 %v3455_v38  ;;  %v3444_v20 = vsub.f32 %v8382_v54, %v3436_v23  ;;  %v3745_v56 = vsub.f32 %v8404_v27, %v3723_v49  ;;  %v2872_v63 = vmul.f32 %v8538_v9, %v2860_v14 }
 0x908   : > { %v6823_v30 = vpop.eup %6822  ;;  %6836 = vpow2.f32 %v3457_v8  ;;  %v2873_v17 = vmul.f32 %v8538_v9, %v2861_v51 }
 0x909   : > { %v8585_v16 = vpop.eup %6824  ;;  %v3459_v3 = vmul.f32 1.442695, %v3444_v20  ;;  %v3753_v53 = vmul.f32 1.442695, %v3745_v56  ;;  %v8588_v25 = vadd.f32 %v8546_v29, %v2872_v63  ;;  %v2862_v39 = vmul.f32 %v6823_v30, %v8436_v10 }
 0x90a   : > { %v3726_v45 = vpop.xlane.xlu1 %3725  ;;  %v3461_v54 = vsel %vm1444_vm0, %v8585_v16, 0.0  ;;  %v3729_v27 = vpop.xlane.xlu0 %3728  ;;  %v8608_v38 = vadd.f32 %v8546_v29, %v2873_v17 }
 0x90b   : > { %9133 = vst [vmem:[#allocation36_spill] sm:$0xff] %v8588_v25  ;;  %6838 = vpow2.f32 %v3459_v3  ;;  %v3746_v15 = vsub.f32 %v8408_v43, %v3726_v45  ;;  %3462 = vadd.xlane.f32.xlu0 %v3461_v54  ;;  %v3747_v12 = vsub.f32 %v8398_v18, %v3729_v27  ;;  %v2889_v7 = vpack.c.bf16 %v8588_v25, %v8583_v4 }
 0x90c   : > { %v8598_v0 = vpop.eup %6826  ;;  %6840 = vpow2.f32 %v3753_v53  ;;  %v2874_v10 = vmul.f32 %v8538_v9, %v2862_v39 }
 0x90d   : > { %v8601_v46 = vpop.eup %6828  ;;  %v3755_v32 = vmul.f32 1.442695, %v3746_v15  ;;  %v3757_v19 = vmul.f32 1.442695, %v3747_v12  ;;  %6266 = vmatprep.mubr.bf16.mxu1 %v2889_v7  ;;  %v3464_v2 = vsel %vm1444_vm0, %v8598_v0, 0.0 }
 0x90e   : > { %3465 = vadd.xlane.f32.xlu1 %v3464_v2  ;;  %v3732_v43 = vpop.xlane.xlu1 %3731  ;;  %v3467_v18 = vsel %vm1444_vm0, %v8601_v46, 0.0  ;;  %v3735_v57 = vpop.xlane.xlu0 %3734  ;;  %v8611_v8 = vadd.f32 %v8546_v29, %v2874_v10 }
 0x90f   : > { %6842 = vpow2.f32 %v3755_v32  ;;  %v3748_v9 = vsub.f32 %v8406_v41, %v3732_v43  ;;  %3468 = vadd.xlane.f32.xlu0 %v3467_v18  ;;  %v3749_v14 = vsub.f32 %v8412_v26, %v3735_v57 }
 0x910   : > { %9134 = vst [vmem:[#allocation37_spill] sm:$0xff] %v8611_v8  ;;  %v8615_v23 = vpop.eup %6830  ;;  %6844 = vpow2.f32 %v3757_v19  ;;  %v2890_v49 = vpack.c.bf16 %v8611_v8, %v8608_v38 }
 0x911   : > { %v8619_v51 = vpop.eup %6832  ;;  %v3759_v20 = vmul.f32 1.442695, %v3748_v9  ;;  %v3761_v56 = vmul.f32 1.442695, %v3749_v14  ;;  %v3470_v29 = vsel %vm1444_vm0, %v8615_v23, 0.0 }
 0x912   : > { %6267 = vmatmul.mubr.bf16.gmra.mxu1 %v2890_v49  ;;  %3471 = vadd.xlane.f32.xlu1 %v3470_v29  ;;  %v3738_v63 = vpop.xlane.xlu1 %3737  ;;  %v3473_v41 = vsel %vm1444_vm0, %v8619_v51, 0.0  ;;  %v3741_v26 = vpop.xlane.xlu0 %3740 }
 0x913   : > { %6846 = vpow2.f32 %v3759_v20  ;;  %v3750_v30 = vsub.f32 %v8421_v60, %v3738_v63  ;;  %3474 = vadd.xlane.f32.xlu0 %v3473_v41  ;;  %v3751_v3 = vsub.f32 %v8410_v6, %v3741_v26 }
 0x914   : > { %v8627_v53 = vpop.eup %6834  ;;  %6848 = vpow2.f32 %v3761_v56 }
 0x915   : > { %v8629_v39 = vpop.eup %6836  ;;  %v3763_v45 = vmul.f32 1.442695, %v3750_v30  ;;  %v3765_v54 = vmul.f32 1.442695, %v3751_v3  ;;  %v3476_v27 = vsel %vm1444_vm0, %v8627_v53, 0.0 }
 0x916   : > { %3477 = vadd.xlane.f32.xlu1 %v3476_v27  ;;  %v3744_v17 = vpop.xlane.xlu1 %3743  ;;  %v3479_v15 = vsel %vm1444_vm0, %v8629_v39, 0.0  ;;  %v4031_v12 = vpop.xlane.xlu0 %4030 }
 0x917   : > { %6850 = vpow2.f32 %v3763_v45  ;;  %v3752_v60 = vsub.f32 %v8414_v28, %v3744_v17  ;;  %3480 = vadd.xlane.f32.xlu0 %v3479_v15  ;;  %v4053_v6 = vsub.f32 %v8442_v62, %v4031_v12 }
 0x918   : > { %v8637_v7 = vpop.eup %6838  ;;  %6852 = vpow2.f32 %v3765_v54 }
 0x919   : > { %v8639_v10 = vpop.eup %6840  ;;  %v3767_v32 = vmul.f32 1.442695, %v3752_v60  ;;  %v4061_v19 = vmul.f32 1.442695, %v4053_v6  ;;  %v3482_v2 = vsel %vm1444_vm0, %v8637_v7, 0.0 }
 0x91a   : > { %3483 = vadd.xlane.f32.xlu1 %v3482_v2  ;;  %v4034_v43 = vpop.xlane.xlu1 %4033  ;;  %v3769_v18 = vsel %vm1444_vm0, %v8639_v10, 0.0  ;;  %v4037_v57 = vpop.xlane.xlu0 %4036 }
 0x91b   : > { %6854 = vpow2.f32 %v3767_v32  ;;  %v4054_v28 = vsub.f32 %v8454_v36, %v4034_v43  ;;  %3770 = vadd.xlane.f32.xlu0 %v3769_v18  ;;  %v4055_v62 = vsub.f32 %v8433_v52, %v4037_v57 }
 0x91c   : > { %v8647_v9 = vpop.eup %6842  ;;  %6856 = vpow2.f32 %v4061_v19 }
 0x91d   : > { %v8649_v14 = vpop.eup %6844  ;;  %v4063_v49 = vmul.f32 1.442695, %v4054_v28  ;;  %v4065_v20 = vmul.f32 1.442695, %v4055_v62  ;;  %v3772_v56 = vsel %vm1444_vm0, %v8647_v9, 0.0 }
 0x91e   : > { %3773 = vadd.xlane.f32.xlu1 %v3772_v56  ;;  %v4040_v29 = vpop.xlane.xlu1 %4039  ;;  %v3775_v63 = vsel %vm1444_vm0, %v8649_v14, 0.0  ;;  %v4043_v41 = vpop.xlane.xlu0 %4042 }
 0x91f   : > { %6858 = vpow2.f32 %v4063_v49  ;;  %v4056_v36 = vsub.f32 %v8448_v40, %v4040_v29  ;;  %3776 = vadd.xlane.f32.xlu0 %v3775_v63  ;;  %v4057_v52 = vsub.f32 %v8464_v11, %v4043_v41 }
 0x920   : > { %v8657_v26 = vpop.eup %6846  ;;  %6860 = vpow2.f32 %v4065_v20 }
 0x921   : > { %v8659_v30 = vpop.eup %6848  ;;  %v4067_v3 = vmul.f32 1.442695, %v4056_v36  ;;  %v4069_v45 = vmul.f32 1.442695, %v4057_v52  ;;  %v3778_v54 = vsel %vm1444_vm0, %v8657_v26, 0.0 }
 0x922   : > { %3779 = vadd.xlane.f32.xlu1 %v3778_v54  ;;  %v4046_v27 = vpop.xlane.xlu1 %4045  ;;  %v3781_v17 = vsel %vm1444_vm0, %v8659_v30, 0.0  ;;  %v4049_v15 = vpop.xlane.xlu0 %4048 }
 0x923   : > { %6862 = vpow2.f32 %v4067_v3  ;;  %v4058_v40 = vsub.f32 %v8478_v55, %v4046_v27  ;;  %3782 = vadd.xlane.f32.xlu0 %v3781_v17  ;;  %v4059_v11 = vsub.f32 %v8460_v33, %v4049_v15 }
 0x924   : > { %v8667_v12 = vpop.eup %6850  ;;  %6864 = vpow2.f32 %v4069_v45 }
 0x925   : > { %v8669_v60 = vpop.eup %6852  ;;  %v4071_v6 = vmul.f32 1.442695, %v4058_v40  ;;  %v4073_v32 = vmul.f32 1.442695, %v4059_v11  ;;  %v3784_v19 = vsel %vm1444_vm0, %v8667_v12, 0.0 }
 0x926   : > { %3785 = vadd.xlane.f32.xlu1 %v3784_v19  ;;  %v4052_v2 = vpop.xlane.xlu1 %4051  ;;  %v3787_v43 = vsel %vm1444_vm0, %v8669_v60, 0.0  ;;  %v4339_v18 = vpop.xlane.xlu0 %4338 }
 0x927   : > { %6866 = vpow2.f32 %v4071_v6  ;;  %v4060_v55 = vsub.f32 %v8472_v34, %v4052_v2  ;;  %3788 = vadd.xlane.f32.xlu0 %v3787_v43  ;;  %v4361_v33 = vsub.f32 %v8488_v13, %v4339_v18 }
 0x928   : > { %v8677_v57 = vpop.eup %6854  ;;  %6868 = vpow2.f32 %v4073_v32 }
 0x929   : > { %v8679_v28 = vpop.eup %6856  ;;  %v4075_v62 = vmul.f32 1.442695, %v4060_v55  ;;  %v4369_v49 = vmul.f32 1.442695, %v4361_v33  ;;  %v3790_v20 = vsel %vm1444_vm0, %v8677_v57, 0.0 }
 0x92a   : > { %3791 = vadd.xlane.f32.xlu1 %v3790_v20  ;;  %v4342_v56 = vpop.xlane.xlu1 %4341  ;;  %v4077_v29 = vsel %vm1444_vm0, %v8679_v28, 0.0  ;;  %v4345_v63 = vpop.xlane.xlu0 %4344 }
 0x92b   : > { %6870 = vpow2.f32 %v4075_v62  ;;  %v4362_v34 = vsub.f32 %v8502_v59, %v4342_v56  ;;  %4078 = vadd.xlane.f32.xlu0 %v4077_v29  ;;  %v4363_v13 = vsub.f32 %v8484_v48, %v4345_v63 }
 0x92c   : > { %v8687_v41 = vpop.eup %6858  ;;  %6872 = vpow2.f32 %v4369_v49 }
 0x92d   : > { %v8689_v36 = vpop.eup %6860  ;;  %v4371_v52 = vmul.f32 1.442695, %v4362_v34  ;;  %v4373_v3 = vmul.f32 1.442695, %v4363_v13  ;;  %v4080_v45 = vsel %vm1444_vm0, %v8687_v41, 0.0 }
 0x92e   : > { %4081 = vadd.xlane.f32.xlu1 %v4080_v45  ;;  %v4348_v54 = vpop.xlane.xlu1 %4347  ;;  %v4083_v27 = vsel %vm1444_vm0, %v8689_v36, 0.0  ;;  %v4351_v17 = vpop.xlane.xlu0 %4350 }
 0x92f   : > { %6874 = vpow2.f32 %v4371_v52  ;;  %v4364_v59 = vsub.f32 %v8496_v5, %v4348_v54  ;;  %4084 = vadd.xlane.f32.xlu0 %v4083_v27  ;;  %v4365_v48 = vsub.f32 %v8512_v42, %v4351_v17 }
 0x930   : > { %v8697_v15 = vpop.eup %6862  ;;  %6876 = vpow2.f32 %v4373_v3 }
 0x931   : > { %v8699_v40 = vpop.eup %6864  ;;  %v4375_v11 = vmul.f32 1.442695, %v4364_v59  ;;  %v4377_v6 = vmul.f32 1.442695, %v4365_v48  ;;  %v4086_v32 = vsel %vm1444_vm0, %v8697_v15, 0.0 }
 0x932   : > { %4087 = vadd.xlane.f32.xlu1 %v4086_v32  ;;  %v4354_v19 = vpop.xlane.xlu1 %4353  ;;  %v4089_v2 = vsel %vm1444_vm0, %v8699_v40, 0.0  ;;  %v4357_v43 = vpop.xlane.xlu0 %4356 }
 0x933   : > { %6878 = vpow2.f32 %v4375_v11  ;;  %v4366_v5 = vsub.f32 %v8526_v24, %v4354_v19  ;;  %4090 = vadd.xlane.f32.xlu0 %v4089_v2  ;;  %v4367_v42 = vsub.f32 %v8508_v35, %v4357_v43 }
 0x934   : > { %v8707_v18 = vpop.eup %6866  ;;  %6880 = vpow2.f32 %v4377_v6 }
 0x935   : > { %v8709_v55 = vpop.eup %6868  ;;  %v4379_v33 = vmul.f32 1.442695, %v4366_v5  ;;  %v4381_v62 = vmul.f32 1.442695, %v4367_v42  ;;  %v4092_v49 = vsel %vm1444_vm0, %v8707_v18, 0.0 }
 0x936   : > { %4093 = vadd.xlane.f32.xlu1 %v4092_v49  ;;  %v4360_v20 = vpop.xlane.xlu1 %4359  ;;  %v4095_v56 = vsel %vm1444_vm0, %v8709_v55, 0.0 }
 0x937   : > { %6882 = vpow2.f32 %v4379_v33  ;;  %v4368_v24 = vsub.f32 %v8520_v50, %v4360_v20  ;;  %4096 = vadd.xlane.f32.xlu0 %v4095_v56 }
 0x938   : > { %v8716_v35 = vpop.eup %6870  ;;  %6884 = vpow2.f32 %v4381_v62 }
 0x939   : > { %v8718_v29 = vpop.eup %6872  ;;  %v4383_v63 = vmul.f32 1.442695, %v4368_v24  ;;  %v4098_v34 = vsel %vm1444_vm0, %v8716_v35, 0.0 }
 0x93a   : > { %4099 = vadd.xlane.f32.xlu1 %v4098_v34  ;;  %v4385_v13 = vsel %vm1444_vm0, %v8718_v29, 0.0 }
 0x93b   : > { %6886 = vpow2.f32 %v4383_v63  ;;  %4386 = vadd.xlane.f32.xlu0 %v4385_v13 }
 0x93c   : > { %v8724_v52 = vpop.eup %6874 }
 0x93d   : > { %v8726_v3 = vpop.eup %6876  ;;  %v4388_v50 = vsel %vm1444_vm0, %v8724_v52, 0.0 }
 0x93e   : > { %4389 = vadd.xlane.f32.xlu1 %v4388_v50  ;;  %v4391_v45 = vsel %vm1444_vm0, %v8726_v3, 0.0 }
 0x93f   : > { %4392 = vadd.xlane.f32.xlu0 %v4391_v45 }
 0x940   : > { %v8732_v54 = vpop.eup %6878 }
 0x941   : > { %v8734_v27 = vpop.eup %6880  ;;  %v4394_v17 = vsel %vm1444_vm0, %v8732_v54, 0.0 }
 0x942   : > { %4395 = vadd.xlane.f32.xlu1 %v4394_v17  ;;  %v4397_v59 = vsel %vm1444_vm0, %v8734_v27, 0.0 }
 0x943   : > { %4398 = vadd.xlane.f32.xlu0 %v4397_v59 }
 0x944   : > { %v8740_v48 = vpop.eup %6882 }
 0x945   : > { %v8742_v11 = vpop.eup %6884  ;;  %v4400_v6 = vsel %vm1444_vm0, %v8740_v48, 0.0 }
 0x946   : > { %4401 = vadd.xlane.f32.xlu1 %v4400_v6  ;;  %v4403_v32 = vsel %vm1444_vm0, %v8742_v11, 0.0 }
 0x947   : > { %4404 = vadd.xlane.f32.xlu0 %v4403_v32  ;;  %v8758_v32 = vld [vmem:[%s9135_s15] ss:$0 sm:$0xff] }
 0x948   : > { %v8748_v19 = vpop.eup %6886 }
 0x949   : > { %v4406_v2 = vsel %vm1444_vm0, %v8748_v19, 0.0 }
 0x94a   : > { %4407 = vadd.xlane.f32.xlu1 %v4406_v2 }
 0x994   : > { %v3463_v43 = vpop.xlane.xlu0 %3462 }
 0x995   : > { %6888 = vrcp.f32 %v3463_v43 }
 0x997   : > { %v3466_v5 = vpop.xlane.xlu1 %3465 }
 0x998   : > { %6890 = vrcp.f32 %v3466_v5  ;;  %v3469_v42 = vpop.xlane.xlu0 %3468 }
 0x99b   : > { %v3472_v33 = vpop.xlane.xlu1 %3471 }
 0x99c   : > { %v3475_v62 = vpop.xlane.xlu0 %3474  ;;  %6892 = vrcp.f32 %v3472_v33 }
 0x99f   : > { %v3478_v49 = vpop.xlane.xlu1 %3477 }
 0x9a0   : > { %v3481_v20 = vpop.xlane.xlu0 %3480  ;;  %6894 = vrcp.f32 %v3478_v49 }
 0x9a1   : > { %6896 = vrcp.f32 %v3469_v42 }
 0x9a2   : > { %v6889_v56 = vpop.eup %6888  ;;  %6898 = vrcp.f32 %v3475_v62 }
 0x9a3   : > { %v3484_v24 = vpop.xlane.xlu1 %3483  ;;  %v3493_v34 = vmul.f32 %v6889_v56, %v8585_v16 }
 0x9a4   : > { %v3771_v45 = vpop.xlane.xlu0 %3770  ;;  %6900 = vrcp.f32 %v3484_v24 }
 0x9a5   : > { %v6891_v63 = vpop.eup %6890 }
 0x9a6   : > { %v3494_v13 = vmul.f32 %v6891_v63, %v8598_v0 }
 0x9a7   : > { %v3774_v50 = vpop.xlane.xlu1 %3773 }
 0x9a8   : > { %v3501_v17 = vpack.c.bf16 %v3494_v13, %v3493_v34  ;;  %v3777_v6 = vpop.xlane.xlu0 %3776  ;;  %6902 = vrcp.f32 %v3774_v50 }
 0x9a9   : > { %6904 = vrcp.f32 %v3481_v20  ;;  %v6893_v62 = vpop.eup %6892 }
 0x9aa   : > { %6282 = vmatprep.mubr.msk.bf16.mxu1 %vm1444_vm0, %v3501_v17  ;;  %6906 = vrcp.f32 %v3771_v45 }
 0x9ab   : > { %v3780_v59 = vpop.xlane.xlu1 %3779 }
 0x9ac   : > { %v3783_v0 = vpop.xlane.xlu0 %3782  ;;  %6908 = vrcp.f32 %v3780_v59 }
 0x9af   : > { %v3786_v43 = vpop.xlane.xlu1 %3785 }
 0x9b0   : > { %v3789_v33 = vpop.xlane.xlu0 %3788  ;;  %6910 = vrcp.f32 %v3786_v43 }
 0x9b1   : > { %v6264_v2 = vpop.f32.mrf.mxu1  ;;  %6912 = vrcp.f32 %v3777_v6 }
 0x9b2   : > { %v3186_v5 = vadd.f32 %v6264_v2, %v8758_v32  ;;  %6914 = vrcp.f32 %v3783_v0 }
 0x9b3   : > { %v3177_v16 = vpop.f32.mrf.mxu1  ;;  %v3792_v8 = vpop.xlane.xlu1 %3791 }
 0x9b4   : > { %v5895_v56 = vpack.c.bf16 %v3186_v5, %v3186_v5  ;;  %v3178_v63 = vadd.f32 %v8758_v32, %v3177_v16  ;;  %v4079_v5 = vpop.xlane.xlu0 %4078  ;;  %v6895_v16 = vpop.eup %6894  ;;  %6916 = vrcp.f32 %v3792_v8 }
 0x9b5   : > { %v6265_v34 = vpop.f32.mrf.mxu1 }
 0x9b6   : > { %3298 = vst [vmem:[#allocation2 + $0x20] sm:$0xf] %v5895_v56  ;;  %v5893_v13 = vpack.c.bf16 %v3178_v63, %v3178_v63  ;;  %v3189_v17 = vadd.f32 %v6265_v34, %v8758_v32  ;;  %v6897_v56 = vpop.eup %6896  ;;  %v3496_v34 = vmul.f32 %v6893_v62, %v8615_v23 }
 0x9b7   : > { %v3180_v47 = vpop.f32.mrf.mxu1  ;;  %v4082_v42 = vpop.xlane.xlu1 %4081  ;;  %v3495_v24 = vmul.f32 %v6897_v56, %v8601_v46 }
 0x9b8   : > { %3296 = vst [vmem:[#allocation2 + $0x8] sm:$0xf] %v5893_v13  ;;  %v5896_v25 = vpack.c.bf16 %v3189_v17, %v3189_v17  ;;  %v3181_v2 = vadd.f32 %v8758_v32, %v3180_v47  ;;  %v6899_v63 = vpop.eup %6898  ;;  %v4085_v50 = vpop.xlane.xlu0 %4084  ;;  %6918 = vrcp.f32 %v4082_v42 }
 0x9b9   : > { %v3497_v45 = vmul.f32 %v6899_v63, %v8619_v51  ;;  %v3502_v17 = vpack.c.bf16 %v3496_v34, %v3495_v24  ;;  %6920 = vrcp.f32 %v3789_v33 }
 0x9ba   : > { %3299 = vst [vmem:[#allocation2 + $0x2c] sm:$0xf] %v5896_v25  ;;  %v5894_v49 = vpack.c.bf16 %v3181_v2, %v3181_v2  ;;  %v3498_v25 = vmul.f32 %v6895_v16, %v8627_v53  ;;  %v6901_v2 = vpop.eup %6900  ;;  %6922 = vrcp.f32 %v4079_v5 }
 0x9bb   : > { %v4088_v47 = vpop.xlane.xlu1 %4087  ;;  %v6903_v59 = vpop.eup %6902  ;;  %v3500_v53 = vmul.f32 %v6901_v2, %v8637_v7 }
 0x9bc   : > { %3297 = vst [vmem:[#allocation2 + $0x14] sm:$0xf] %v5894_v49  ;;  %v3503_v23 = vpack.c.bf16 %v3498_v25, %v3497_v45  ;;  %v6905_v43 = vpop.eup %6904  ;;  %v4091_v6 = vpop.xlane.xlu0 %4090  ;;  %v3802_v51 = vmul.f32 %v6903_v59, %v8647_v9  ;;  %6924 = vrcp.f32 %v4088_v47 }
 0x9bd   : > { %v6907_v46 = vpop.eup %6906  ;;  %v3499_v0 = vmul.f32 %v6905_v43, %v8629_v39 }
 0x9be   : > { %v3801_v62 = vmul.f32 %v6907_v46, %v8639_v10  ;;  %v6909_v56 = vpop.eup %6908 }
 0x9bf   : > { %v4094_v49 = vpop.xlane.xlu1 %4093  ;;  %v3504_v16 = vpack.c.bf16 %v3500_v53, %v3499_v0  ;;  %v3804_v9 = vmul.f32 %v6909_v56, %v8657_v26 }
 0x9c0   : > { %v3809_v34 = vpack.c.bf16 %v3802_v51, %v3801_v62  ;;  %v4097_v25 = vpop.xlane.xlu0 %4096  ;;  %6926 = vrcp.f32 %v4094_v49 }
 0x9c1   : > { %v6625_v20 = vld [vmem:[#allocation2 + $0x20] ss:$12 sps:$4 sm:$0xff]   ;;  %6928 = vrcp.f32 %v4085_v50 }
 0x9c2   : > { %6930 = vrcp.f32 %v4091_v6 }
 0x9c3   : > { %v6624_v13 = vld [vmem:[#allocation2 + $0x8] ss:$12 sps:$4 sm:$0xff]   ;;  %v4100_v63 = vpop.xlane.xlu1 %4099 }
 0x9c4   : > { %6280 = vmatprep.subr.bf16.mxu1 %v6624_v13  ;;  %v4387_v43 = vpop.xlane.xlu0 %4386  ;;  %6932 = vrcp.f32 %v4100_v63 }
 0x9c5   : > { %6281 = vmatpush3.bf16.msra.mxu1 %v6624_v13  ;;  %v6911_v13 = vpop.eup %6910 }
 0x9c6   : > { %6300 = vmatprep.subr.bf16.mxu1 %v6625_v20  ;;  %v6913_v8 = vpop.eup %6912  ;;  %v3806_v10 = vmul.f32 %v6911_v13, %v8667_v12 }
 0x9c7   : > { %v6915_v42 = vpop.eup %6914  ;;  %v3803_v5 = vmul.f32 %v6913_v8, %v8649_v14  ;;  %v4390_v45 = vpop.xlane.xlu1 %4389 }
 0x9c8   : > { %6283 = vmatmul.mubr.msk.bf16.vlgmr.msra.gmra.mxu1 %vm1444_vm0, %v3502_v17  ;;  %v3805_v2 = vmul.f32 %v6915_v42, %v8659_v30  ;;  %v6917_v59 = vpop.eup %6916  ;;  %6934 = vrcp.f32 %v4390_v45 }
 0x9c9   : > { %6286 = vmatprep.mubr.msk.bf16.mxu1 %vm1444_vm0, %v3503_v23  ;;  %6301 = vmatpush3.bf16.msra.mxu1 %v6625_v20  ;;  %v3810_v23 = vpack.c.bf16 %v3804_v9, %v3803_v5  ;;  %v6919_v14 = vpop.eup %6918  ;;  %v3808_v51 = vmul.f32 %v6917_v59, %v8677_v57  ;;  %6936 = vrcp.f32 %v4097_v25 }
 0x9ca   : > { %v3811_v46 = vpack.c.bf16 %v3806_v10, %v3805_v2  ;;  %v6921_v50 = vpop.eup %6920  ;;  %v4110_v62 = vmul.f32 %v6919_v14, %v8687_v41  ;;  %6938 = vrcp.f32 %v4387_v43 }
 0x9cb   : > { %v6923_v30 = vpop.eup %6922  ;;  %v4396_v0 = vpop.xlane.xlu1 %4395 }
 0x9cc   : > { %v4109_v56 = vmul.f32 %v6923_v30, %v8679_v28  ;;  %v6925_v8 = vpop.eup %6924  ;;  %6940 = vrcp.f32 %v4396_v0  ;;  %v6631_v0 = vld [vmem:[#allocation19 + $0x20] sm:$0xff]  }
 0x9cd   : > { %v4112_v42 = vmul.f32 %v6925_v8, %v8697_v15 }
 0x9ce   : > { %v4117_v13 = vpack.c.bf16 %v4110_v62, %v4109_v56  ;;  %v6635_v62 = vld [vmem:[#allocation19 + $0x8] sm:$0xff]  }
 0x9cf   : > { %v4402_v57 = vpop.xlane.xlu1 %4401 }
 0x9d0   : > { %6287 = vmatmul.mubr.msk.bf16.gmra.mxu1 %vm1444_vm0, %v3504_v16  ;;  %v3807_v16 = vmul.f32 %v6921_v50, %v8669_v60  ;;  %6942 = vrcp.f32 %v4402_v57 }
 0x9d1   : > { %6302 = vmatprep.mubr.msk.bf16.mxu1 %vm1444_vm0, %v3809_v34 }
 0x9d2   : > { %v6268_v7 = vpop.f32.mrf.mxu1  ;;  %v3812_v34 = vpack.c.bf16 %v3808_v51, %v3807_v16  ;;  %v6636_v16 = vld [vmem:[#allocation19] sm:$0xff]  }
 0x9d3   : > { %v3202_v39 = vadd.f32 %v6268_v7, %v8758_v32  ;;  %v6927_v7 = vpop.eup %6926 }
 0x9d4   : > { %v3193_v33 = vpop.f32.mrf.mxu1  ;;  %v6929_v63 = vpop.eup %6928  ;;  %v4114_v28 = vmul.f32 %v6927_v7, %v8707_v18 }
 0x9d5   : > { %v5899_v24 = vpack.c.bf16 %v3202_v39, %v3202_v39  ;;  %v3194_v20 = vadd.f32 %v8758_v32, %v3193_v33  ;;  %v6931_v41 = vpop.eup %6930  ;;  %v4111_v9 = vmul.f32 %v6929_v63, %v8689_v36 }
 0x9d6   : > { %v6269_v17 = vpop.f32.mrf.mxu1  ;;  %v4113_v33 = vmul.f32 %v6931_v41, %v8699_v40  ;;  %v6933_v5 = vpop.eup %6932 }
 0x9d7   : > { %3302 = vst [vmem:[#allocation2 + $0x50] sm:$0xf] %v5899_v24  ;;  %v5897_v26 = vpack.c.bf16 %v3194_v20, %v3194_v20  ;;  %v3205_v47 = vadd.f32 %v6269_v17, %v8758_v32  ;;  %v4118_v10 = vpack.c.bf16 %v4112_v42, %v4111_v9  ;;  %v4408_v24 = vpop.xlane.xlu1 %4407  ;;  %v6935_v20 = vpop.eup %6934  ;;  %v4116_v18 = vmul.f32 %v6933_v5, %v8716_v35 }
 0x9d8   : > { %v3196_v12 = vpop.f32.mrf.mxu1  ;;  %6303 = vmatmul.mubr.msk.bf16.vlgmr.msra.gmra.mxu1 %vm1444_vm0, %v3810_v23  ;;  %v4119_v15 = vpack.c.bf16 %v4114_v28, %v4113_v33  ;;  %v6937_v45 = vpop.eup %6936  ;;  %v4418_v2 = vmul.f32 %v6935_v20, %v8724_v52 }
 0x9d9   : > { %3300 = vst [vmem:[#allocation2 + $0x38] sm:$0xf] %v5897_v26  ;;  %v5900_v49 = vpack.c.bf16 %v3205_v47, %v3205_v47  ;;  %v3197_v53 = vadd.f32 %v8758_v32, %v3196_v12  ;;  %6306 = vmatprep.mubr.msk.bf16.mxu1 %vm1444_vm0, %v3811_v46  ;;  %v4393_v32 = vpop.xlane.xlu0 %4392  ;;  %v6939_v36 = vpop.eup %6938  ;;  %v4115_v40 = vmul.f32 %v6937_v45, %v8709_v55 }
 0x9da   : > { %6944 = vrcp.f32 %v4393_v32  ;;  %v4417_v23 = vmul.f32 %v6939_v36, %v8718_v29  ;;  %v6941_v47 = vpop.eup %6940 }
 0x9db   : > { %3303 = vst [vmem:[#allocation2 + $0x5c] sm:$0xf] %v5900_v49  ;;  %v5898_v6 = vpack.c.bf16 %v3197_v53, %v3197_v53  ;;  %v4120_v26 = vpack.c.bf16 %v4116_v18, %v4115_v40  ;;  %v4420_v14 = vmul.f32 %v6941_v47, %v8732_v54  ;;  %v9136_v54 = vmov 0  }
 0x9dc   : > { %v4425_v59 = vpack.c.bf16 %v4418_v2, %v4417_v23 }
 0x9dd   : > { %3301 = vst [vmem:[#allocation2 + $0x44] sm:$0xf] %v5898_v6  ;;  %v4399_v60 = vpop.xlane.xlu0 %4398  ;;  %v6943_v43 = vpop.eup %6942 }
 0x9de   : > { %6946 = vrcp.f32 %v4399_v60  ;;  %v4422_v35 = vmul.f32 %v6943_v43, %v8740_v48  ;;  %v6630_v48 = vld [vmem:[#allocation19 + $0x28] sm:$0xff]  }
 0x9df   : > { %6948 = vrcp.f32 %v4408_v24 }
 0x9e0   : > { %6307 = vmatmul.mubr.msk.bf16.gmra.mxu1 %vm1444_vm0, %v3812_v34 }
 0x9e1   : > { %6322 = vmatprep.mubr.msk.bf16.mxu1 %vm1444_vm0, %v4117_v13  ;;  %v4405_v17 = vpop.xlane.xlu0 %4404 }
 0x9e2   : > { %v6627_v39 = vld [vmem:[#allocation2 + $0x50] ss:$12 sps:$4 sm:$0xff]   ;;  %6950 = vrcp.f32 %v4405_v17 }
 0x9e4   : > { %v6626_v25 = vld [vmem:[#allocation2 + $0x38] ss:$12 sps:$4 sm:$0xff]  }
 0x9e5   : > { %6320 = vmatprep.subr.bf16.mxu1 %v6626_v25 }
 0x9e6   : > { %6321 = vmatpush3.bf16.msra.mxu1 %v6626_v25 }
 0x9e7   : > { %6340 = vmatprep.subr.bf16.mxu1 %v6627_v39  ;;  %v6945_v12 = vpop.eup %6944 }
 0x9e8   : > { %v4419_v52 = vmul.f32 %v6945_v12, %v8726_v3  ;;  %v6628_v3 = vld [vmem:[#allocation19 + $0x38] sm:$0xff]  }
 0x9e9   : > { %6323 = vmatmul.mubr.msk.bf16.vlgmr.msra.gmra.mxu1 %vm1444_vm0, %v4118_v10  ;;  %6350 = vmatprep.subr.bf16.mxu0 %v6628_v3 }
 0x9ea   : > { %6326 = vmatprep.mubr.msk.bf16.mxu1 %vm1444_vm0, %v4119_v15  ;;  %6341 = vmatpush3.bf16.msra.mxu1 %v6627_v39  ;;  %v4426_v49 = vpack.c.bf16 %v4420_v14, %v4419_v52 }
 0x9eb   : > { %v6947_v46 = vpop.eup %6946  ;;  %6351 = vmatpush3.bf16.msra.mxu0 %v6628_v3 }
 0x9ec   : > { %v4421_v55 = vmul.f32 %v6947_v46, %v8734_v27  ;;  %v6949_v29 = vpop.eup %6948  ;;  %v6629_v27 = vld [vmem:[#allocation19 + $0x30] sm:$0xff]  }
 0x9ed   : > { %v4424_v30 = vmul.f32 %v6949_v29, %v8748_v19  ;;  %6352 = vmatprep.subr.bf16.mxu0 %v6629_v27  ;;  %v6632_v19 = vld [vmem:[#allocation19 + $0x18] sm:$0xff]  }
 0x9ee   : > { %v4427_v53 = vpack.c.bf16 %v4422_v35, %v4421_v55 }
 0x9ef   : > { %v6951_v50 = vpop.eup %6950  ;;  %6353 = vmatpush3.bf16.msra.mxu0 %v6629_v27 }
 0x9f0   : > { %v4423_v6 = vmul.f32 %v6951_v50, %v8742_v11  ;;  %6354 = vmatprep.subr.bf16.mxu0 %v6630_v48  ;;  %v6634_v11 = vld [vmem:[#allocation19 + $0x10] sm:$0xff]  }
 0x9f1   : > { %6327 = vmatmul.mubr.msk.bf16.gmra.mxu1 %vm1444_vm0, %v4120_v26 }
 0x9f2   : > { %6342 = vmatprep.mubr.msk.bf16.mxu1 %vm1444_vm0, %v4425_v59  ;;  %v4428_v51 = vpack.c.bf16 %v4424_v30, %v4423_v6 }
 0x9f3   : > { %6355 = vmatpush3.bf16.msra.mxu0 %v6630_v48 }
 0x9f4   : > { %6356 = vmatprep.subr.bf16.mxu0 %v6631_v0 }
 0x9f7   : > { %6357 = vmatpush3.bf16.msra.mxu0 %v6631_v0 }
 0x9f8   : > { %6358 = vmatprep.subr.bf16.mxu0 %v6632_v19 }
 0x9f9   : > { %6343 = vmatmul.mubr.msk.bf16.vlgmr.msra.gmra.mxu1 %vm1444_vm0, %v4426_v49 }
 0x9fa   : > { %6346 = vmatprep.mubr.msk.bf16.mxu1 %vm1444_vm0, %v4427_v53 }
 0x9fb   : > { %6359 = vmatpush3.bf16.msra.mxu0 %v6632_v19 }
 0x9fc   : > { %6360 = vmatprep.subr.bf16.mxu0 %v6634_v11 }
 0x9ff   : > { %6361 = vmatpush3.bf16.msra.mxu0 %v6634_v11 }
 0xa00   : > { %6362 = vmatprep.subr.bf16.mxu0 %v6635_v62 }
 0xa01   : > { %6347 = vmatmul.mubr.msk.bf16.gmra.mxu1 %vm1444_vm0, %v4428_v51 }
 0xa02   : > { %4970 = vmatprep.mubr.bf16.mxu1 %v9136_v54 }
 0xa03   : > { %6363 = vmatpush3.bf16.msra.mxu0 %v6635_v62 }
 0xa04   : > { %6364 = vmatprep.subr.bf16.mxu0 %v6636_v16 }
 0xa07   : > { %6365 = vmatpush3.bf16.msra.mxu0 %v6636_v16 }
 0xa88   : > { %v6284_v32 = vpop.f32.mrf.mxu1 }
 0xa89   : > { %v3590_v63 = vmul.f32 %v6284_v32, %v7989_v1 }
 0xa8a   : > { %v3557_v56 = vpop.f32.mrf.mxu1 }
 0xa8b   : > { %v3588_v7 = vmul.f32 %v3557_v56, %v7985_v21 }
 0xa8c   : > { %v6285_v34 = vpop.f32.mrf.mxu1 }
 0xa8d   : > { %v3592_v25 = vadd.f32 %v3590_v63, %v3588_v7  ;;  %v3591_v28 = vmul.f32 %v6285_v34, %v7989_v1 }
 0xa8e   : > { %v3560_v13 = vpop.f32.mrf.mxu1 }
 0xa8f   : > { %v3589_v41 = vmul.f32 %v3560_v13, %v7985_v21 }
 0xa90   : > { %v6288_v8 = vpop.f32.mrf.mxu1 }
 0xa91   : > { %v3593_v39 = vadd.f32 %v3591_v28, %v3589_v41  ;;  %v3598_v24 = vmul.f32 %v6288_v8, %v8003_v31 }
 0xa92   : > { %v3573_v57 = vpop.f32.mrf.mxu1 }
 0xa93   : > { %v3594_v42 = vmul.f32 %v3573_v57, %v7994_v22 }
 0xa94   : > { %v6289_v60 = vpop.f32.mrf.mxu1 }
 0xa95   : > { %v3596_v33 = vadd.f32 %v3594_v42, %v3592_v25  ;;  %v3599_v15 = vmul.f32 %v6289_v60, %v8003_v31 }
 0xa96   : > { %v3576_v9 = vpop.f32.mrf.mxu1 }
 0xa97   : > { %v3595_v10 = vmul.f32 %v3576_v9, %v7994_v22  ;;  %v3600_v17 = vadd.f32 %v3598_v24, %v3596_v33 }
 0xa98   : > { %v6304_v5 = vpop.f32.mrf.mxu1 }
 0xa99   : > { %v3597_v20 = vadd.f32 %v3595_v10, %v3593_v39  ;;  %v3898_v59 = vmul.f32 %v6304_v5, %v7989_v1 }
 0xa9a   : > { %v3865_v45 = vpop.f32.mrf.mxu1 }
 0xa9b   : > { %v3601_v36 = vadd.f32 %v3599_v15, %v3597_v20  ;;  %v3896_v26 = vmul.f32 %v3865_v45, %v7985_v21 }
 0xa9c   : > { %v6305_v18 = vpop.f32.mrf.mxu1 }
 0xa9d   : > { %v5933_v2 = vpack.c.bf16 %v3601_v36, %v3600_v17  ;;  %v3900_v14 = vadd.f32 %v3898_v59, %v3896_v26  ;;  %v3899_v35 = vmul.f32 %v6305_v18, %v7989_v1 }
 0xa9e   : > { %v3868_v40 = vpop.f32.mrf.mxu1 }
 0xa9f   : > { %5934 = vst [vmem:[#allocation3] sm:$0xff] %v5933_v2   ;;  %v3897_v43 = vmul.f32 %v3868_v40, %v7985_v21 }
 0xaa0   : > { %v6308_v23 = vpop.f32.mrf.mxu1 }
 0xaa1   : > { %v3901_v49 = vadd.f32 %v3899_v35, %v3897_v43  ;;  %v3906_v50 = vmul.f32 %v6308_v23, %v8003_v31 }
 0xaa2   : > { %v3881_v47 = vpop.f32.mrf.mxu1 }
 0xaa3   : > { %v3902_v12 = vmul.f32 %v3881_v47, %v7994_v22 }
 0xaa4   : > { %v6309_v46 = vpop.f32.mrf.mxu1 }
 0xaa5   : > { %v3904_v29 = vadd.f32 %v3902_v12, %v3900_v14  ;;  %v3907_v30 = vmul.f32 %v6309_v46, %v8003_v31 }
 0xaa6   : > { %v3884_v52 = vpop.f32.mrf.mxu1  ;;  %v6633_v55 = vld [vmem:[#allocation3] sm:$0xff]  }
 0xaa7   : > { %v3903_v53 = vmul.f32 %v3884_v52, %v7994_v22  ;;  %6366 = vmatprep.mubr.bf16.mxu0 %v6633_v55  ;;  %v3908_v3 = vadd.f32 %v3906_v50, %v3904_v29 }
 0xaa9   : > { %v3905_v6 = vadd.f32 %v3903_v53, %v3901_v49  ;;  %v6324_v51 = vpop.f32.mrf.mxu1 }
 0xaaa   : > { %v4206_v56 = vmul.f32 %v6324_v51, %v7989_v1 }
 0xaab   : > { %v3909_v27 = vadd.f32 %v3907_v30, %v3905_v6  ;;  %v4173_v48 = vpop.f32.mrf.mxu1 }
 0xaac   : > { %v4204_v16 = vmul.f32 %v4173_v48, %v7985_v21 }
 0xaad   : > { %v5938_v0 = vpack.c.bf16 %v3909_v27, %v3908_v3  ;;  %v6325_v19 = vpop.f32.mrf.mxu1 }
 0xaae   : > { %v4208_v7 = vadd.f32 %v4206_v56, %v4204_v16  ;;  %v4207_v57 = vmul.f32 %v6325_v19, %v7989_v1 }
 0xaaf   : > { %5939 = vst [vmem:[#allocation3 + $0x8] sm:$0xff] %v5938_v0   ;;  %v4176_v11 = vpop.f32.mrf.mxu1 }
 0xab0   : > { %v4205_v34 = vmul.f32 %v4176_v11, %v7985_v21 }
 0xab1   : > { %v6328_v62 = vpop.f32.mrf.mxu1 }
 0xab2   : > { %v4209_v42 = vadd.f32 %v4207_v57, %v4205_v34  ;;  %v4214_v9 = vmul.f32 %v6328_v62, %v8003_v31 }
 0xab3   : > { %v4189_v32 = vpop.f32.mrf.mxu1 }
 0xab4   : > { %v4210_v13 = vmul.f32 %v4189_v32, %v7994_v22 }
 0xab5   : > { %v6329_v8 = vpop.f32.mrf.mxu1 }
 0xab6   : > { %v6637_v63 = vld [vmem:[#allocation3 + $0x8] sm:$0xff]   ;;  %v4212_v60 = vadd.f32 %v4210_v13, %v4208_v7  ;;  %v4215_v39 = vmul.f32 %v6329_v8, %v8003_v31 }
 0xab7   : > { %v4192_v41 = vpop.f32.mrf.mxu1  ;;  %6367 = vmatmul.mubr.bf16.vlgmr.msra.gmra.mxu0 %v6637_v63 }
 0xab8   : > { %v4211_v25 = vmul.f32 %v4192_v41, %v7994_v22  ;;  %v4216_v5 = vadd.f32 %v4214_v9, %v4212_v60  ;;  %v6642_v60 = vld [vmem:[#allocation21 + $0x74] ss:$8 sps:$4 sm:$0xff]  }
 0xab9   : > { %v6344_v28 = vpop.f32.mrf.mxu1  ;;  %4938 = vmatprep.subr.bf16.mxu1 %v6642_v60 }
 0xaba   : > { %v4213_v33 = vadd.f32 %v4211_v25, %v4209_v42  ;;  %v4514_v2 = vmul.f32 %v6344_v28, %v7989_v1  ;;  %v6640_v42 = vld [vmem:[#allocation21 + $0x70] ss:$8 sps:$4 sm:$0xff]  }
 0xabb   : > { %v4481_v10 = vpop.f32.mrf.mxu1  ;;  %4939 = vmatpush1.bf16.msra.mxu1 %v6640_v42 }
 0xabc   : > { %v4217_v24 = vadd.f32 %v4215_v39, %v4213_v33  ;;  %v4512_v36 = vmul.f32 %v4481_v10, %v7985_v21 }
 0xabd   : > { %v6345_v15 = vpop.f32.mrf.mxu1 }
 0xabe   : > { %v5943_v20 = vpack.c.bf16 %v4217_v24, %v4216_v5  ;;  %v4516_v47 = vadd.f32 %v4514_v2, %v4512_v36  ;;  %v4515_v59 = vmul.f32 %v6345_v15, %v7989_v1  ;;  %v5804_v1 = vld [vmem:[%s9137_s4] ss:$0 sm:$0xff]  ;;  %v6645_v2 = vld [vmem:[#allocation21 + $0x64] ss:$8 sps:$4 sm:$0xff]   ;;  %s8977_s4 = scalar_lea.vmem [#allocation24], %s7788_s27  ;;  %s5909_s27 = sshll.u32 %s7547_s2, 10 }
 0xabf   : > { %v4484_v45 = vpop.f32.mrf.mxu1  ;;  %4940 = vmatprep.subr.bf16.mxu1 %v6645_v2  ;;  %v5818_v2 = vld [vmem:[%s9132_s24 + $0x1] ss:$0 sm:$0xff]  ;;  %s5379_s8 = sshll.u32 %s8977_s4, 4  ;;  %s8995_s3 = scalar_lea.hbm %s9144_s11, %s5909_s27  ;;  %s8997_s8 = int_to_ptr.vmem [resolvable:$true] %s5379_s8 }
 0xac0   : > { %5944 = vst [vmem:[#allocation3 + $0x10] sm:$0xff] %v5943_v20   ;;  %v4513_v40 = vmul.f32 %v4484_v45, %v7985_v21  ;;  %s7423_s2 = smov [#allocation24]  }
 0xac1   : > { %v6348_v17 = vpop.f32.mrf.mxu1  ;;  %s7313_s12 = sshll.u32 %s7423_s2, 4  ;;  %s7314_s12 = int_to_ptr.vmem [resolvable:$false] %s7313_s12 }
 0xac2   : > { %v4517_v46 = vadd.f32 %v4515_v59, %v4513_v40  ;;  %v4522_v52 = vmul.f32 %v6348_v17, %v8003_v31  ;;  %v6643_v40 = vld [vmem:[#allocation21 + $0x60] ss:$8 sps:$4 sm:$0xff]   ;;  %s7315_s1 = scalar_lea.vmem %s7314_s12, 2048  ;;  %p7316_p0 = scmp.lt.s32.totalorder %s8997_s8, %s7314_s12 }
 0xac3   : > { %v4497_v18 = vpop.f32.mrf.mxu1  ;;  %4941 = vmatpush1.bf16.msra.mxu1 %v6643_v40  ;;  %v6649_v59 = vld [vmem:[#allocation21 + $0x40] ss:$8 sps:$4 sm:$0xff]  }
 0xac4   : > { %v4518_v23 = vmul.f32 %v4497_v18, %v7994_v22 }
 0xac5   : > { %v6349_v26 = vpop.f32.mrf.mxu1 }
 0xac6   : > { %v4520_v14 = vadd.f32 %v4518_v23, %v4516_v47  ;;  %v4523_v55 = vmul.f32 %v6349_v26, %v8003_v31  ;;  %v6648_v23 = vld [vmem:[#allocation21 + $0x54] ss:$8 sps:$4 sm:$0xff]   ;;  %v6646_v26 = vld [vmem:[#allocation21 + $0x50] ss:$8 sps:$4 sm:$0xff]   ;;  %v6651_v47 = vld [vmem:[#allocation21 + $0x44] ss:$8 sps:$4 sm:$0xff]  }
 0xac7   : > { %v4500_v43 = vpop.f32.mrf.mxu1  ;;  %v6638_v12 = vld [vmem:[#allocation3 + $0x10] sm:$0xff]   ;;  %4942 = vmatprep.subr.bf16.mxu1 %v6648_v23 }
 0xac8   : > { %v4519_v35 = vmul.f32 %v4500_v43, %v7994_v22  ;;  %6370 = vmatprep.mubr.bf16.mxu0 %v6638_v12  ;;  %v4524_v29 = vadd.f32 %v4522_v52, %v4520_v14  ;;  %4943 = vmatpush1.bf16.msra.mxu1 %v6646_v26  ;;  %v6654_v43 = vld [vmem:[#allocation21 + $0x34] ss:$8 sps:$4 sm:$0xff]   ;;  %v6652_v12 = vld [vmem:[#allocation21 + $0x30] ss:$8 sps:$4 sm:$0xff]   ;;  %v6655_v52 = vld [vmem:[#allocation21 + $0x20] ss:$8 sps:$4 sm:$0xff]  }
 0xac9   : > { %4944 = vmatprep.subr.bf16.mxu1 %v6651_v47 }
 0xaca   : > { %v4521_v49 = vadd.f32 %v4519_v35, %v4517_v46  ;;  %v6657_v35 = vld [vmem:[#allocation21 + $0x24] ss:$8 sps:$4 sm:$0xff]  }
 0xacc   : > { %v4525_v21 = vadd.f32 %v4523_v55, %v4521_v49  ;;  %4945 = vmatpush1.bf16.msra.mxu1 %v6649_v59 }
 0xacd   : > { %4946 = vmatprep.subr.bf16.mxu1 %v6654_v43 }
 0xace   : > { %v5948_v53 = vpack.c.bf16 %v4525_v21, %v4524_v29 }
 0xad0   : > { %5949 = vst [vmem:[#allocation3 + $0x18] sm:$0xff] %v5948_v53   ;;  %4947 = vmatpush1.bf16.msra.mxu1 %v6652_v12 }
 0xad1   : > { %4948 = vmatprep.subr.bf16.mxu1 %v6657_v35 }
 0xad4   : > { %4949 = vmatpush1.bf16.msra.mxu1 %v6655_v52 }
 0xad7   : > { %v6639_v50 = vld [vmem:[#allocation3 + $0x18] sm:$0xff]  }
 0xad8   : > { %6371 = vmatmul.mubr.bf16.gmra.mxu0 %v6639_v50 }
 0xb77   : > { %v6368_v30 = vpop.f32.mrf.mxu0 }
 0xb78   : > { %v4682_v3 = vadd.f32 %v6368_v30, %v5804_v1  ;;  %v6660_v30 = vld [vmem:[#allocation21 + $0x14] ss:$8 sps:$4 sm:$0xff]  }
 0xb79   : > { %v4673_v6 = vpop.f32.mrf.mxu0  ;;  %4950 = vmatprep.subr.bf16.mxu1 %v6660_v30 }
 0xb7a   : > { %v4674_v51 = vadd.f32 %v5804_v1, %v4673_v6  ;;  %v4706_v0 = vadd.f32 %v4682_v3, %v8561_v37  ;;  %v6663_v6 = vld [vmem:[#allocation21 + $0x4] ss:$8 sps:$4 sm:$0xff]  }
 0xb7b   : > { %v6369_v22 = vpop.f32.mrf.mxu0 }
 0xb7c   : > { %v4704_v27 = vadd.f32 %v4674_v51, %v8551_v44  ;;  %v4685_v19 = vadd.f32 %v6369_v22, %v5804_v1 }
 0xb7d   : > { %v4676_v48 = vpop.f32.mrf.mxu0 }
 0xb7e   : > { %v4677_v31 = vadd.f32 %v5804_v1, %v4676_v48  ;;  %4714 = vadd.xlane.f32.xlu0 %v4704_v27  ;;  %v4707_v62 = vadd.f32 %v4685_v19, %v8564_v61  ;;  %v9139_v61 = vld [vmem:[#allocation37_spill] sm:$0xff] }
 0xb80   : > { %v4705_v11 = vadd.f32 %v4677_v31, %v8554_v58  ;;  %v9138_v58 = vld [vmem:[#allocation36_spill] sm:$0xff] }
 0xb82   : > { %4716 = vadd.xlane.f32.xlu1 %v4705_v11  ;;  %4718 = vadd.xlane.f32.xlu0 %v4706_v0 }
 0xb86   : > { %4720 = vadd.xlane.f32.xlu1 %v4707_v62 }
 0xb98   : > { %v6372_v16 = vpop.f32.mrf.mxu0 }
 0xb99   : > { %v4698_v13 = vadd.f32 %v6372_v16, %v5804_v1  ;;  %v6665_v16 = vld [vmem:[#allocation22 + $0x38] sm:$0xff]  }
 0xb9a   : > { %v4689_v32 = vpop.f32.mrf.mxu0 }
 0xb9b   : > { %v4690_v56 = vadd.f32 %v5804_v1, %v4689_v32  ;;  %v8855_v37 = vadd.f32 %v4698_v13, %v8608_v38  ;;  %v6666_v32 = vld [vmem:[#allocation22 + $0x70] sm:$0xff]   ;;  %v6669_v13 = vld [vmem:[#allocation22 + $0x28] sm:$0xff]  }
 0xb9c   : > { %v6373_v34 = vpop.f32.mrf.mxu0 }
 0xb9d   : > { %v4708_v44 = vadd.f32 %v4690_v56, %v8583_v4  ;;  %v4701_v57 = vadd.f32 %v6373_v34, %v5804_v1  ;;  %v6667_v56 = vld [vmem:[#allocation22 + $0x30] sm:$0xff]   ;;  %v6668_v34 = vld [vmem:[#allocation22 + $0x68] sm:$0xff]  }
 0xb9e   : > { %v4692_v8 = vpop.f32.mrf.mxu0 }
 0xb9f   : > { %v4693_v7 = vadd.f32 %v5804_v1, %v4692_v8  ;;  %4722 = vadd.xlane.f32.xlu0 %v4708_v44  ;;  %v8860_v41 = vadd.f32 %v4701_v57, %v9139_v61  ;;  %v6658_v1 = vld [vmem:[#allocation21 + $0x10] ss:$8 sps:$4 sm:$0xff]   ;;  %v6671_v8 = vld [vmem:[#allocation22 + $0x20] sm:$0xff]  }
 0xba0   : > { %4951 = vmatpush1.bf16.msra.mxu1 %v6658_v1 }
 0xba1   : > { %v4709_v63 = vadd.f32 %v4693_v7, %v9138_v58  ;;  %4952 = vmatprep.subr.bf16.mxu1 %v6663_v6  ;;  %v6672_v7 = vld [vmem:[#allocation22 + $0x58] sm:$0xff]  }
 0xba3   : > { %4724 = vadd.xlane.f32.xlu1 %v4709_v63  ;;  %4726 = vadd.xlane.f32.xlu0 %v8855_v37 }
 0xba7   : > { %4728 = vadd.xlane.f32.xlu1 %v8860_v41 }
 0xc07   : > { %v4715_v4 = vpop.xlane.xlu0 %4714 }
 0xc08   : > { %v4730_v25 = vmul.f32 0.0078125, %v4715_v4 }
 0xc0a   : > { %v8863_v28 = vsub.f32 %v4704_v27, %v4730_v25  ;;  %v6661_v27 = vld [vmem:[#allocation21] ss:$8 sps:$4 sm:$0xff]  }
 0xc0b   : > { %v4717_v38 = vpop.xlane.xlu1 %4716  ;;  %v4719_v9 = vpop.xlane.xlu0 %4718  ;;  %4953 = vmatpush1.bf16.msra.mxu1 %v6661_v27 }
 0xc0c   : > { %v4731_v39 = vmul.f32 0.0078125, %v4717_v38  ;;  %v4732_v33 = vmul.f32 0.0078125, %v4719_v9  ;;  %v4746_v10 = vmul.f32 %v8863_v28, %v8863_v28 }
 0xc0e   : > { %v8867_v5 = vsub.f32 %v4705_v11, %v4731_v39  ;;  %v8869_v24 = vsub.f32 %v4706_v0, %v4732_v33  ;;  %4754 = vadd.xlane.f32.xlu0 %v4746_v10 }
 0xc0f   : > { %v4721_v15 = vpop.xlane.xlu1 %4720 }
 0xc10   : > { %v4733_v20 = vmul.f32 0.0078125, %v4721_v15  ;;  %v4747_v45 = vmul.f32 %v8867_v5, %v8867_v5  ;;  %v4748_v17 = vmul.f32 %v8869_v24, %v8869_v24  ;;  %v5817_v15 = vld [vmem:[%s9056_s16 + $0x1] ss:$0 sm:$0xff] }
 0xc12   : > { %v8875_v36 = vsub.f32 %v4707_v62, %v4733_v20  ;;  %4756 = vadd.xlane.f32.xlu1 %v4747_v45  ;;  %4758 = vadd.xlane.f32.xlu0 %v4748_v17  ;;  %v6664_v62 = vld [vmem:[#allocation22 + $0x78] sm:$0xff]  }
 0xc13   : > { %6078 = vmatprep.subr.bf16.mxu0 %v6664_v62 }
 0xc14   : > { %v4749_v18 = vmul.f32 %v8875_v36, %v8875_v36  ;;  %6079 = vmatpush3.bf16.msra.mxu0 %v6665_v16 }
 0xc15   : > { %6080 = vmatprep.subr.bf16.mxu0 %v6666_v32 }
 0xc16   : > { %4760 = vadd.xlane.f32.xlu1 %v4749_v18 }
 0xc18   : > { %6081 = vmatpush3.bf16.msra.mxu0 %v6667_v56 }
 0xc19   : > { %6082 = vmatprep.subr.bf16.mxu0 %v6668_v34 }
 0xc1c   : > { %6083 = vmatpush3.bf16.msra.mxu0 %v6669_v13 }
 0xc28   : > { %v4723_v46 = vpop.xlane.xlu0 %4722 }
 0xc29   : > { %v4734_v14 = vmul.f32 0.0078125, %v4723_v46 }
 0xc2b   : > { %v8879_v55 = vsub.f32 %v4708_v44, %v4734_v14  ;;  %v6670_v44 = vld [vmem:[#allocation22 + $0x60] sm:$0xff]  }
 0xc2c   : > { %v4725_v49 = vpop.xlane.xlu1 %4724  ;;  %v4727_v29 = vpop.xlane.xlu0 %4726  ;;  %6084 = vmatprep.subr.bf16.mxu0 %v6670_v44 }
 0xc2d   : > { %v4735_v21 = vmul.f32 0.0078125, %v4725_v49  ;;  %v4736_v53 = vmul.f32 0.0078125, %v4727_v29  ;;  %v4750_v50 = vmul.f32 %v8879_v55, %v8879_v55  ;;  %6085 = vmatpush3.bf16.msra.mxu0 %v6671_v8 }
 0xc2e   : > { %6086 = vmatprep.subr.bf16.mxu0 %v6672_v7 }
 0xc2f   : > { %v8883_v51 = vsub.f32 %v4709_v63, %v4735_v21  ;;  %v8886_v22 = vsub.f32 %v8855_v37, %v4736_v53  ;;  %4762 = vadd.xlane.f32.xlu0 %v4750_v50  ;;  %v6673_v37 = vld [vmem:[#allocation22 + $0x18] sm:$0xff]  }
 0xc30   : > { %v4729_v3 = vpop.xlane.xlu1 %4728 }
 0xc31   : > { %v4737_v48 = vmul.f32 0.0078125, %v4729_v3  ;;  %v4751_v31 = vmul.f32 %v8883_v51, %v8883_v51  ;;  %v4752_v0 = vmul.f32 %v8886_v22, %v8886_v22  ;;  %6087 = vmatpush3.bf16.msra.mxu0 %v6673_v37 }
 0xc33   : > { %v8893_v19 = vsub.f32 %v8860_v41, %v4737_v48  ;;  %4764 = vadd.xlane.f32.xlu1 %v4751_v31  ;;  %4766 = vadd.xlane.f32.xlu0 %v4752_v0 }
 0xc35   : > { %v4753_v11 = vmul.f32 %v8893_v19, %v8893_v19 }
 0xc37   : > { %4768 = vadd.xlane.f32.xlu1 %v4753_v11 }
 0xc97   : > { %v4755_v57 = vpop.xlane.xlu0 %4754 }
 0xc98   : > { %v4770_v58 = vmul.f32 0.0078125, %v4755_v57 }
 0xc9a   : > { %v4778_v63 = vadd.f32 1e-05, %v4770_v58  ;;  %v6674_v58 = vld [vmem:[#allocation22 + $0x50] sm:$0xff]  }
 0xc9b   : > { %v4757_v61 = vpop.xlane.xlu1 %4756  ;;  %v4759_v41 = vpop.xlane.xlu0 %4758  ;;  %6088 = vmatprep.subr.bf16.mxu0 %v6674_v58 }
 0xc9c   : > { %6952 = vrsqrt.f32 %v4778_v63  ;;  %v4771_v42 = vmul.f32 0.0078125, %v4757_v61  ;;  %v4772_v60 = vmul.f32 0.0078125, %v4759_v41  ;;  %v6677_v63 = vld [vmem:[#allocation22 + $0x8] sm:$0xff]   ;;  %v6678_v61 = vld [vmem:[#allocation22 + $0x40] sm:$0xff]  }
 0xc9d   : > { %v6679_v41 = vld [vmem:[#allocation22] sm:$0xff]  }
 0xc9e   : > { %v4779_v4 = vadd.f32 1e-05, %v4771_v42  ;;  %v4780_v25 = vadd.f32 1e-05, %v4772_v60  ;;  %v9141_v60 = vld [vmem:[#allocation35_spill] sm:$0xff] }
 0xc9f   : > { %v4761_v38 = vpop.xlane.xlu1 %4760 }
 0xca0   : > { %6954 = vrsqrt.f32 %v4779_v4  ;;  %v4773_v9 = vmul.f32 0.0078125, %v4761_v38 }
 0xca1   : > { %6956 = vrsqrt.f32 %v4780_v25  ;;  %v9142_v25 = vld [vmem:[#allocation34_spill] sm:$0xff] }
 0xca2   : > { %v4781_v39 = vadd.f32 1e-05, %v4773_v9 }
 0xca4   : > { %6958 = vrsqrt.f32 %v4781_v39 }
 0xca9   : > { %v6953_v33 = vpop.eup %6952 }
 0xcaa   : > { %v4794_v10 = vmul.f32 %v6953_v33, %v8863_v28 }
 0xcac   : > { %v4806_v17 = vmul.f32 %v5817_v15, %v4794_v10 }
 0xcad   : > { %v6955_v20 = vpop.eup %6954 }
 0xcae   : > { %v4795_v45 = vmul.f32 %v6955_v20, %v8867_v5  ;;  %v6957_v18 = vpop.eup %6956  ;;  %v8905_v26 = vadd.f32 %v5818_v2, %v4806_v17 }
 0xcaf   : > { %v4796_v28 = vmul.f32 %v6957_v18, %v8869_v24 }
 0xcb0   : > { %v4807_v40 = vmul.f32 %v5817_v15, %v4795_v45 }
 0xcb1   : > { %v6959_v23 = vpop.eup %6958  ;;  %v4808_v12 = vmul.f32 %v5817_v15, %v4796_v28 }
 0xcb2   : > { %v8907_v47 = vadd.f32 %v5818_v2, %v4807_v40  ;;  %v4797_v59 = vmul.f32 %v6959_v23, %v8875_v36 }
 0xcb3   : > { %v8916_v52 = vadd.f32 %v5818_v2, %v4808_v12 }
 0xcb4   : > { %v4826_v43 = vpack.c.bf16 %v8907_v47, %v8905_v26  ;;  %v4809_v5 = vmul.f32 %v5817_v15, %v4797_v59 }
 0xcb6   : > { %4971 = vmatmul.mubr.bf16.vlgmr.msra.gmra.mxu1 %v4826_v43  ;;  %v8914_v14 = vadd.f32 %v5818_v2, %v4809_v5 }
 0xcb7   : > { %4980 = vmatprep.mubr.bf16.mxu1 %v9136_v54 }
 0xcb8   : > { %v4763_v46 = vpop.xlane.xlu0 %4762  ;;  %v4827_v24 = vpack.c.bf16 %v8914_v14, %v8916_v52 }
 0xcb9   : > { %v4774_v35 = vmul.f32 0.0078125, %v4763_v46 }
 0xcbb   : > { %v4782_v49 = vadd.f32 1e-05, %v4774_v35 }
 0xcbc   : > { %v4765_v29 = vpop.xlane.xlu1 %4764  ;;  %v4767_v21 = vpop.xlane.xlu0 %4766 }
 0xcbd   : > { %6960 = vrsqrt.f32 %v4782_v49  ;;  %v4775_v36 = vmul.f32 0.0078125, %v4765_v29  ;;  %v4776_v53 = vmul.f32 0.0078125, %v4767_v21 }
 0xcbe   : > { %4981 = vmatmul.mubr.bf16.gmra.mxu1 %v4827_v24 }
 0xcbf   : > { %v4783_v50 = vadd.f32 1e-05, %v4775_v36  ;;  %v4784_v30 = vadd.f32 1e-05, %v4776_v53  ;;  %4990 = vmatprep.mubr.bf16.mxu1 %v9136_v54 }
 0xcc0   : > { %v4769_v1 = vpop.xlane.xlu1 %4768 }
 0xcc1   : > { %6962 = vrsqrt.f32 %v4783_v50  ;;  %v4777_v6 = vmul.f32 0.0078125, %v4769_v1 }
 0xcc2   : > { %6964 = vrsqrt.f32 %v4784_v30 }
 0xcc3   : > { %v4785_v3 = vadd.f32 1e-05, %v4777_v6 }
 0xcc5   : > { %6966 = vrsqrt.f32 %v4785_v3 }
 0xcca   : > { %v6961_v27 = vpop.eup %6960 }
 0xccb   : > { %v4798_v48 = vmul.f32 %v6961_v27, %v8879_v55 }
 0xccd   : > { %v4810_v11 = vmul.f32 %v5817_v15, %v4798_v48 }
 0xcce   : > { %v6963_v31 = vpop.eup %6962 }
 0xccf   : > { %v4799_v0 = vmul.f32 %v6963_v31, %v8883_v51  ;;  %v6965_v62 = vpop.eup %6964  ;;  %v8923_v56 = vadd.f32 %v5818_v2, %v4810_v11 }
 0xcd0   : > { %v4800_v13 = vmul.f32 %v6965_v62, %v8886_v22  ;;  %v6675_v22 = vld [vmem:[#allocation22 + $0x10] sm:$0xff]  }
 0xcd1   : > { %v4811_v16 = vmul.f32 %v5817_v15, %v4799_v0  ;;  %6089 = vmatpush3.bf16.msra.mxu0 %v6675_v22 }
 0xcd2   : > { %v6967_v32 = vpop.eup %6966  ;;  %v4812_v55 = vmul.f32 %v5817_v15, %v4800_v13 }
 0xcd3   : > { %v8925_v34 = vadd.f32 %v5818_v2, %v4811_v16  ;;  %v4801_v44 = vmul.f32 %v6967_v32, %v8893_v19  ;;  %v6676_v19 = vld [vmem:[#allocation22 + $0x48] sm:$0xff]  }
 0xcd4   : > { %v8934_v37 = vadd.f32 %v5818_v2, %v4812_v55  ;;  %6090 = vmatprep.subr.bf16.mxu0 %v6676_v19 }
 0xcd5   : > { %v4828_v8 = vpack.c.bf16 %v8925_v34, %v8923_v56  ;;  %v4813_v7 = vmul.f32 %v5817_v15, %v4801_v44  ;;  %6091 = vmatpush3.bf16.msra.mxu0 %v6677_v63 }
 0xcd6   : > { %6092 = vmatprep.subr.bf16.mxu0 %v6678_v61 }
 0xcd7   : > { %4991 = vmatmul.mubr.bf16.gmra.mxu1 %v4828_v8  ;;  %v8932_v51 = vadd.f32 %v5818_v2, %v4813_v7 }
 0xcd8   : > { %5000 = vmatprep.mubr.bf16.mxu1 %v9136_v54  ;;  %v4846_v54 = vld [vmem:[%s9140_s6] sm:$0x3]  ;;  %s7309_s6 = scalar_lea.vmem %s8997_s8, 1024 }
 0xcd9   : > { %v4829_v57 = vpack.c.bf16 %v8932_v51, %v8934_v37  ;;  %6093 = vmatpush3.bf16.msra.mxu0 %v6679_v41  ;;  %v4855_v4 = vrot.slane %v4846_v54, %v9141_v60  ;;  %v4851_v38 = vrot.slane %v4846_v54, %v9142_v25  ;;  %p7310_p2 = scmp.ne.s32.totalorder %s8997_s8, %s7309_s6  ;;  %p7317_p10 = scmp.lt.s32.totalorder %s7315_s1, %s7309_s6 }
 0xcdb   : > { %p7311_p3 = pnand %p7310_p2, %p9145_p7  ;;  %p7318_p11 = por %p7317_p10, %p7316_p0 }
 0xcdd   : > { %p7312_p4 = pneg %p7311_p3 }
 0xcdf   : > { %5001 = vmatmul.mubr.bf16.gmra.mxu1 %v4829_v57  ;;  %p7319_p12 = pnand %p7318_p11, %p7312_p4 }
 0xd76   : > { %v4972_v42 = vpop.f32.mrf.mxu1 }
 0xd77   : > { %v4973_v15 = vadd.f32 %v4972_v42, %v4851_v38 }
 0xd78   : > { %v4974_v9 = vpop.f32.mrf.mxu1 }
 0xd79   : > { %v4975_v33 = vadd.f32 %v4974_v9, %v4855_v4  ;;  %v5011_v23 = vmax.f32 %v4973_v15, 0.0 }
 0xd7a   : > { %v4976_v39 = vpop.f32.mrf.mxu1 }
 0xd7b   : > { %v4977_v10 = vadd.f32 %v4976_v39, %v4851_v38  ;;  %v5012_v2 = vmax.f32 %v4975_v33, 0.0  ;;  %v5835_v33 = vld [vmem:[%s9143_s10] ss:$0 sm:$0xff] }
 0xd7c   : > { %v4978_v20 = vpop.f32.mrf.mxu1 }
 0xd7d   : > { %v4979_v45 = vadd.f32 %v4978_v20, %v4855_v4  ;;  %v5013_v17 = vmax.f32 %v4977_v10, 0.0 }
 0xd7e   : > { %v4982_v18 = vpop.f32.mrf.mxu1 }
 0xd7f   : > { %v5014_v40 = vmax.f32 %v4979_v45, 0.0  ;;  %v5027_v43 = vpack.c.bf16 %v5013_v17, %v5011_v23  ;;  %v4983_v35 = vadd.f32 %v4982_v18, %v4851_v38 }
 0xd80   : > { %v4984_v28 = vpop.f32.mrf.mxu1 }
 0xd81   : > { %v5028_v59 = vpack.c.bf16 %v5014_v40, %v5012_v2  ;;  %v4985_v12 = vadd.f32 %v4984_v28, %v4855_v4  ;;  %v5015_v53 = vmax.f32 %v4983_v35, 0.0 }
 0xd82   : > { %v4986_v5 = vpop.f32.mrf.mxu1 }
 0xd83   : > { %v4987_v46 = vadd.f32 %v4986_v5, %v4851_v38  ;;  %5202 = vmatprep.mubr.bf16.mxu0 %v5028_v59  ;;  %v5016_v24 = vmax.f32 %v4985_v12, 0.0 }
 0xd84   : > { %v4988_v49 = vpop.f32.mrf.mxu1  ;;  %5203 = vmatmul.mubr.bf16.vlgmr.msra.gmra.mxu0 %v5027_v43 }
 0xd85   : > { %v4989_v29 = vadd.f32 %v4988_v49, %v4855_v4  ;;  %v5017_v21 = vmax.f32 %v4987_v46, 0.0 }
 0xd87   : > { %v5018_v36 = vmax.f32 %v4989_v29, 0.0  ;;  %v5029_v30 = vpack.c.bf16 %v5017_v21, %v5015_v53 }
 0xd89   : > { %v5030_v50 = vpack.c.bf16 %v5018_v36, %v5016_v24 }
 0xd8b   : > { %5210 = vmatprep.mubr.bf16.mxu0 %v5030_v50 }
 0xd8c   : > { %5211 = vmatmul.mubr.bf16.gmra.mxu0 %v5029_v30 }
 0xd97   : > { %v4992_v1 = vpop.f32.mrf.mxu1 }
 0xd98   : > { %v4993_v31 = vadd.f32 %v4992_v1, %v4851_v38 }
 0xd99   : > { %v4994_v6 = vpop.f32.mrf.mxu1 }
 0xd9a   : > { %v4995_v27 = vadd.f32 %v4994_v6, %v4855_v4  ;;  %v5019_v44 = vmax.f32 %v4993_v31, 0.0 }
 0xd9b   : > { %v4996_v3 = vpop.f32.mrf.mxu1 }
 0xd9c   : > { %v4997_v48 = vadd.f32 %v4996_v3, %v4851_v38  ;;  %v5020_v32 = vmax.f32 %v4995_v27, 0.0 }
 0xd9d   : > { %v4998_v0 = vpop.f32.mrf.mxu1 }
 0xd9e   : > { %v4999_v11 = vadd.f32 %v4998_v0, %v4855_v4  ;;  %v5021_v62 = vmax.f32 %v4997_v48, 0.0 }
 0xd9f   : > { %v5002_v16 = vpop.f32.mrf.mxu1 }
 0xda0   : > { %v5022_v13 = vmax.f32 %v4999_v11, 0.0  ;;  %v5031_v55 = vpack.c.bf16 %v5021_v62, %v5019_v44  ;;  %v5003_v19 = vadd.f32 %v5002_v16, %v4851_v38 }
 0xda1   : > { %v5004_v8 = vpop.f32.mrf.mxu1 }
 0xda2   : > { %v5032_v7 = vpack.c.bf16 %v5022_v13, %v5020_v32  ;;  %v5005_v58 = vadd.f32 %v5004_v8, %v4855_v4  ;;  %v5023_v60 = vmax.f32 %v5003_v19, 0.0 }
 0xda3   : > { %v5006_v57 = vpop.f32.mrf.mxu1 }
 0xda4   : > { %v5007_v22 = vadd.f32 %v5006_v57, %v4851_v38  ;;  %5218 = vmatprep.mubr.bf16.mxu0 %v5032_v7  ;;  %v5024_v54 = vmax.f32 %v5005_v58, 0.0 }
 0xda5   : > { %v5008_v63 = vpop.f32.mrf.mxu1  ;;  %5219 = vmatmul.mubr.bf16.gmra.mxu0 %v5031_v55 }
 0xda6   : > { %v5009_v61 = vadd.f32 %v5008_v63, %v4855_v4  ;;  %v5025_v41 = vmax.f32 %v5007_v22, 0.0 }
 0xda8   : > { %v5026_v42 = vmax.f32 %v5009_v61, 0.0  ;;  %v5033_v9 = vpack.c.bf16 %v5025_v41, %v5023_v60 }
 0xdaa   : > { %v5034_v25 = vpack.c.bf16 %v5026_v42, %v5024_v54 }
 0xdac   : > { %5226 = vmatprep.mubr.bf16.mxu0 %v5034_v25 }
 0xdad   : > { %5227 = vmatmul.mubr.bf16.gmra.mxu0 %v5033_v9 }
 0xe44   : > { %v6094_v39 = vpop.f32.mrf.mxu0 }
 0xe46   : > { %v6095_v10 = vpop.f32.mrf.mxu0 }
 0xe47   : > { %v6096_v15 = vadd.f32 %v6095_v10, %v6094_v39 }
 0xe48   : > { %v6097_v20 = vpop.f32.mrf.mxu0 }
 0xe49   : > { %v5205_v38 = vadd.f32 %v6096_v15, %v5835_v33 }
 0xe4a   : > { %v6098_v45 = vpop.f32.mrf.mxu0 }
 0xe4b   : > { %v6099_v17 = vadd.f32 %v6098_v45, %v6097_v20  ;;  %v5235_v4 = vadd.f32 %v5205_v38, %v8905_v26 }
 0xe4c   : > { %v6100_v18 = vpop.f32.mrf.mxu0 }
 0xe4d   : > { %v5208_v2 = vadd.f32 %v6099_v17, %v5835_v33  ;;  %5245 = vadd.xlane.f32.xlu0 %v5235_v4 }
 0xe4e   : > { %v6101_v40 = vpop.f32.mrf.mxu0 }
 0xe4f   : > { %v6102_v23 = vadd.f32 %v6101_v40, %v6100_v18  ;;  %v5236_v28 = vadd.f32 %v5208_v2, %v8907_v47 }
 0xe50   : > { %v6103_v59 = vpop.f32.mrf.mxu0 }
 0xe51   : > { %v5213_v43 = vadd.f32 %v6102_v23, %v5835_v33  ;;  %5247 = vadd.xlane.f32.xlu1 %v5236_v28 }
 0xe52   : > { %v6104_v5 = vpop.f32.mrf.mxu0 }
 0xe53   : > { %v6105_v12 = vadd.f32 %v6104_v5, %v6103_v59  ;;  %v5237_v46 = vadd.f32 %v5213_v43, %v8916_v52 }
 0xe55   : > { %v5216_v35 = vadd.f32 %v6105_v12, %v5835_v33  ;;  %5249 = vadd.xlane.f32.xlu0 %v5237_v46 }
 0xe57   : > { %v5238_v49 = vadd.f32 %v5216_v35, %v8914_v14 }
 0xe59   : > { %5251 = vadd.xlane.f32.xlu1 %v5238_v49 }
 0xe65   : > { %v6106_v26 = vpop.f32.mrf.mxu0 }
 0xe67   : > { %v6107_v29 = vpop.f32.mrf.mxu0 }
 0xe68   : > { %v6108_v21 = vadd.f32 %v6107_v29, %v6106_v26  ;;  %v5852_v29 = vld [vmem:[%s9056_s16 + $0x2] ss:$0 sm:$0xff] }
 0xe69   : > { %v6109_v24 = vpop.f32.mrf.mxu0 }
 0xe6a   : > { %v5221_v36 = vadd.f32 %v6108_v21, %v5835_v33 }
 0xe6b   : > { %v6110_v53 = vpop.f32.mrf.mxu0 }
 0xe6c   : > { %v6111_v50 = vadd.f32 %v6110_v53, %v6109_v24  ;;  %v5239_v47 = vadd.f32 %v5221_v36, %v8923_v56  ;;  %v5853_v24 = vld [vmem:[%s9132_s24 + $0x2] ss:$0 sm:$0xff] }
 0xe6d   : > { %v6112_v30 = vpop.f32.mrf.mxu0 }
 0xe6e   : > { %v5224_v1 = vadd.f32 %v6111_v50, %v5835_v33  ;;  %5253 = vadd.xlane.f32.xlu0 %v5239_v47 }
 0xe6f   : > { %v6113_v6 = vpop.f32.mrf.mxu0 }
 0xe70   : > { %v6114_v3 = vadd.f32 %v6113_v6, %v6112_v30  ;;  %v5240_v52 = vadd.f32 %v5224_v1, %v8925_v34 }
 0xe71   : > { %v6115_v27 = vpop.f32.mrf.mxu0 }
 0xe72   : > { %v5229_v48 = vadd.f32 %v6114_v3, %v5835_v33  ;;  %5255 = vadd.xlane.f32.xlu1 %v5240_v52 }
 0xe73   : > { %v6116_v14 = vpop.f32.mrf.mxu0 }
 0xe74   : > { %v6117_v31 = vadd.f32 %v6116_v14, %v6115_v27  ;;  %v5241_v0 = vadd.f32 %v5229_v48, %v8934_v37 }
 0xe76   : > { %v5232_v11 = vadd.f32 %v6117_v31, %v5835_v33  ;;  %5257 = vadd.xlane.f32.xlu0 %v5241_v0 }
 0xe78   : > { %v5242_v62 = vadd.f32 %v5232_v11, %v8932_v51 }
 0xe7a   : > { %5259 = vadd.xlane.f32.xlu1 %v5242_v62 }
 0xed6   : > { %v5246_v56 = vpop.xlane.xlu0 %5245 }
 0xed7   : > { %v5261_v16 = vmul.f32 0.0078125, %v5246_v56 }
 0xed9   : > { %v5269_v32 = vsub.f32 %v5235_v4, %v5261_v16 }
 0xeda   : > { %v5248_v13 = vpop.xlane.xlu1 %5247 }
 0xedb   : > { %v5262_v44 = vmul.f32 0.0078125, %v5248_v13  ;;  %v5277_v8 = vmul.f32 %v5269_v32, %v5269_v32 }
 0xedd   : > { %v5270_v7 = vsub.f32 %v5236_v28, %v5262_v44  ;;  %5285 = vadd.xlane.f32.xlu0 %v5277_v8 }
 0xede   : > { %v5250_v34 = vpop.xlane.xlu0 %5249 }
 0xedf   : > { %v5263_v55 = vmul.f32 0.0078125, %v5250_v34  ;;  %v5278_v57 = vmul.f32 %v5270_v7, %v5270_v7 }
 0xee1   : > { %v5271_v58 = vsub.f32 %v5237_v46, %v5263_v55  ;;  %5287 = vadd.xlane.f32.xlu1 %v5278_v57 }
 0xee2   : > { %v5252_v22 = vpop.xlane.xlu1 %5251 }
 0xee3   : > { %v5264_v37 = vmul.f32 0.0078125, %v5252_v22  ;;  %v5279_v19 = vmul.f32 %v5271_v58, %v5271_v58 }
 0xee5   : > { %v5272_v63 = vsub.f32 %v5238_v49, %v5264_v37  ;;  %5289 = vadd.xlane.f32.xlu0 %v5279_v19 }
 0xee7   : > { %v5280_v51 = vmul.f32 %v5272_v63, %v5272_v63 }
 0xee9   : > { %5291 = vadd.xlane.f32.xlu1 %v5280_v51 }
 0xef7   : > { %v5254_v61 = vpop.xlane.xlu0 %5253 }
 0xef8   : > { %v5265_v41 = vmul.f32 0.0078125, %v5254_v61 }
 0xefa   : > { %v8954_v54 = vsub.f32 %v5239_v47, %v5265_v41 }
 0xefb   : > { %v5256_v42 = vpop.xlane.xlu1 %5255 }
 0xefc   : > { %v5266_v60 = vmul.f32 0.0078125, %v5256_v42  ;;  %v5281_v25 = vmul.f32 %v8954_v54, %v8954_v54 }
 0xefe   : > { %v8958_v9 = vsub.f32 %v5240_v52, %v5266_v60  ;;  %5293 = vadd.xlane.f32.xlu0 %v5281_v25 }
 0xeff   : > { %v5258_v39 = vpop.xlane.xlu0 %5257 }
 0xf00   : > { %v5267_v33 = vmul.f32 0.0078125, %v5258_v39  ;;  %v5282_v10 = vmul.f32 %v8958_v9, %v8958_v9 }
 0xf02   : > { %v8962_v15 = vsub.f32 %v5241_v0, %v5267_v33  ;;  %5295 = vadd.xlane.f32.xlu1 %v5282_v10 }
 0xf03   : > { %v5260_v20 = vpop.xlane.xlu1 %5259 }
 0xf04   : > { %v5268_v38 = vmul.f32 0.0078125, %v5260_v20  ;;  %v5283_v45 = vmul.f32 %v8962_v15, %v8962_v15 }
 0xf06   : > { %v8966_v17 = vsub.f32 %v5242_v62, %v5268_v38  ;;  %5297 = vadd.xlane.f32.xlu0 %v5283_v45 }
 0xf08   : > { %v5284_v4 = vmul.f32 %v8966_v17, %v8966_v17 }
 0xf0a   : > { %5299 = vadd.xlane.f32.xlu1 %v5284_v4 }
 0xf66   : > { %v5286_v18 = vpop.xlane.xlu0 %5285 }
 0xf67   : > { %v5301_v2 = vmul.f32 0.0078125, %v5286_v18 }
 0xf69   : > { %v5309_v40 = vadd.f32 1e-05, %v5301_v2 }
 0xf6a   : > { %v5288_v23 = vpop.xlane.xlu1 %5287 }
 0xf6b   : > { %6968 = vrsqrt.f32 %v5309_v40  ;;  %v5302_v28 = vmul.f32 0.0078125, %v5288_v23 }
 0xf6d   : > { %v5310_v59 = vadd.f32 1e-05, %v5302_v28 }
 0xf6e   : > { %v5290_v43 = vpop.xlane.xlu0 %5289 }
 0xf6f   : > { %6970 = vrsqrt.f32 %v5310_v59  ;;  %v5303_v5 = vmul.f32 0.0078125, %v5290_v43 }
 0xf71   : > { %v5311_v12 = vadd.f32 1e-05, %v5303_v5 }
 0xf72   : > { %v5292_v46 = vpop.xlane.xlu1 %5291 }
 0xf73   : > { %6972 = vrsqrt.f32 %v5311_v12  ;;  %v5304_v35 = vmul.f32 0.0078125, %v5292_v46 }
 0xf75   : > { %v5312_v49 = vadd.f32 1e-05, %v5304_v35 }
 0xf77   : > { %6974 = vrsqrt.f32 %v5312_v49 }
 0xf78   : > { %v6969_v26 = vpop.eup %6968 }
 0xf79   : > { %v5325_v21 = vmul.f32 %v6969_v26, %v5269_v32 }
 0xf7b   : > { %v5337_v36 = vmul.f32 %v5852_v29, %v5325_v21 }
 0xf7c   : > { %v6971_v53 = vpop.eup %6970 }
 0xf7d   : > { %v5349_v50 = vadd.f32 %v5853_v24, %v5337_v36  ;;  %v5326_v47 = vmul.f32 %v6971_v53, %v5270_v7 }
 0xf7f   : > { %5357 = vst [vmem:[%s8977_s4] sm:$0xff] %v5349_v50  ;;  %v5338_v30 = vmul.f32 %v5852_v29, %v5326_v47 }
 0xf80   : > { %v6973_v1 = vpop.eup %6972 }
 0xf81   : > { %v5350_v6 = vadd.f32 %v5853_v24, %v5338_v30  ;;  %v5327_v3 = vmul.f32 %v6973_v1, %v5271_v58 }
 0xf83   : > { %5358 = vst [vmem:[%s8977_s4 + $0x8] sm:$0xff] %v5350_v6  ;;  %v5339_v52 = vmul.f32 %v5852_v29, %v5327_v3 }
 0xf84   : > { %v6975_v27 = vpop.eup %6974 }
 0xf85   : > { %v5351_v48 = vadd.f32 %v5853_v24, %v5339_v52  ;;  %v5328_v14 = vmul.f32 %v6975_v27, %v5272_v63 }
 0xf87   : > { %5359 = vst [vmem:[%s8977_s4 + $0x10] sm:$0xff] %v5351_v48  ;;  %v5340_v31 = vmul.f32 %v5852_v29, %v5328_v14  ;;  %v5294_v0 = vpop.xlane.xlu0 %5293 }
 0xf88   : > { %v5305_v11 = vmul.f32 0.0078125, %v5294_v0 }
 0xf89   : > { %v5352_v62 = vadd.f32 %v5853_v24, %v5340_v31 }
 0xf8a   : > { %v5313_v56 = vadd.f32 1e-05, %v5305_v11 }
 0xf8b   : > { %5360 = vst [vmem:[%s8977_s4 + $0x18] sm:$0xff] %v5352_v62  ;;  %v5296_v16 = vpop.xlane.xlu1 %5295 }
 0xf8c   : > { %6976 = vrsqrt.f32 %v5313_v56  ;;  %v5306_v32 = vmul.f32 0.0078125, %v5296_v16 }
 0xf8e   : > { %v5314_v13 = vadd.f32 1e-05, %v5306_v32 }
 0xf8f   : > { %v5298_v44 = vpop.xlane.xlu0 %5297 }
 0xf90   : > { %6978 = vrsqrt.f32 %v5314_v13  ;;  %v5307_v8 = vmul.f32 0.0078125, %v5298_v44 }
 0xf92   : > { %v5315_v7 = vadd.f32 1e-05, %v5307_v8 }
 0xf93   : > { %v5300_v34 = vpop.xlane.xlu1 %5299 }
 0xf94   : > { %6980 = vrsqrt.f32 %v5315_v7  ;;  %v5308_v55 = vmul.f32 0.0078125, %v5300_v34 }
 0xf96   : > { %v5316_v57 = vadd.f32 1e-05, %v5308_v55 }
 0xf98   : > { %6982 = vrsqrt.f32 %v5316_v57 }
 0xf99   : > { %v6977_v58 = vpop.eup %6976 }
 0xf9a   : > { %v5329_v22 = vmul.f32 %v6977_v58, %v8954_v54 }
 0xf9c   : > { %v5341_v37 = vmul.f32 %v5852_v29, %v5329_v22 }
 0xf9d   : > { %v6979_v19 = vpop.eup %6978 }
 0xf9e   : > { %v5353_v63 = vadd.f32 %v5853_v24, %v5341_v37  ;;  %v5330_v51 = vmul.f32 %v6979_v19, %v8958_v9 }
 0xfa0   : > { %5361 = vst [vmem:[%s8977_s4 + $0x20] sm:$0xff] %v5353_v63  ;;  %v5342_v61 = vmul.f32 %v5852_v29, %v5330_v51 }
 0xfa1   : > { %v6981_v41 = vpop.eup %6980 }
 0xfa2   : > { %v5354_v42 = vadd.f32 %v5853_v24, %v5342_v61  ;;  %v5331_v60 = vmul.f32 %v6981_v41, %v8962_v15 }
 0xfa4   : > { %5362 = vst [vmem:[%s8977_s4 + $0x28] sm:$0xff] %v5354_v42  ;;  %v5343_v25 = vmul.f32 %v5852_v29, %v5331_v60 }
 0xfa5   : > { %v6983_v39 = vpop.eup %6982 }
 0xfa6   : > { %v5355_v54 = vadd.f32 %v5853_v24, %v5343_v25  ;;  %v5332_v33 = vmul.f32 %v6983_v39, %v8966_v17 }
 0xfa8   : > { %5363 = vst [vmem:[%s8977_s4 + $0x30] sm:$0xff] %v5355_v54  ;;  %v5344_v10 = vmul.f32 %v5852_v29, %v5332_v33 }
 0xfaa   : > { %v5356_v9 = vadd.f32 %v5853_v24, %v5344_v10 }
 0xfac   : > { %5364 = vst [vmem:[%s8977_s4 + $0x38] sm:$0xff] %v5356_v9 }
 0xfad   : > { %7322 = shalt.err (!%p7319_p12)
}
 0xfae   : > { %s7323_s10 = scalar_lea.hbm %s8995_s3, 1024  ;;  %s7327_s5 = scalar_lea.hbm %s9144_s11, 4096 }
 0xfaf   : > { %p7324_p13 = scmp.ne.s32.totalorder %s8995_s3, %s7323_s10  ;;  %p7328_p9 = scmp.lt.s32.totalorder %s8995_s3, %s9144_s11 }
 0xfb0   : > { %p7329_p1 = scmp.lt.s32.totalorder %s7327_s5, %s7323_s10 }
 0xfb1   : > { %p7325_p6 = pnand %p7324_p13, %p9145_p7 }
 0xfb2   : > { %p7330_p5 = por %p7329_p1, %p7328_p9 }
 0xfb3   : > { %p7326_p8 = pneg %p7325_p6 }
 0xfb5   : > { %p7331_p2 = pnand %p7330_p5, %p7326_p8 }
 0xfb7   : > { %7334 = shalt.err (!%p7331_p2)
}
 0xfb8   : > { %s7424_s27 = smov 128   ;;  %s7425_s23 = smov 8  }
 0xfb9   : > { %6418 = dma.vmem_to_hbm [thread:$0]  (%p9145_p7), %s8997_s8, 1024, %s8995_s3, %s5366_s17, %s7424_s27, %s7424_s27, %s7425_s23  }
 0xfba PF: > { %p6483_p3 = scmp.ge.s32.totalorder %s7401_s21, 2  ;;  %s5394_s25 = sand.u32 1, %s7389_s0  }
 0xfbb   : > { %p9146_p4 = scmp.ne.s32.totalorder %s9111_s22, 0  ;;  %s5395_s6 = scalar_lea.sflag [#allocation6], %s5394_s25 }
 0xfbd   : > { %p6459_p0 = pnand %p6483_p3, %p9146_p4 }
 0xfbf   : > { %p6460_p10 = pneg %p6459_p0 }
 0xfc1   : > { %7384 = dma.done.wait (%p6460_p10), %s5395_s6, 1024  }
 0xfc2   : > { %7386 = vsyncadd (%p6460_p10), %s5395_s6, 4294966272  ;;  %p40_p11 = scmp.ge.s32.totalorder %s7668_s28, 6   ;;  %s9147_s0 = smov %s7393_s30 }
 0xfc3   : > { %s9148_s30 = smov %s7397_s20  ;;  %s9149_s20 = smov %s7679_s13 }
 0xfc4   : > { %s9150_s21 = smov %s7668_s28  ;;  %42 = sbr.rel (!%p40_p11) target bundleno = 31 (0x1f), region = 201 }
 0xfc9   :  { %5400 = vsyncpa [#allocation5], 1 }
 0xfca   :  { %5402 = vsyncpa [#allocation5 + $0x1], 1 }
 0xfcb   :  { %5403 = vsyncpa [#allocation8], 1 }
 0xfcc   :  { %5405 = vsyncpa [#allocation8 + $0x1], 1 }
 0xfcd   :  { %5406 = vsyncpa [#allocation11], 1 }
 0xfce   :  { %5407 = vsyncpa [#allocation14], 1 }
 0xfcf   :  { %5408 = vsyncpa [#allocation17], 1 }
 0xfd0   :  { %5409 = vsyncpa [#allocation20], 1 }
 0xfd1   :  { %5410 = vsyncpa [#allocation23], 1 }
 0xfd2   :  { %5411 = vsyncpa [#allocation6], 1 }
 0xfd3   :  { %5413 = vsyncpa [#allocation6 + $0x1], 1 }

</bundles_post_ra>
